<compile_context>
chip_gen: v6e
topology: v6e:2x2x1
jax: 0.10.0
libtpu: 0.0.40
codegen_flags: <defaults>
</compile_context>

<pallas_src>
import functools

import jax
import jax.numpy as jnp
from jax.experimental import pallas as pl
from jax.experimental.pallas import tpu as pltpu


# ----------------------------------------------------------------------------
# small static helpers
# ----------------------------------------------------------------------------
def _round_up(n, m):
    return ((n + m - 1) // m) * m


def _pick_time_block(seq_len, max_tb=32):
    """Time-block size.  With Bp=8 sublanes, max_tb=32 gives TB*Bp ~= 256 rows
    (fills v6e/v7x MXU M dim; v5e's 128-wide MXU is saturated either way).
    The sequence is padded up to a multiple of TB and tail steps are masked
    in-kernel, so awkward lengths never degrade TB.  Kept even so TB*Bp is a
    bf16 (16,128) tile multiple."""
    return min(max_tb, _round_up(seq_len, 2))


# ----------------------------------------------------------------------------
# Pallas kernels
# ----------------------------------------------------------------------------
def _gru_encoder_kernel(x_ref, wih_ref, whh_ref, bi_ref, bhn_ref, h0_ref,
                        hT_ref, gi_scr, *, hidden, time_block, batch,
                        seq_len, mask_tail):
    """One grid step == one time *block* of a single-layer GRU (gate order
    r,z,n).  The input projection for the whole block is ONE batched matmul
    (off the serial path); only h @ W_hh is per-step.  The hidden state is
    carried in the resident hT output block."""
    @pl.when(pl.program_id(0) == 0)
    def _():
        hT_ref[...] = h0_ref[...]

    H = hidden
    B = batch

    # Hoisted, MXU-filling batched input projection (bf16 in, f32 acc).
    gi_scr[...] = jnp.dot(x_ref[...], wih_ref[...],
                          preferred_element_type=jnp.float32) + bi_ref[...]

    @pl.loop(0, time_block, unroll=True)
    def _(i):
        h = hT_ref[...]                                     # (Bp, Hp) f32 carry
        row = pl.multiple_of(i * B, B)
        gi = gi_scr[pl.ds(row, B), :]                       # (Bp, 3Hp) f32
        gh = jnp.dot(h.astype(jnp.bfloat16), whh_ref[...],
                     preferred_element_type=jnp.float32)
        r = jax.nn.sigmoid(gi[:, :H] + gh[:, :H])
        z = jax.nn.sigmoid(gi[:, H:2 * H] + gh[:, H:2 * H])
        n = jnp.tanh(gi[:, 2 * H:] + r * (gh[:, 2 * H:] + bhn_ref[...]))
        h_new = (1.0 - z) * n + z * h
        if mask_tail:                                       # static python flag
            h_new = jnp.where((pl.program_id(0) * time_block + i) < seq_len,
                              h_new, h)
        hT_ref[...] = h_new


def _gru_decoder_kernel(x_ref, gic_ref, wx_ref, whh_ref, bhn_ref, h0_ref,
                        wd_ref, bd_ref, out_ref, hT_ref, gi_scr, hs_scr,
                        *, hidden, time_block, batch, seq_len, mask_tail):
    """GRU step on [x_t ; context].  The context projection (c @ Wc + biases)
    is time-invariant and precomputed (gic_ref).  Grid = (time blocks, vocab
    tiles); the serial recurrence runs only on the first vocab tile, hidden
    states of the block are staged in VMEM and projected with ONE batched,
    lane-dense matmul per (time block, vocab tile)."""
    b_idx = pl.program_id(0)
    v_idx = pl.program_id(1)
    H = hidden
    B = batch

    @pl.when(jnp.logical_and(b_idx == 0, v_idx == 0))
    def _():
        hT_ref[...] = h0_ref[...]

    @pl.when(v_idx == 0)
    def _():
        # Hoisted batched input projection for the whole time block.
        gi_scr[...] = jnp.dot(x_ref[...], wx_ref[...],
                              preferred_element_type=jnp.float32)

        @pl.loop(0, time_block, unroll=True)
        def _(i):
            h = hT_ref[...]                                 # (Bp, Hp) f32 carry
            row = pl.multiple_of(i * B, B)
            gi = gi_scr[pl.ds(row, B), :] + gic_ref[...]
            gh = jnp.dot(h.astype(jnp.bfloat16), whh_ref[...],
                         preferred_element_type=jnp.float32)
            r = jax.nn.sigmoid(gi[:, :H] + gh[:, :H])
            z = jax.nn.sigmoid(gi[:, H:2 * H] + gh[:, H:2 * H])
            n = jnp.tanh(gi[:, 2 * H:] + r * (gh[:, 2 * H:] + bhn_ref[...]))
            h_new = (1.0 - z) * n + z * h
            if mask_tail:                                   # static python flag
                h_new = jnp.where((b_idx * time_block + i) < seq_len, h_new, h)
            hT_ref[...] = h_new
            hs_scr[pl.ds(row, B), :] = h_new

    # Batched, lane-dense vocab projection for the whole time block / tile.
    logits = jnp.dot(hs_scr[...].astype(jnp.bfloat16), wd_ref[...],
                     preferred_element_type=jnp.float32) + bd_ref[...]
    out_ref[...] = logits.astype(out_ref.dtype)


# ----------------------------------------------------------------------------
# pallas_call wrappers (all shapes already padded to (8, 128) multiples)
# ----------------------------------------------------------------------------
_VMEM_LIMIT = 48 * 1024 * 1024   # above default scoped limits, below v7x 64MiB


def gru_encoder(x_2d, w_ih, w_hh, bias_i, bias_hn, h0, *, time_block, seq_len):
    SBp, Ep = x_2d.shape
    Bp, Hp = h0.shape
    n_blocks = SBp // (time_block * Bp)
    mask_tail = (n_blocks * time_block) != seq_len
    hT = pl.pallas_call(
        functools.partial(_gru_encoder_kernel, hidden=Hp, time_block=time_block,
                          batch=Bp, seq_len=seq_len, mask_tail=mask_tail),
        out_shape=jax.ShapeDtypeStruct((Bp, Hp), jnp.float32),
        grid_spec=pltpu.PrefetchScalarGridSpec(
            num_scalar_prefetch=0,
            grid=(n_blocks,),
            in_specs=[
                pl.BlockSpec((time_block * Bp, Ep), lambda b: (b, 0)),
                pl.BlockSpec((Ep, 3 * Hp), lambda b: (0, 0)),
                pl.BlockSpec((Hp, 3 * Hp), lambda b: (0, 0)),
                pl.BlockSpec((1, 3 * Hp), lambda b: (0, 0)),
                pl.BlockSpec((1, Hp), lambda b: (0, 0)),
                pl.BlockSpec((Bp, Hp), lambda b: (0, 0)),
            ],
            out_specs=pl.BlockSpec((Bp, Hp), lambda b: (0, 0)),
            scratch_shapes=[pltpu.VMEM((time_block * Bp, 3 * Hp), jnp.float32)],
        ),
        compiler_params=pltpu.CompilerParams(
            dimension_semantics=("arbitrary",),
            vmem_limit_bytes=_VMEM_LIMIT),
    )(x_2d, w_ih, w_hh, bias_i, bias_hn, h0)
    return hT


def gru_decoder(x_2d, gi_ctx, w_x, w_hh, bias_hn, h0, w_dense, b_dense,
                *, time_block, seq_len, vocab_tile):
    SBp, Ep = x_2d.shape
    Bp, Hp = h0.shape
    Vp = w_dense.shape[-1]
    n_blocks = SBp // (time_block * Bp)
    n_vtiles = Vp // vocab_tile
    mask_tail = (n_blocks * time_block) != seq_len
    out, hT = pl.pallas_call(
        functools.partial(_gru_decoder_kernel, hidden=Hp, time_block=time_block,
                          batch=Bp, seq_len=seq_len, mask_tail=mask_tail),
        out_shape=(jax.ShapeDtypeStruct((SBp, Vp), jnp.float32),
                   jax.ShapeDtypeStruct((Bp, Hp), jnp.float32)),
        grid_spec=pltpu.PrefetchScalarGridSpec(
            num_scalar_prefetch=0,
            grid=(n_blocks, n_vtiles),
            in_specs=[
                pl.BlockSpec((time_block * Bp, Ep), lambda b, v: (b, 0)),
                pl.BlockSpec((Bp, 3 * Hp), lambda b, v: (0, 0)),
                pl.BlockSpec((Ep, 3 * Hp), lambda b, v: (0, 0)),
                pl.BlockSpec((Hp, 3 * Hp), lambda b, v: (0, 0)),
                pl.BlockSpec((1, Hp), lambda b, v: (0, 0)),
                pl.BlockSpec((Bp, Hp), lambda b, v: (0, 0)),
                pl.BlockSpec((Hp, vocab_tile), lambda b, v: (0, v)),
                pl.BlockSpec((1, vocab_tile), lambda b, v: (0, v)),
            ],
            out_specs=[
                pl.BlockSpec((time_block * Bp, vocab_tile), lambda b, v: (b, v)),
                pl.BlockSpec((Bp, Hp), lambda b, v: (0, 0)),
            ],
            scratch_shapes=[
                pltpu.VMEM((time_block * Bp, 3 * Hp), jnp.float32),
                pltpu.VMEM((time_block * Bp, Hp), jnp.float32),
            ],
        ),
        compiler_params=pltpu.CompilerParams(
            dimension_semantics=("arbitrary", "arbitrary"),
            vmem_limit_bytes=_VMEM_LIMIT),
    )(x_2d, gi_ctx, w_x, w_hh, bias_hn, h0, w_dense, b_dense)
    return out, hT


# ----------------------------------------------------------------------------
# weight / bias packing (plain JAX, constant-folded under jit)
# ----------------------------------------------------------------------------
def _pack_gate_weights(w, in_pad, out_pad):
    """(3, In, H) -> (in_pad, 3*out_pad), each gate zero-padded to out_pad lanes."""
    cols = []
    for k in range(3):
        g = w[k]
        g = jnp.pad(g, ((0, in_pad - g.shape[0]), (0, out_pad - g.shape[1])))
        cols.append(g)
    return jnp.concatenate(cols, axis=1)


def _pack_input_bias(b_ih, b_hh, out_pad):
    """b_ih (+ b_hh folded in for r,z; b_hh[n] stays inside the r-scaled term)."""
    cols = []
    for k in range(3):
        b = (b_ih[k] + b_hh[k]) if k < 2 else b_ih[k]
        b = jnp.pad(b, ((0, 0), (0, out_pad - b.shape[1])))
        cols.append(b)
    return jnp.concatenate(cols, axis=1)          # (1, 3*out_pad)


def _context_gates(context, w_c, b_ih, b_hh, b_pad, h_pad):
    """Time-invariant decoder term: c @ Wc + b_ih (+ b_hh for r,z), padded."""
    cols = []
    for k in range(3):
        g = context @ w_c[k] + b_ih[k]
        if k < 2:
            g = g + b_hh[k]
        g = jnp.pad(g, ((0, b_pad - g.shape[0]), (0, h_pad - g.shape[1])))
        cols.append(g)
    return jnp.concatenate(cols, axis=1)          # (b_pad, 3*h_pad)


def _gather_padded_tokens(emb_padded, tok_ids, seq_pad, batch_pad):
    """Pad ids (time + batch) and gather once -> (seq_pad*batch_pad, Ep)."""
    S_pad_extra = seq_pad - tok_ids.shape[1]
    B_pad_extra = batch_pad - tok_ids.shape[0]
    idx = jnp.pad(tok_ids.T, ((0, S_pad_extra), (0, B_pad_extra)))
    x = jnp.take(emb_padded, idx, axis=0)          # (S_pad, Bp, Ep)
    return x.reshape(seq_pad * batch_pad, emb_padded.shape[1])


# ----------------------------------------------------------------------------
# EncoderDecoder forward (mirrors the PyTorch base class contract)
# ----------------------------------------------------------------------------
def encoder_decoder_forward(params, enc_X, dec_X):
    """enc_X, dec_X: int32 token ids, shape (batch, seq).
    Returns (dec_output (batch, seq, vocab), dec_state (batch, hidden))."""
    p = params
    B, S_enc = enc_X.shape
    _, S_dec = dec_X.shape
    E = p["enc_emb"].shape[1]
    H = p["hidden"]
    V = p["w_dense"].shape[1]

    Bp = _round_up(B, 8)
    Ep = _round_up(E, 128)
    Hp = _round_up(H, 128)
    Vp = _round_up(V, 128)
    TV = min(Vp, 2048)                 # vocab tile (lanes) for the projection
    Vp = _round_up(Vp, TV)

    mxu = jnp.bfloat16                 # MXU input dtype; accumulate/carry f32

    tb_enc = _pick_time_block(S_enc)
    S_enc_pad = _round_up(S_enc, tb_enc)
    tb_dec = _pick_time_block(S_dec)
    S_dec_pad = _round_up(S_dec, tb_dec)

    # --- encoder ---
    enc_emb_p = jnp.pad(p["enc_emb"], ((0, 0), (0, Ep - E))).astype(mxu)
    enc_x = _gather_padded_tokens(enc_emb_p, enc_X, S_enc_pad, Bp)
    enc_wih = _pack_gate_weights(p["enc_wih"], Ep, Hp).astype(mxu)
    enc_whh = _pack_gate_weights(p["enc_whh"], Hp, Hp).astype(mxu)
    enc_bi = _pack_input_bias(p["enc_bih"], p["enc_bhh"], Hp)
    enc_bhn = jnp.pad(p["enc_bhh"][2], ((0, 0), (0, Hp - H)))
    h0 = jnp.zeros((Bp, Hp), jnp.float32)
    enc_state_p = gru_encoder(enc_x, enc_wih, enc_whh, enc_bi, enc_bhn, h0,
                              time_block=tb_enc, seq_len=S_enc)       # (Bp, Hp)

    # --- decoder.init_state(enc_outputs) -> final encoder hidden state ---
    dec_h0 = enc_state_p                                              # padded
    context = enc_state_p[:B, :H]                                     # (B, H)

    # --- decoder ---
    dec_emb_p = jnp.pad(p["dec_emb"], ((0, 0), (0, Ep - E))).astype(mxu)
    dec_x = _gather_padded_tokens(dec_emb_p, dec_X, S_dec_pad, Bp)
    dec_wx = _pack_gate_weights(p["dec_wx"], Ep, Hp).astype(mxu)
    dec_whh = _pack_gate_weights(p["dec_whh"], Hp, Hp).astype(mxu)
    gi_ctx = _context_gates(context, p["dec_wc"], p["dec_bih"], p["dec_bhh"],
                            Bp, Hp)
    dec_bhn = jnp.pad(p["dec_bhh"][2], ((0, 0), (0, Hp - H)))
    w_dense = jnp.pad(p["w_dense"], ((0, Hp - H), (0, Vp - V))).astype(mxu)
    b_dense = jnp.pad(p["b_dense"], ((0, 0), (0, Vp - V)))
    out_p, dec_hT_p = gru_decoder(dec_x, gi_ctx, dec_wx, dec_whh, dec_bhn,
                                  dec_h0, w_dense, b_dense,
                                  time_block=tb_dec, seq_len=S_dec,
                                  vocab_tile=TV)

    dec_out = out_p.reshape(S_dec_pad, Bp, Vp)[:S_dec, :B, :V]        # unpad
    dec_out = jnp.transpose(dec_out, (1, 0, 2))                       # (B, S, V)
    dec_state = dec_hT_p[:B, :H]
    return dec_out, dec_state


# ----------------------------------------------------------------------------
# Pure-JAX reference (for correctness check, f32)
# ----------------------------------------------------------------------------
def _gru_cell_ref(x_t, h, w_ih, w_hh, b_ih, b_hh):
    gi = [x_t @ w_ih[k] + b_ih[k] for k in range(3)]
    gh = [h @ w_hh[k] + b_hh[k] for k in range(3)]
    r = jax.nn.sigmoid(gi[0] + gh[0])
    z = jax.nn.sigmoid(gi[1] + gh[1])
    n = jnp.tanh(gi[2] + r * gh[2])
    return (1.0 - z) * n + z * h


def reference_forward(params, enc_X, dec_X):
    p = params
    B, S = enc_X.shape
    enc_emb = jnp.transpose(jnp.take(p["enc_emb"], enc_X, axis=0), (1, 0, 2))
    h = jnp.zeros((B, p["hidden"]), jnp.float32)
    for t in range(S):
        h = _gru_cell_ref(enc_emb[t], h, p["enc_wih"], p["enc_whh"],
                          p["enc_bih"], p["enc_bhh"])
    enc_state = h

    dec_emb = jnp.transpose(jnp.take(p["dec_emb"], dec_X, axis=0), (1, 0, 2))
    hd = enc_state
    outs = []
    w_ih_cat = jnp.concatenate([p["dec_wx"], p["dec_wc"]], axis=1)  # (3, E+H, H)
    for t in range(S):
        xc = jnp.concatenate([dec_emb[t], enc_state], axis=-1)
        hd = _gru_cell_ref(xc, hd, w_ih_cat, p["dec_whh"], p["dec_bih"], p["dec_bhh"])
        outs.append(hd @ p["w_dense"] + p["b_dense"])
    dec_out = jnp.transpose(jnp.stack(outs, axis=0), (1, 0, 2))
    return dec_out, hd


# ----------------------------------------------------------------------------
def init_params(key, vocab=16, embed=32, hidden=32):
    ks = jax.random.split(key, 12)
    s = 0.1
    return {
        "hidden": hidden,
        "enc_emb": s * jax.random.normal(ks[0], (vocab, embed), jnp.float32),
        "enc_wih": s * jax.random.normal(ks[1], (3, embed, hidden), jnp.float32),
        "enc_whh": s * jax.random.normal(ks[2], (3, hidden, hidden), jnp.float32),
        "enc_bih": s * jax.random.normal(ks[3], (3, 1, hidden), jnp.float32),
        "enc_bhh": s * jax.random.normal(ks[4], (3, 1, hidden), jnp.float32),
        "dec_emb": s * jax.random.normal(ks[5], (vocab, embed), jnp.float32),
        "dec_wx": s * jax.random.normal(ks[6], (3, embed, hidden), jnp.float32),
        "dec_wc": s * jax.random.normal(ks[7], (3, hidden, hidden), jnp.float32),
        "dec_whh": s * jax.random.normal(ks[8], (3, hidden, hidden), jnp.float32),
        "dec_bih": s * jax.random.normal(ks[9], (3, 1, hidden), jnp.float32),
        "dec_bhh": s * jax.random.normal(ks[10], (3, 1, hidden), jnp.float32),
        "w_dense": s * jax.random.normal(ks[11], (hidden, vocab), jnp.float32),
        "b_dense": jnp.zeros((1, vocab), jnp.float32),
    }


if __name__ == "__main__":
    key = jax.random.PRNGKey(0)
    k_p, k_e, k_d = jax.random.split(key, 3)

    batch, seq, vocab, embed, hidden = 2, 8, 16, 32, 32
    params = init_params(k_p, vocab=vocab, embed=embed, hidden=hidden)

    enc_X = jax.random.randint(k_e, (batch, seq), 0, vocab, dtype=jnp.int32)
    dec_X = jax.random.randint(k_d, (batch, seq), 0, vocab, dtype=jnp.int32)

    fwd = jax.jit(functools.partial(encoder_decoder_forward, params))
    out, state = fwd(enc_X, dec_X)
    jax.block_until_ready((out, state))

    ref_out, ref_state = reference_forward(params, enc_X, dec_X)
    assert out.shape == (batch, seq, vocab) and state.shape == (batch, hidden)
    # bf16 MXU inputs (f32 accumulate / f32 hidden carry) -> loosened tolerance.
    assert jnp.allclose(out, ref_out, atol=2e-2, rtol=2e-2)
    assert jnp.allclose(state, ref_state, atol=2e-2, rtol=2e-2)

    print("KERNEL_OK")
</pallas_src>

<mosaic_0001>
module attributes {stable_mosaic.version = 11 : i64} {
  func.func @_gru_encoder_kernel(%arg0: i32, %arg1: memref<64x128xbf16, #tpu.memory_space<vmem>>, %arg2: memref<128x384xbf16, #tpu.memory_space<vmem>>, %arg3: memref<128x384xbf16, #tpu.memory_space<vmem>>, %arg4: memref<1x384xf32, #tpu.memory_space<vmem>>, %arg5: memref<1x128xf32, #tpu.memory_space<vmem>>, %arg6: memref<8x128xf32, #tpu.memory_space<vmem>>, %arg7: memref<8x128xf32, #tpu.memory_space<vmem>>, %arg8: memref<64x384xf32, #tpu.memory_space<vmem>>) attributes {dimension_semantics = [#tpu.dimension_semantics<arbitrary>], iteration_bounds = array<i64: 1>, scalar_prefetch = 0 : i64, scratch_operands = 1 : i64, tpu.core_type = #tpu.core_type<tc>, window_params = [{transform_indices = @transform_0, window_bounds = array<i64: 64, 128>}, {pipeline_mode = #tpu.pipeline_mode<synchronous>, transform_indices = @transform_1, window_bounds = array<i64: 128, 384>}, {pipeline_mode = #tpu.pipeline_mode<synchronous>, transform_indices = @transform_2, window_bounds = array<i64: 128, 384>}, {pipeline_mode = #tpu.pipeline_mode<synchronous>, transform_indices = @transform_3, window_bounds = array<i64: 1, 384>}, {pipeline_mode = #tpu.pipeline_mode<synchronous>, transform_indices = @transform_4, window_bounds = array<i64: 1, 128>}, {pipeline_mode = #tpu.pipeline_mode<synchronous>, transform_indices = @transform_5, window_bounds = array<i64: 8, 128>}, {pipeline_mode = #tpu.pipeline_mode<synchronous>, transform_indices = @transform_6, window_bounds = array<i64: 8, 128>}]} {
    %c0_i32 = arith.constant 0 : i32
    %0 = arith.cmpi eq, %arg0, %c0_i32 : i32
    %1 = arith.extui %0 : i1 to i32
    %c0_i32_0 = arith.constant 0 : i32
    %2 = arith.cmpi ne, %1, %c0_i32_0 : i32
    scf.if %2 {
      %c0_137 = arith.constant 0 : index
      %c0_138 = arith.constant 0 : index
      %330 = vector.load %arg6[%c0_137, %c0_138] : memref<8x128xf32, #tpu.memory_space<vmem>>, vector<8x128xf32>
      %c0_139 = arith.constant 0 : index
      %c0_140 = arith.constant 0 : index
      %331 = vector.load %arg7[%c0_139, %c0_140] : memref<8x128xf32, #tpu.memory_space<vmem>>, vector<8x128xf32>
      tpu.vector_store %arg7[%c0_139, %c0_140], %330 {strides = array<i32>} : memref<8x128xf32, #tpu.memory_space<vmem>>, vector<8x128xf32>,
    } else {
    }
    %c0 = arith.constant 0 : index
    %c0_1 = arith.constant 0 : index
    %3 = vector.load %arg1[%c0, %c0_1] : memref<64x128xbf16, #tpu.memory_space<vmem>>, vector<64x128xbf16>
    %c0_2 = arith.constant 0 : index
    %c0_3 = arith.constant 0 : index
    %4 = vector.load %arg2[%c0_2, %c0_3] : memref<128x384xbf16, #tpu.memory_space<vmem>>, vector<128x384xbf16>
    %cst = arith.constant dense<0.000000e+00> : vector<64x384xf32>
    %5 = tpu.matmul %3, %4, %cst {dimension_numbers = #tpu.dot_dimension_numbers<[1], [0], [0], [1], [0, 0, 1, 1], [], []>} : vector<64x128xbf16>, vector<128x384xbf16>, vector<64x384xf32> -> vector<64x384xf32>
    %c0_4 = arith.constant 0 : index
    %c0_5 = arith.constant 0 : index
    %6 = vector.load %arg4[%c0_4, %c0_5] : memref<1x384xf32, #tpu.memory_space<vmem>>, vector<1x384xf32>
    %7 = vector.broadcast %6 : vector<1x384xf32> to vector<64x384xf32>
    %8 = arith.addf %5, %7 : vector<64x384xf32>
    %c0_6 = arith.constant 0 : index
    %c0_7 = arith.constant 0 : index
    %9 = vector.load %arg8[%c0_6, %c0_7] : memref<64x384xf32, #tpu.memory_space<vmem>>, vector<64x384xf32>
    tpu.vector_store %arg8[%c0_6, %c0_7], %8 {strides = array<i32>} : memref<64x384xf32, #tpu.memory_space<vmem>>, vector<64x384xf32>,
    %c0_i32_8 = arith.constant 0 : i32
    %c1_i32 = arith.constant 1 : i32
    %10 = arith.muli %c0_i32_8, %c1_i32 : i32
    %c0_i32_9 = arith.constant 0 : i32
    %11 = arith.addi %c0_i32_9, %10 : i32
    %c0_10 = arith.constant 0 : index
    %c0_11 = arith.constant 0 : index
    %12 = vector.load %arg7[%c0_10, %c0_11] : memref<8x128xf32, #tpu.memory_space<vmem>>, vector<8x128xf32>
    %c8_i32 = arith.constant 8 : i32
    %13 = arith.muli %11, %c8_i32 : i32
    %14 = tpu.assume_multiple %13, 8 : i32
    %15 = arith.index_cast %14 : i32 to index
    %c0_12 = arith.constant 0 : index
    %16 = vector.load %arg8[%15, %c0_12] : memref<64x384xf32, #tpu.memory_space<vmem>>, vector<8x384xf32>
    %17 = arith.truncf %12 : vector<8x128xf32> to vector<8x128xbf16>
    %c0_13 = arith.constant 0 : index
    %c0_14 = arith.constant 0 : index
    %18 = vector.load %arg3[%c0_13, %c0_14] : memref<128x384xbf16, #tpu.memory_space<vmem>>, vector<128x384xbf16>
    %cst_15 = arith.constant dense<0.000000e+00> : vector<8x384xf32>
    %19 = tpu.matmul %17, %18, %cst_15 {dimension_numbers = #tpu.dot_dimension_numbers<[1], [0], [0], [1], [0, 0, 1, 1], [], []>} : vector<8x128xbf16>, vector<128x384xbf16>, vector<8x384xf32> -> vector<8x384xf32>
    %20 = vector.extract_strided_slice %16 {offsets = [0, 0], sizes = [8, 128], strides = [1, 1]} : vector<8x384xf32> to vector<8x128xf32>
    %21 = vector.extract_strided_slice %19 {offsets = [0, 0], sizes = [8, 128], strides = [1, 1]} : vector<8x384xf32> to vector<8x128xf32>
    %22 = arith.addf %20, %21 : vector<8x128xf32>
    %23 = arith.negf %22 : vector<8x128xf32>
    %24 = math.exp %23 : vector<8x128xf32>
    %cst_16 = arith.constant 1.000000e+00 : f32
    %25 = vector.broadcast %cst_16 : f32 to vector<8x128xf32>
    %26 = arith.addf %25, %24 : vector<8x128xf32>
    %27 = arith.divf %25, %26 : vector<8x128xf32>
    %28 = vector.extract_strided_slice %16 {offsets = [0, 128], sizes = [8, 128], strides = [1, 1]} : vector<8x384xf32> to vector<8x128xf32>
    %29 = vector.extract_strided_slice %19 {offsets = [0, 128], sizes = [8, 128], strides = [1, 1]} : vector<8x384xf32> to vector<8x128xf32>
    %30 = arith.addf %28, %29 : vector<8x128xf32>
    %31 = arith.negf %30 : vector<8x128xf32>
    %32 = math.exp %31 : vector<8x128xf32>
    %cst_17 = arith.constant 1.000000e+00 : f32
    %33 = vector.broadcast %cst_17 : f32 to vector<8x128xf32>
    %34 = arith.addf %33, %32 : vector<8x128xf32>
    %35 = arith.divf %33, %34 : vector<8x128xf32>
    %36 = vector.extract_strided_slice %16 {offsets = [0, 256], sizes = [8, 128], strides = [1, 1]} : vector<8x384xf32> to vector<8x128xf32>
    %37 = vector.extract_strided_slice %19 {offsets = [0, 256], sizes = [8, 128], strides = [1, 1]} : vector<8x384xf32> to vector<8x128xf32>
    %c0_18 = arith.constant 0 : index
    %c0_19 = arith.constant 0 : index
    %38 = vector.load %arg5[%c0_18, %c0_19] : memref<1x128xf32, #tpu.memory_space<vmem>>, vector<1x128xf32>
    %39 = vector.broadcast %38 : vector<1x128xf32> to vector<8x128xf32>
    %40 = arith.addf %37, %39 : vector<8x128xf32>
    %41 = arith.mulf %27, %40 : vector<8x128xf32>
    %42 = arith.addf %36, %41 : vector<8x128xf32>
    %43 = math.tanh %42 : vector<8x128xf32>
    %cst_20 = arith.constant 1.000000e+00 : f32
    %44 = vector.broadcast %cst_20 : f32 to vector<8x128xf32>
    %45 = arith.subf %44, %35 : vector<8x128xf32>
    %46 = arith.mulf %45, %43 : vector<8x128xf32>
    %47 = arith.mulf %35, %12 : vector<8x128xf32>
    %48 = arith.addf %46, %47 : vector<8x128xf32>
    %c0_21 = arith.constant 0 : index
    %c0_22 = arith.constant 0 : index
    %49 = vector.load %arg7[%c0_21, %c0_22] : memref<8x128xf32, #tpu.memory_space<vmem>>, vector<8x128xf32>
    tpu.vector_store %arg7[%c0_21, %c0_22], %48 {strides = array<i32>} : memref<8x128xf32, #tpu.memory_space<vmem>>, vector<8x128xf32>,
    %c1_i32_23 = arith.constant 1 : i32
    %c1_i32_24 = arith.constant 1 : i32
    %50 = arith.muli %c1_i32_23, %c1_i32_24 : i32
    %c0_i32_25 = arith.constant 0 : i32
    %51 = arith.addi %c0_i32_25, %50 : i32
    %c0_26 = arith.constant 0 : index
    %c0_27 = arith.constant 0 : index
    %52 = vector.load %arg7[%c0_26, %c0_27] : memref<8x128xf32, #tpu.memory_space<vmem>>, vector<8x128xf32>
    %c8_i32_28 = arith.constant 8 : i32
    %53 = arith.muli %51, %c8_i32_28 : i32
    %54 = tpu.assume_multiple %53, 8 : i32
    %55 = arith.index_cast %54 : i32 to index
    %c0_29 = arith.constant 0 : index
    %56 = vector.load %arg8[%55, %c0_29] : memref<64x384xf32, #tpu.memory_space<vmem>>, vector<8x384xf32>
    %57 = arith.truncf %52 : vector<8x128xf32> to vector<8x128xbf16>
    %c0_30 = arith.constant 0 : index
    %c0_31 = arith.constant 0 : index
    %58 = vector.load %arg3[%c0_30, %c0_31] : memref<128x384xbf16, #tpu.memory_space<vmem>>, vector<128x384xbf16>
    %cst_32 = arith.constant dense<0.000000e+00> : vector<8x384xf32>
    %59 = tpu.matmul %57, %58, %cst_32 {dimension_numbers = #tpu.dot_dimension_numbers<[1], [0], [0], [1], [0, 0, 1, 1], [], []>} : vector<8x128xbf16>, vector<128x384xbf16>, vector<8x384xf32> -> vector<8x384xf32>
    %60 = vector.extract_strided_slice %56 {offsets = [0, 0], sizes = [8, 128], strides = [1, 1]} : vector<8x384xf32> to vector<8x128xf32>
    %61 = vector.extract_strided_slice %59 {offsets = [0, 0], sizes = [8, 128], strides = [1, 1]} : vector<8x384xf32> to vector<8x128xf32>
    %62 = arith.addf %60, %61 : vector<8x128xf32>
    %63 = arith.negf %62 : vector<8x128xf32>
    %64 = math.exp %63 : vector<8x128xf32>
    %cst_33 = arith.constant 1.000000e+00 : f32
    %65 = vector.broadcast %cst_33 : f32 to vector<8x128xf32>
    %66 = arith.addf %65, %64 : vector<8x128xf32>
    %67 = arith.divf %65, %66 : vector<8x128xf32>
    %68 = vector.extract_strided_slice %56 {offsets = [0, 128], sizes = [8, 128], strides = [1, 1]} : vector<8x384xf32> to vector<8x128xf32>
    %69 = vector.extract_strided_slice %59 {offsets = [0, 128], sizes = [8, 128], strides = [1, 1]} : vector<8x384xf32> to vector<8x128xf32>
    %70 = arith.addf %68, %69 : vector<8x128xf32>
    %71 = arith.negf %70 : vector<8x128xf32>
    %72 = math.exp %71 : vector<8x128xf32>
    %cst_34 = arith.constant 1.000000e+00 : f32
    %73 = vector.broadcast %cst_34 : f32 to vector<8x128xf32>
    %74 = arith.addf %73, %72 : vector<8x128xf32>
    %75 = arith.divf %73, %74 : vector<8x128xf32>
    %76 = vector.extract_strided_slice %56 {offsets = [0, 256], sizes = [8, 128], strides = [1, 1]} : vector<8x384xf32> to vector<8x128xf32>
    %77 = vector.extract_strided_slice %59 {offsets = [0, 256], sizes = [8, 128], strides = [1, 1]} : vector<8x384xf32> to vector<8x128xf32>
    %c0_35 = arith.constant 0 : index
    %c0_36 = arith.constant 0 : index
    %78 = vector.load %arg5[%c0_35, %c0_36] : memref<1x128xf32, #tpu.memory_space<vmem>>, vector<1x128xf32>
    %79 = vector.broadcast %78 : vector<1x128xf32> to vector<8x128xf32>
    %80 = arith.addf %77, %79 : vector<8x128xf32>
    %81 = arith.mulf %67, %80 : vector<8x128xf32>
    %82 = arith.addf %76, %81 : vector<8x128xf32>
    %83 = math.tanh %82 : vector<8x128xf32>
    %cst_37 = arith.constant 1.000000e+00 : f32
    %84 = vector.broadcast %cst_37 : f32 to vector<8x128xf32>
    %85 = arith.subf %84, %75 : vector<8x128xf32>
    %86 = arith.mulf %85, %83 : vector<8x128xf32>
    %87 = arith.mulf %75, %52 : vector<8x128xf32>
    %88 = arith.addf %86, %87 : vector<8x128xf32>
    %c0_38 = arith.constant 0 : index
    %c0_39 = arith.constant 0 : index
    %89 = vector.load %arg7[%c0_38, %c0_39] : memref<8x128xf32, #tpu.memory_space<vmem>>, vector<8x128xf32>
    tpu.vector_store %arg7[%c0_38, %c0_39], %88 {strides = array<i32>} : memref<8x128xf32, #tpu.memory_space<vmem>>, vector<8x128xf32>,
    %c2_i32 = arith.constant 2 : i32
    %c1_i32_40 = arith.constant 1 : i32
    %90 = arith.muli %c2_i32, %c1_i32_40 : i32
    %c0_i32_41 = arith.constant 0 : i32
    %91 = arith.addi %c0_i32_41, %90 : i32
    %c0_42 = arith.constant 0 : index
    %c0_43 = arith.constant 0 : index
    %92 = vector.load %arg7[%c0_42, %c0_43] : memref<8x128xf32, #tpu.memory_space<vmem>>, vector<8x128xf32>
    %c8_i32_44 = arith.constant 8 : i32
    %93 = arith.muli %91, %c8_i32_44 : i32
    %94 = tpu.assume_multiple %93, 8 : i32
    %95 = arith.index_cast %94 : i32 to index
    %c0_45 = arith.constant 0 : index
    %96 = vector.load %arg8[%95, %c0_45] : memref<64x384xf32, #tpu.memory_space<vmem>>, vector<8x384xf32>
    %97 = arith.truncf %92 : vector<8x128xf32> to vector<8x128xbf16>
    %c0_46 = arith.constant 0 : index
    %c0_47 = arith.constant 0 : index
    %98 = vector.load %arg3[%c0_46, %c0_47] : memref<128x384xbf16, #tpu.memory_space<vmem>>, vector<128x384xbf16>
    %cst_48 = arith.constant dense<0.000000e+00> : vector<8x384xf32>
    %99 = tpu.matmul %97, %98, %cst_48 {dimension_numbers = #tpu.dot_dimension_numbers<[1], [0], [0], [1], [0, 0, 1, 1], [], []>} : vector<8x128xbf16>, vector<128x384xbf16>, vector<8x384xf32> -> vector<8x384xf32>
    %100 = vector.extract_strided_slice %96 {offsets = [0, 0], sizes = [8, 128], strides = [1, 1]} : vector<8x384xf32> to vector<8x128xf32>
    %101 = vector.extract_strided_slice %99 {offsets = [0, 0], sizes = [8, 128], strides = [1, 1]} : vector<8x384xf32> to vector<8x128xf32>
    %102 = arith.addf %100, %101 : vector<8x128xf32>
    %103 = arith.negf %102 : vector<8x128xf32>
    %104 = math.exp %103 : vector<8x128xf32>
    %cst_49 = arith.constant 1.000000e+00 : f32
    %105 = vector.broadcast %cst_49 : f32 to vector<8x128xf32>
    %106 = arith.addf %105, %104 : vector<8x128xf32>
    %107 = arith.divf %105, %106 : vector<8x128xf32>
    %108 = vector.extract_strided_slice %96 {offsets = [0, 128], sizes = [8, 128], strides = [1, 1]} : vector<8x384xf32> to vector<8x128xf32>
    %109 = vector.extract_strided_slice %99 {offsets = [0, 128], sizes = [8, 128], strides = [1, 1]} : vector<8x384xf32> to vector<8x128xf32>
    %110 = arith.addf %108, %109 : vector<8x128xf32>
    %111 = arith.negf %110 : vector<8x128xf32>
    %112 = math.exp %111 : vector<8x128xf32>
    %cst_50 = arith.constant 1.000000e+00 : f32
    %113 = vector.broadcast %cst_50 : f32 to vector<8x128xf32>
    %114 = arith.addf %113, %112 : vector<8x128xf32>
    %115 = arith.divf %113, %114 : vector<8x128xf32>
    %116 = vector.extract_strided_slice %96 {offsets = [0, 256], sizes = [8, 128], strides = [1, 1]} : vector<8x384xf32> to vector<8x128xf32>
    %117 = vector.extract_strided_slice %99 {offsets = [0, 256], sizes = [8, 128], strides = [1, 1]} : vector<8x384xf32> to vector<8x128xf32>
    %c0_51 = arith.constant 0 : index
    %c0_52 = arith.constant 0 : index
    %118 = vector.load %arg5[%c0_51, %c0_52] : memref<1x128xf32, #tpu.memory_space<vmem>>, vector<1x128xf32>
    %119 = vector.broadcast %118 : vector<1x128xf32> to vector<8x128xf32>
    %120 = arith.addf %117, %119 : vector<8x128xf32>
    %121 = arith.mulf %107, %120 : vector<8x128xf32>
    %122 = arith.addf %116, %121 : vector<8x128xf32>
    %123 = math.tanh %122 : vector<8x128xf32>
    %cst_53 = arith.constant 1.000000e+00 : f32
    %124 = vector.broadcast %cst_53 : f32 to vector<8x128xf32>
    %125 = arith.subf %124, %115 : vector<8x128xf32>
    %126 = arith.mulf %125, %123 : vector<8x128xf32>
    %127 = arith.mulf %115, %92 : vector<8x128xf32>
    %128 = arith.addf %126, %127 : vector<8x128xf32>
    %c0_54 = arith.constant 0 : index
    %c0_55 = arith.constant 0 : index
    %129 = vector.load %arg7[%c0_54, %c0_55] : memref<8x128xf32, #tpu.memory_space<vmem>>, vector<8x128xf32>
    tpu.vector_store %arg7[%c0_54, %c0_55], %128 {strides = array<i32>} : memref<8x128xf32, #tpu.memory_space<vmem>>, vector<8x128xf32>,
    %c3_i32 = arith.constant 3 : i32
    %c1_i32_56 = arith.constant 1 : i32
    %130 = arith.muli %c3_i32, %c1_i32_56 : i32
    %c0_i32_57 = arith.constant 0 : i32
    %131 = arith.addi %c0_i32_57, %130 : i32
    %c0_58 = arith.constant 0 : index
    %c0_59 = arith.constant 0 : index
    %132 = vector.load %arg7[%c0_58, %c0_59] : memref<8x128xf32, #tpu.memory_space<vmem>>, vector<8x128xf32>
    %c8_i32_60 = arith.constant 8 : i32
    %133 = arith.muli %131, %c8_i32_60 : i32
    %134 = tpu.assume_multiple %133, 8 : i32
    %135 = arith.index_cast %134 : i32 to index
    %c0_61 = arith.constant 0 : index
    %136 = vector.load %arg8[%135, %c0_61] : memref<64x384xf32, #tpu.memory_space<vmem>>, vector<8x384xf32>
    %137 = arith.truncf %132 : vector<8x128xf32> to vector<8x128xbf16>
    %c0_62 = arith.constant 0 : index
    %c0_63 = arith.constant 0 : index
    %138 = vector.load %arg3[%c0_62, %c0_63] : memref<128x384xbf16, #tpu.memory_space<vmem>>, vector<128x384xbf16>
    %cst_64 = arith.constant dense<0.000000e+00> : vector<8x384xf32>
    %139 = tpu.matmul %137, %138, %cst_64 {dimension_numbers = #tpu.dot_dimension_numbers<[1], [0], [0], [1], [0, 0, 1, 1], [], []>} : vector<8x128xbf16>, vector<128x384xbf16>, vector<8x384xf32> -> vector<8x384xf32>
    %140 = vector.extract_strided_slice %136 {offsets = [0, 0], sizes = [8, 128], strides = [1, 1]} : vector<8x384xf32> to vector<8x128xf32>
    %141 = vector.extract_strided_slice %139 {offsets = [0, 0], sizes = [8, 128], strides = [1, 1]} : vector<8x384xf32> to vector<8x128xf32>
    %142 = arith.addf %140, %141 : vector<8x128xf32>
    %143 = arith.negf %142 : vector<8x128xf32>
    %144 = math.exp %143 : vector<8x128xf32>
    %cst_65 = arith.constant 1.000000e+00 : f32
    %145 = vector.broadcast %cst_65 : f32 to vector<8x128xf32>
    %146 = arith.addf %145, %144 : vector<8x128xf32>
    %147 = arith.divf %145, %146 : vector<8x128xf32>
    %148 = vector.extract_strided_slice %136 {offsets = [0, 128], sizes = [8, 128], strides = [1, 1]} : vector<8x384xf32> to vector<8x128xf32>
    %149 = vector.extract_strided_slice %139 {offsets = [0, 128], sizes = [8, 128], strides = [1, 1]} : vector<8x384xf32> to vector<8x128xf32>
    %150 = arith.addf %148, %149 : vector<8x128xf32>
    %151 = arith.negf %150 : vector<8x128xf32>
    %152 = math.exp %151 : vector<8x128xf32>
    %cst_66 = arith.constant 1.000000e+00 : f32
    %153 = vector.broadcast %cst_66 : f32 to vector<8x128xf32>
    %154 = arith.addf %153, %152 : vector<8x128xf32>
    %155 = arith.divf %153, %154 : vector<8x128xf32>
    %156 = vector.extract_strided_slice %136 {offsets = [0, 256], sizes = [8, 128], strides = [1, 1]} : vector<8x384xf32> to vector<8x128xf32>
    %157 = vector.extract_strided_slice %139 {offsets = [0, 256], sizes = [8, 128], strides = [1, 1]} : vector<8x384xf32> to vector<8x128xf32>
    %c0_67 = arith.constant 0 : index
    %c0_68 = arith.constant 0 : index
    %158 = vector.load %arg5[%c0_67, %c0_68] : memref<1x128xf32, #tpu.memory_space<vmem>>, vector<1x128xf32>
    %159 = vector.broadcast %158 : vector<1x128xf32> to vector<8x128xf32>
    %160 = arith.addf %157, %159 : vector<8x128xf32>
    %161 = arith.mulf %147, %160 : vector<8x128xf32>
    %162 = arith.addf %156, %161 : vector<8x128xf32>
    %163 = math.tanh %162 : vector<8x128xf32>
    %cst_69 = arith.constant 1.000000e+00 : f32
    %164 = vector.broadcast %cst_69 : f32 to vector<8x128xf32>
    %165 = arith.subf %164, %155 : vector<8x128xf32>
    %166 = arith.mulf %165, %163 : vector<8x128xf32>
    %167 = arith.mulf %155, %132 : vector<8x128xf32>
    %168 = arith.addf %166, %167 : vector<8x128xf32>
    %c0_70 = arith.constant 0 : index
    %c0_71 = arith.constant 0 : index
    %169 = vector.load %arg7[%c0_70, %c0_71] : memref<8x128xf32, #tpu.memory_space<vmem>>, vector<8x128xf32>
    tpu.vector_store %arg7[%c0_70, %c0_71], %168 {strides = array<i32>} : memref<8x128xf32, #tpu.memory_space<vmem>>, vector<8x128xf32>,
    %c4_i32 = arith.constant 4 : i32
    %c1_i32_72 = arith.constant 1 : i32
    %170 = arith.muli %c4_i32, %c1_i32_72 : i32
    %c0_i32_73 = arith.constant 0 : i32
    %171 = arith.addi %c0_i32_73, %170 : i32
    %c0_74 = arith.constant 0 : index
    %c0_75 = arith.constant 0 : index
    %172 = vector.load %arg7[%c0_74, %c0_75] : memref<8x128xf32, #tpu.memory_space<vmem>>, vector<8x128xf32>
    %c8_i32_76 = arith.constant 8 : i32
    %173 = arith.muli %171, %c8_i32_76 : i32
    %174 = tpu.assume_multiple %173, 8 : i32
    %175 = arith.index_cast %174 : i32 to index
    %c0_77 = arith.constant 0 : index
    %176 = vector.load %arg8[%175, %c0_77] : memref<64x384xf32, #tpu.memory_space<vmem>>, vector<8x384xf32>
    %177 = arith.truncf %172 : vector<8x128xf32> to vector<8x128xbf16>
    %c0_78 = arith.constant 0 : index
    %c0_79 = arith.constant 0 : index
    %178 = vector.load %arg3[%c0_78, %c0_79] : memref<128x384xbf16, #tpu.memory_space<vmem>>, vector<128x384xbf16>
    %cst_80 = arith.constant dense<0.000000e+00> : vector<8x384xf32>
    %179 = tpu.matmul %177, %178, %cst_80 {dimension_numbers = #tpu.dot_dimension_numbers<[1], [0], [0], [1], [0, 0, 1, 1], [], []>} : vector<8x128xbf16>, vector<128x384xbf16>, vector<8x384xf32> -> vector<8x384xf32>
    %180 = vector.extract_strided_slice %176 {offsets = [0, 0], sizes = [8, 128], strides = [1, 1]} : vector<8x384xf32> to vector<8x128xf32>
    %181 = vector.extract_strided_slice %179 {offsets = [0, 0], sizes = [8, 128], strides = [1, 1]} : vector<8x384xf32> to vector<8x128xf32>
    %182 = arith.addf %180, %181 : vector<8x128xf32>
    %183 = arith.negf %182 : vector<8x128xf32>
    %184 = math.exp %183 : vector<8x128xf32>
    %cst_81 = arith.constant 1.000000e+00 : f32
    %185 = vector.broadcast %cst_81 : f32 to vector<8x128xf32>
    %186 = arith.addf %185, %184 : vector<8x128xf32>
    %187 = arith.divf %185, %186 : vector<8x128xf32>
    %188 = vector.extract_strided_slice %176 {offsets = [0, 128], sizes = [8, 128], strides = [1, 1]} : vector<8x384xf32> to vector<8x128xf32>
    %189 = vector.extract_strided_slice %179 {offsets = [0, 128], sizes = [8, 128], strides = [1, 1]} : vector<8x384xf32> to vector<8x128xf32>
    %190 = arith.addf %188, %189 : vector<8x128xf32>
    %191 = arith.negf %190 : vector<8x128xf32>
    %192 = math.exp %191 : vector<8x128xf32>
    %cst_82 = arith.constant 1.000000e+00 : f32
    %193 = vector.broadcast %cst_82 : f32 to vector<8x128xf32>
    %194 = arith.addf %193, %192 : vector<8x128xf32>
    %195 = arith.divf %193, %194 : vector<8x128xf32>
    %196 = vector.extract_strided_slice %176 {offsets = [0, 256], sizes = [8, 128], strides = [1, 1]} : vector<8x384xf32> to vector<8x128xf32>
    %197 = vector.extract_strided_slice %179 {offsets = [0, 256], sizes = [8, 128], strides = [1, 1]} : vector<8x384xf32> to vector<8x128xf32>
    %c0_83 = arith.constant 0 : index
    %c0_84 = arith.constant 0 : index
    %198 = vector.load %arg5[%c0_83, %c0_84] : memref<1x128xf32, #tpu.memory_space<vmem>>, vector<1x128xf32>
    %199 = vector.broadcast %198 : vector<1x128xf32> to vector<8x128xf32>
    %200 = arith.addf %197, %199 : vector<8x128xf32>
    %201 = arith.mulf %187, %200 : vector<8x128xf32>
    %202 = arith.addf %196, %201 : vector<8x128xf32>
    %203 = math.tanh %202 : vector<8x128xf32>
    %cst_85 = arith.constant 1.000000e+00 : f32
    %204 = vector.broadcast %cst_85 : f32 to vector<8x128xf32>
    %205 = arith.subf %204, %195 : vector<8x128xf32>
    %206 = arith.mulf %205, %203 : vector<8x128xf32>
    %207 = arith.mulf %195, %172 : vector<8x128xf32>
    %208 = arith.addf %206, %207 : vector<8x128xf32>
    %c0_86 = arith.constant 0 : index
    %c0_87 = arith.constant 0 : index
    %209 = vector.load %arg7[%c0_86, %c0_87] : memref<8x128xf32, #tpu.memory_space<vmem>>, vector<8x128xf32>
    tpu.vector_store %arg7[%c0_86, %c0_87], %208 {strides = array<i32>} : memref<8x128xf32, #tpu.memory_space<vmem>>, vector<8x128xf32>,
    %c5_i32 = arith.constant 5 : i32
    %c1_i32_88 = arith.constant 1 : i32
    %210 = arith.muli %c5_i32, %c1_i32_88 : i32
    %c0_i32_89 = arith.constant 0 : i32
    %211 = arith.addi %c0_i32_89, %210 : i32
    %c0_90 = arith.constant 0 : index
    %c0_91 = arith.constant 0 : index
    %212 = vector.load %arg7[%c0_90, %c0_91] : memref<8x128xf32, #tpu.memory_space<vmem>>, vector<8x128xf32>
    %c8_i32_92 = arith.constant 8 : i32
    %213 = arith.muli %211, %c8_i32_92 : i32
    %214 = tpu.assume_multiple %213, 8 : i32
    %215 = arith.index_cast %214 : i32 to index
    %c0_93 = arith.constant 0 : index
    %216 = vector.load %arg8[%215, %c0_93] : memref<64x384xf32, #tpu.memory_space<vmem>>, vector<8x384xf32>
    %217 = arith.truncf %212 : vector<8x128xf32> to vector<8x128xbf16>
    %c0_94 = arith.constant 0 : index
    %c0_95 = arith.constant 0 : index
    %218 = vector.load %arg3[%c0_94, %c0_95] : memref<128x384xbf16, #tpu.memory_space<vmem>>, vector<128x384xbf16>
    %cst_96 = arith.constant dense<0.000000e+00> : vector<8x384xf32>
    %219 = tpu.matmul %217, %218, %cst_96 {dimension_numbers = #tpu.dot_dimension_numbers<[1], [0], [0], [1], [0, 0, 1, 1], [], []>} : vector<8x128xbf16>, vector<128x384xbf16>, vector<8x384xf32> -> vector<8x384xf32>
    %220 = vector.extract_strided_slice %216 {offsets = [0, 0], sizes = [8, 128], strides = [1, 1]} : vector<8x384xf32> to vector<8x128xf32>
    %221 = vector.extract_strided_slice %219 {offsets = [0, 0], sizes = [8, 128], strides = [1, 1]} : vector<8x384xf32> to vector<8x128xf32>
    %222 = arith.addf %220, %221 : vector<8x128xf32>
    %223 = arith.negf %222 : vector<8x128xf32>
    %224 = math.exp %223 : vector<8x128xf32>
    %cst_97 = arith.constant 1.000000e+00 : f32
    %225 = vector.broadcast %cst_97 : f32 to vector<8x128xf32>
    %226 = arith.addf %225, %224 : vector<8x128xf32>
    %227 = arith.divf %225, %226 : vector<8x128xf32>
    %228 = vector.extract_strided_slice %216 {offsets = [0, 128], sizes = [8, 128], strides = [1, 1]} : vector<8x384xf32> to vector<8x128xf32>
    %229 = vector.extract_strided_slice %219 {offsets = [0, 128], sizes = [8, 128], strides = [1, 1]} : vector<8x384xf32> to vector<8x128xf32>
    %230 = arith.addf %228, %229 : vector<8x128xf32>
    %231 = arith.negf %230 : vector<8x128xf32>
    %232 = math.exp %231 : vector<8x128xf32>
    %cst_98 = arith.constant 1.000000e+00 : f32
    %233 = vector.broadcast %cst_98 : f32 to vector<8x128xf32>
    %234 = arith.addf %233, %232 : vector<8x128xf32>
    %235 = arith.divf %233, %234 : vector<8x128xf32>
    %236 = vector.extract_strided_slice %216 {offsets = [0, 256], sizes = [8, 128], strides = [1, 1]} : vector<8x384xf32> to vector<8x128xf32>
    %237 = vector.extract_strided_slice %219 {offsets = [0, 256], sizes = [8, 128], strides = [1, 1]} : vector<8x384xf32> to vector<8x128xf32>
    %c0_99 = arith.constant 0 : index
    %c0_100 = arith.constant 0 : index
    %238 = vector.load %arg5[%c0_99, %c0_100] : memref<1x128xf32, #tpu.memory_space<vmem>>, vector<1x128xf32>
    %239 = vector.broadcast %238 : vector<1x128xf32> to vector<8x128xf32>
    %240 = arith.addf %237, %239 : vector<8x128xf32>
    %241 = arith.mulf %227, %240 : vector<8x128xf32>
    %242 = arith.addf %236, %241 : vector<8x128xf32>
    %243 = math.tanh %242 : vector<8x128xf32>
    %cst_101 = arith.constant 1.000000e+00 : f32
    %244 = vector.broadcast %cst_101 : f32 to vector<8x128xf32>
    %245 = arith.subf %244, %235 : vector<8x128xf32>
    %246 = arith.mulf %245, %243 : vector<8x128xf32>
    %247 = arith.mulf %235, %212 : vector<8x128xf32>
    %248 = arith.addf %246, %247 : vector<8x128xf32>
    %c0_102 = arith.constant 0 : index
    %c0_103 = arith.constant 0 : index
    %249 = vector.load %arg7[%c0_102, %c0_103] : memref<8x128xf32, #tpu.memory_space<vmem>>, vector<8x128xf32>
    tpu.vector_store %arg7[%c0_102, %c0_103], %248 {strides = array<i32>} : memref<8x128xf32, #tpu.memory_space<vmem>>, vector<8x128xf32>,
    %c6_i32 = arith.constant 6 : i32
    %c1_i32_104 = arith.constant 1 : i32
    %250 = arith.muli %c6_i32, %c1_i32_104 : i32
    %c0_i32_105 = arith.constant 0 : i32
    %251 = arith.addi %c0_i32_105, %250 : i32
    %c0_106 = arith.constant 0 : index
    %c0_107 = arith.constant 0 : index
    %252 = vector.load %arg7[%c0_106, %c0_107] : memref<8x128xf32, #tpu.memory_space<vmem>>, vector<8x128xf32>
    %c8_i32_108 = arith.constant 8 : i32
    %253 = arith.muli %251, %c8_i32_108 : i32
    %254 = tpu.assume_multiple %253, 8 : i32
    %255 = arith.index_cast %254 : i32 to index
    %c0_109 = arith.constant 0 : index
    %256 = vector.load %arg8[%255, %c0_109] : memref<64x384xf32, #tpu.memory_space<vmem>>, vector<8x384xf32>
    %257 = arith.truncf %252 : vector<8x128xf32> to vector<8x128xbf16>
    %c0_110 = arith.constant 0 : index
    %c0_111 = arith.constant 0 : index
    %258 = vector.load %arg3[%c0_110, %c0_111] : memref<128x384xbf16, #tpu.memory_space<vmem>>, vector<128x384xbf16>
    %cst_112 = arith.constant dense<0.000000e+00> : vector<8x384xf32>
    %259 = tpu.matmul %257, %258, %cst_112 {dimension_numbers = #tpu.dot_dimension_numbers<[1], [0], [0], [1], [0, 0, 1, 1], [], []>} : vector<8x128xbf16>, vector<128x384xbf16>, vector<8x384xf32> -> vector<8x384xf32>
    %260 = vector.extract_strided_slice %256 {offsets = [0, 0], sizes = [8, 128], strides = [1, 1]} : vector<8x384xf32> to vector<8x128xf32>
    %261 = vector.extract_strided_slice %259 {offsets = [0, 0], sizes = [8, 128], strides = [1, 1]} : vector<8x384xf32> to vector<8x128xf32>
    %262 = arith.addf %260, %261 : vector<8x128xf32>
    %263 = arith.negf %262 : vector<8x128xf32>
    %264 = math.exp %263 : vector<8x128xf32>
    %cst_113 = arith.constant 1.000000e+00 : f32
    %265 = vector.broadcast %cst_113 : f32 to vector<8x128xf32>
    %266 = arith.addf %265, %264 : vector<8x128xf32>
    %267 = arith.divf %265, %266 : vector<8x128xf32>
    %268 = vector.extract_strided_slice %256 {offsets = [0, 128], sizes = [8, 128], strides = [1, 1]} : vector<8x384xf32> to vector<8x128xf32>
    %269 = vector.extract_strided_slice %259 {offsets = [0, 128], sizes = [8, 128], strides = [1, 1]} : vector<8x384xf32> to vector<8x128xf32>
    %270 = arith.addf %268, %269 : vector<8x128xf32>
    %271 = arith.negf %270 : vector<8x128xf32>
    %272 = math.exp %271 : vector<8x128xf32>
    %cst_114 = arith.constant 1.000000e+00 : f32
    %273 = vector.broadcast %cst_114 : f32 to vector<8x128xf32>
    %274 = arith.addf %273, %272 : vector<8x128xf32>
    %275 = arith.divf %273, %274 : vector<8x128xf32>
    %276 = vector.extract_strided_slice %256 {offsets = [0, 256], sizes = [8, 128], strides = [1, 1]} : vector<8x384xf32> to vector<8x128xf32>
    %277 = vector.extract_strided_slice %259 {offsets = [0, 256], sizes = [8, 128], strides = [1, 1]} : vector<8x384xf32> to vector<8x128xf32>
    %c0_115 = arith.constant 0 : index
    %c0_116 = arith.constant 0 : index
    %278 = vector.load %arg5[%c0_115, %c0_116] : memref<1x128xf32, #tpu.memory_space<vmem>>, vector<1x128xf32>
    %279 = vector.broadcast %278 : vector<1x128xf32> to vector<8x128xf32>
    %280 = arith.addf %277, %279 : vector<8x128xf32>
    %281 = arith.mulf %267, %280 : vector<8x128xf32>
    %282 = arith.addf %276, %281 : vector<8x128xf32>
    %283 = math.tanh %282 : vector<8x128xf32>
    %cst_117 = arith.constant 1.000000e+00 : f32
    %284 = vector.broadcast %cst_117 : f32 to vector<8x128xf32>
    %285 = arith.subf %284, %275 : vector<8x128xf32>
    %286 = arith.mulf %285, %283 : vector<8x128xf32>
    %287 = arith.mulf %275, %252 : vector<8x128xf32>
    %288 = arith.addf %286, %287 : vector<8x128xf32>
    %c0_118 = arith.constant 0 : index
    %c0_119 = arith.constant 0 : index
    %289 = vector.load %arg7[%c0_118, %c0_119] : memref<8x128xf32, #tpu.memory_space<vmem>>, vector<8x128xf32>
    tpu.vector_store %arg7[%c0_118, %c0_119], %288 {strides = array<i32>} : memref<8x128xf32, #tpu.memory_space<vmem>>, vector<8x128xf32>,
    %c7_i32 = arith.constant 7 : i32
    %c1_i32_120 = arith.constant 1 : i32
    %290 = arith.muli %c7_i32, %c1_i32_120 : i32
    %c0_i32_121 = arith.constant 0 : i32
    %291 = arith.addi %c0_i32_121, %290 : i32
    %c0_122 = arith.constant 0 : index
    %c0_123 = arith.constant 0 : index
    %292 = vector.load %arg7[%c0_122, %c0_123] : memref<8x128xf32, #tpu.memory_space<vmem>>, vector<8x128xf32>
    %c8_i32_124 = arith.constant 8 : i32
    %293 = arith.muli %291, %c8_i32_124 : i32
    %294 = tpu.assume_multiple %293, 8 : i32
    %295 = arith.index_cast %294 : i32 to index
    %c0_125 = arith.constant 0 : index
    %296 = vector.load %arg8[%295, %c0_125] : memref<64x384xf32, #tpu.memory_space<vmem>>, vector<8x384xf32>
    %297 = arith.truncf %292 : vector<8x128xf32> to vector<8x128xbf16>
    %c0_126 = arith.constant 0 : index
    %c0_127 = arith.constant 0 : index
    %298 = vector.load %arg3[%c0_126, %c0_127] : memref<128x384xbf16, #tpu.memory_space<vmem>>, vector<128x384xbf16>
    %cst_128 = arith.constant dense<0.000000e+00> : vector<8x384xf32>
    %299 = tpu.matmul %297, %298, %cst_128 {dimension_numbers = #tpu.dot_dimension_numbers<[1], [0], [0], [1], [0, 0, 1, 1], [], []>} : vector<8x128xbf16>, vector<128x384xbf16>, vector<8x384xf32> -> vector<8x384xf32>
    %300 = vector.extract_strided_slice %296 {offsets = [0, 0], sizes = [8, 128], strides = [1, 1]} : vector<8x384xf32> to vector<8x128xf32>
    %301 = vector.extract_strided_slice %299 {offsets = [0, 0], sizes = [8, 128], strides = [1, 1]} : vector<8x384xf32> to vector<8x128xf32>
    %302 = arith.addf %300, %301 : vector<8x128xf32>
    %303 = arith.negf %302 : vector<8x128xf32>
    %304 = math.exp %303 : vector<8x128xf32>
    %cst_129 = arith.constant 1.000000e+00 : f32
    %305 = vector.broadcast %cst_129 : f32 to vector<8x128xf32>
    %306 = arith.addf %305, %304 : vector<8x128xf32>
    %307 = arith.divf %305, %306 : vector<8x128xf32>
    %308 = vector.extract_strided_slice %296 {offsets = [0, 128], sizes = [8, 128], strides = [1, 1]} : vector<8x384xf32> to vector<8x128xf32>
    %309 = vector.extract_strided_slice %299 {offsets = [0, 128], sizes = [8, 128], strides = [1, 1]} : vector<8x384xf32> to vector<8x128xf32>
    %310 = arith.addf %308, %309 : vector<8x128xf32>
    %311 = arith.negf %310 : vector<8x128xf32>
    %312 = math.exp %311 : vector<8x128xf32>
    %cst_130 = arith.constant 1.000000e+00 : f32
    %313 = vector.broadcast %cst_130 : f32 to vector<8x128xf32>
    %314 = arith.addf %313, %312 : vector<8x128xf32>
    %315 = arith.divf %313, %314 : vector<8x128xf32>
    %316 = vector.extract_strided_slice %296 {offsets = [0, 256], sizes = [8, 128], strides = [1, 1]} : vector<8x384xf32> to vector<8x128xf32>
    %317 = vector.extract_strided_slice %299 {offsets = [0, 256], sizes = [8, 128], strides = [1, 1]} : vector<8x384xf32> to vector<8x128xf32>
    %c0_131 = arith.constant 0 : index
    %c0_132 = arith.constant 0 : index
    %318 = vector.load %arg5[%c0_131, %c0_132] : memref<1x128xf32, #tpu.memory_space<vmem>>, vector<1x128xf32>
    %319 = vector.broadcast %318 : vector<1x128xf32> to vector<8x128xf32>
    %320 = arith.addf %317, %319 : vector<8x128xf32>
    %321 = arith.mulf %307, %320 : vector<8x128xf32>
    %322 = arith.addf %316, %321 : vector<8x128xf32>
    %323 = math.tanh %322 : vector<8x128xf32>
    %cst_133 = arith.constant 1.000000e+00 : f32
    %324 = vector.broadcast %cst_133 : f32 to vector<8x128xf32>
    %325 = arith.subf %324, %315 : vector<8x128xf32>
    %326 = arith.mulf %325, %323 : vector<8x128xf32>
    %327 = arith.mulf %315, %292 : vector<8x128xf32>
    %328 = arith.addf %326, %327 : vector<8x128xf32>
    %c0_134 = arith.constant 0 : index
    %c0_135 = arith.constant 0 : index
    %329 = vector.load %arg7[%c0_134, %c0_135] : memref<8x128xf32, #tpu.memory_space<vmem>>, vector<8x128xf32>
    tpu.vector_store %arg7[%c0_134, %c0_135], %328 {strides = array<i32>} : memref<8x128xf32, #tpu.memory_space<vmem>>, vector<8x128xf32>,
    %c8_i32_136 = arith.constant 8 : i32
    return
  }
  func.func @transform_0(%arg0: i32) -> (i32, i32) {
    %c0_i32 = arith.constant 0 : i32
    %c0_i32_0 = arith.constant 0 : i32
    return %arg0, %c0_i32 : i32, i32
  }
  func.func @transform_1(%arg0: i32) -> (i32, i32) {
    %c0_i32 = arith.constant 0 : i32
    %c0_i32_0 = arith.constant 0 : i32
    %c0_i32_1 = arith.constant 0 : i32
    return %c0_i32, %c0_i32_0 : i32, i32
  }
  func.func @transform_2(%arg0: i32) -> (i32, i32) {
    %c0_i32 = arith.constant 0 : i32
    %c0_i32_0 = arith.constant 0 : i32
    %c0_i32_1 = arith.constant 0 : i32
    return %c0_i32, %c0_i32_0 : i32, i32
  }
  func.func @transform_3(%arg0: i32) -> (i32, i32) {
    %c0_i32 = arith.constant 0 : i32
    %c0_i32_0 = arith.constant 0 : i32
    %c0_i32_1 = arith.constant 0 : i32
    return %c0_i32, %c0_i32_0 : i32, i32
  }
  func.func @transform_4(%arg0: i32) -> (i32, i32) {
    %c0_i32 = arith.constant 0 : i32
    %c0_i32_0 = arith.constant 0 : i32
    %c0_i32_1 = arith.constant 0 : i32
    return %c0_i32, %c0_i32_0 : i32, i32
  }
  func.func @transform_5(%arg0: i32) -> (i32, i32) {
    %c0_i32 = arith.constant 0 : i32
    %c0_i32_0 = arith.constant 0 : i32
    %c0_i32_1 = arith.constant 0 : i32
    return %c0_i32, %c0_i32_0 : i32, i32
  }
  func.func @transform_6(%arg0: i32) -> (i32, i32) {
    %c0_i32 = arith.constant 0 : i32
    %c0_i32_0 = arith.constant 0 : i32
    %c0_i32_1 = arith.constant 0 : i32
    return %c0_i32, %c0_i32_0 : i32, i32
  }
}

module attributes {stable_mosaic.version = 11 : i64} {
  func.func @_gru_decoder_kernel(%arg0: i32, %arg1: i32, %arg2: memref<64x128xbf16, #tpu.memory_space<vmem>>, %arg3: memref<8x384xf32, #tpu.memory_space<vmem>>, %arg4: memref<128x384xbf16, #tpu.memory_space<vmem>>, %arg5: memref<128x384xbf16, #tpu.memory_space<vmem>>, %arg6: memref<1x128xf32, #tpu.memory_space<vmem>>, %arg7: memref<8x128xf32, #tpu.memory_space<vmem>>, %arg8: memref<128x128xbf16, #tpu.memory_space<vmem>>, %arg9: memref<1x128xf32, #tpu.memory_space<vmem>>, %arg10: memref<64x128xf32, #tpu.memory_space<vmem>>, %arg11: memref<8x128xf32, #tpu.memory_space<vmem>>, %arg12: memref<64x384xf32, #tpu.memory_space<vmem>>, %arg13: memref<64x128xf32, #tpu.memory_space<vmem>>) attributes {dimension_semantics = [#tpu.dimension_semantics<arbitrary>, #tpu.dimension_semantics<arbitrary>], iteration_bounds = array<i64: 1, 1>, scalar_prefetch = 0 : i64, scratch_operands = 2 : i64, tpu.core_type = #tpu.core_type<tc>, window_params = [{transform_indices = @transform_0, window_bounds = array<i64: 64, 128>}, {pipeline_mode = #tpu.pipeline_mode<synchronous>, transform_indices = @transform_1, window_bounds = array<i64: 8, 384>}, {pipeline_mode = #tpu.pipeline_mode<synchronous>, transform_indices = @transform_2, window_bounds = array<i64: 128, 384>}, {pipeline_mode = #tpu.pipeline_mode<synchronous>, transform_indices = @transform_3, window_bounds = array<i64: 128, 384>}, {pipeline_mode = #tpu.pipeline_mode<synchronous>, transform_indices = @transform_4, window_bounds = array<i64: 1, 128>}, {pipeline_mode = #tpu.pipeline_mode<synchronous>, transform_indices = @transform_5, window_bounds = array<i64: 8, 128>}, {transform_indices = @transform_6, window_bounds = array<i64: 128, 128>}, {transform_indices = @transform_7, window_bounds = array<i64: 1, 128>}, {transform_indices = @transform_8, window_bounds = array<i64: 64, 128>}, {pipeline_mode = #tpu.pipeline_mode<synchronous>, transform_indices = @transform_9, window_bounds = array<i64: 8, 128>}]} {
    %c0_i32 = arith.constant 0 : i32
    %0 = arith.cmpi eq, %arg0, %c0_i32 : i32
    %c0_i32_0 = arith.constant 0 : i32
    %1 = arith.cmpi eq, %arg1, %c0_i32_0 : i32
    %2 = arith.andi %0, %1 : i1
    %3 = arith.extui %2 : i1 to i32
    %c0_i32_1 = arith.constant 0 : i32
    %4 = arith.cmpi ne, %3, %c0_i32_1 : i32
    scf.if %4 {
      %c0_11 = arith.constant 0 : index
      %c0_12 = arith.constant 0 : index
      %16 = vector.load %arg7[%c0_11, %c0_12] : memref<8x128xf32, #tpu.memory_space<vmem>>, vector<8x128xf32>
      %c0_13 = arith.constant 0 : index
      %c0_14 = arith.constant 0 : index
      %17 = vector.load %arg11[%c0_13, %c0_14] : memref<8x128xf32, #tpu.memory_space<vmem>>, vector<8x128xf32>
      tpu.vector_store %arg11[%c0_13, %c0_14], %16 {strides = array<i32>} : memref<8x128xf32, #tpu.memory_space<vmem>>, vector<8x128xf32>,
    } else {
    }
    %c0_i32_2 = arith.constant 0 : i32
    %5 = arith.cmpi eq, %arg1, %c0_i32_2 : i32
    %6 = arith.extui %5 : i1 to i32
    %c0_i32_3 = arith.constant 0 : i32
    %7 = arith.cmpi ne, %6, %c0_i32_3 : i32
    scf.if %7 {
      %c0_11 = arith.constant 0 : index
      %c0_12 = arith.constant 0 : index
      %16 = vector.load %arg2[%c0_11, %c0_12] : memref<64x128xbf16, #tpu.memory_space<vmem>>, vector<64x128xbf16>
      %c0_13 = arith.constant 0 : index
      %c0_14 = arith.constant 0 : index
      %17 = vector.load %arg4[%c0_13, %c0_14] : memref<128x384xbf16, #tpu.memory_space<vmem>>, vector<128x384xbf16>
      %cst_15 = arith.constant dense<0.000000e+00> : vector<64x384xf32>
      %18 = tpu.matmul %16, %17, %cst_15 {dimension_numbers = #tpu.dot_dimension_numbers<[1], [0], [0], [1], [0, 0, 1, 1], [], []>} : vector<64x128xbf16>, vector<128x384xbf16>, vector<64x384xf32> -> vector<64x384xf32>
      %c0_16 = arith.constant 0 : index
      %c0_17 = arith.constant 0 : index
      %19 = vector.load %arg12[%c0_16, %c0_17] : memref<64x384xf32, #tpu.memory_space<vmem>>, vector<64x384xf32>
      tpu.vector_store %arg12[%c0_16, %c0_17], %18 {strides = array<i32>} : memref<64x384xf32, #tpu.memory_space<vmem>>, vector<64x384xf32>,
      %c0_i32_18 = arith.constant 0 : i32
      %c1_i32 = arith.constant 1 : i32
      %20 = arith.muli %c0_i32_18, %c1_i32 : i32
      %c0_i32_19 = arith.constant 0 : i32
      %21 = arith.addi %c0_i32_19, %20 : i32
      %c0_20 = arith.constant 0 : index
      %c0_21 = arith.constant 0 : index
      %22 = vector.load %arg11[%c0_20, %c0_21] : memref<8x128xf32, #tpu.memory_space<vmem>>, vector<8x128xf32>
      %c8_i32 = arith.constant 8 : i32
      %23 = arith.muli %21, %c8_i32 : i32
      %24 = tpu.assume_multiple %23, 8 : i32
      %25 = arith.index_cast %24 : i32 to index
      %c0_22 = arith.constant 0 : index
      %26 = vector.load %arg12[%25, %c0_22] : memref<64x384xf32, #tpu.memory_space<vmem>>, vector<8x384xf32>
      %c0_23 = arith.constant 0 : index
      %c0_24 = arith.constant 0 : index
      %27 = vector.load %arg3[%c0_23, %c0_24] : memref<8x384xf32, #tpu.memory_space<vmem>>, vector<8x384xf32>
      %28 = arith.addf %26, %27 : vector<8x384xf32>
      %29 = arith.truncf %22 : vector<8x128xf32> to vector<8x128xbf16>
      %c0_25 = arith.constant 0 : index
      %c0_26 = arith.constant 0 : index
      %30 = vector.load %arg5[%c0_25, %c0_26] : memref<128x384xbf16, #tpu.memory_space<vmem>>, vector<128x384xbf16>
      %cst_27 = arith.constant dense<0.000000e+00> : vector<8x384xf32>
      %31 = tpu.matmul %29, %30, %cst_27 {dimension_numbers = #tpu.dot_dimension_numbers<[1], [0], [0], [1], [0, 0, 1, 1], [], []>} : vector<8x128xbf16>, vector<128x384xbf16>, vector<8x384xf32> -> vector<8x384xf32>
      %32 = vector.extract_strided_slice %28 {offsets = [0, 0], sizes = [8, 128], strides = [1, 1]} : vector<8x384xf32> to vector<8x128xf32>
      %33 = vector.extract_strided_slice %31 {offsets = [0, 0], sizes = [8, 128], strides = [1, 1]} : vector<8x384xf32> to vector<8x128xf32>
      %34 = arith.addf %32, %33 : vector<8x128xf32>
      %35 = arith.negf %34 : vector<8x128xf32>
      %36 = math.exp %35 : vector<8x128xf32>
      %cst_28 = arith.constant 1.000000e+00 : f32
      %37 = vector.broadcast %cst_28 : f32 to vector<8x128xf32>
      %38 = arith.addf %37, %36 : vector<8x128xf32>
      %39 = arith.divf %37, %38 : vector<8x128xf32>
      %40 = vector.extract_strided_slice %28 {offsets = [0, 128], sizes = [8, 128], strides = [1, 1]} : vector<8x384xf32> to vector<8x128xf32>
      %41 = vector.extract_strided_slice %31 {offsets = [0, 128], sizes = [8, 128], strides = [1, 1]} : vector<8x384xf32> to vector<8x128xf32>
      %42 = arith.addf %40, %41 : vector<8x128xf32>
      %43 = arith.negf %42 : vector<8x128xf32>
      %44 = math.exp %43 : vector<8x128xf32>
      %cst_29 = arith.constant 1.000000e+00 : f32
      %45 = vector.broadcast %cst_29 : f32 to vector<8x128xf32>
      %46 = arith.addf %45, %44 : vector<8x128xf32>
      %47 = arith.divf %45, %46 : vector<8x128xf32>
      %48 = vector.extract_strided_slice %28 {offsets = [0, 256], sizes = [8, 128], strides = [1, 1]} : vector<8x384xf32> to vector<8x128xf32>
      %49 = vector.extract_strided_slice %31 {offsets = [0, 256], sizes = [8, 128], strides = [1, 1]} : vector<8x384xf32> to vector<8x128xf32>
      %c0_30 = arith.constant 0 : index
      %c0_31 = arith.constant 0 : index
      %50 = vector.load %arg6[%c0_30, %c0_31] : memref<1x128xf32, #tpu.memory_space<vmem>>, vector<1x128xf32>
      %51 = vector.broadcast %50 : vector<1x128xf32> to vector<8x128xf32>
      %52 = arith.addf %49, %51 : vector<8x128xf32>
      %53 = arith.mulf %39, %52 : vector<8x128xf32>
      %54 = arith.addf %48, %53 : vector<8x128xf32>
      %55 = math.tanh %54 : vector<8x128xf32>
      %cst_32 = arith.constant 1.000000e+00 : f32
      %56 = vector.broadcast %cst_32 : f32 to vector<8x128xf32>
      %57 = arith.subf %56, %47 : vector<8x128xf32>
      %58 = arith.mulf %57, %55 : vector<8x128xf32>
      %59 = arith.mulf %47, %22 : vector<8x128xf32>
      %60 = arith.addf %58, %59 : vector<8x128xf32>
      %c0_33 = arith.constant 0 : index
      %c0_34 = arith.constant 0 : index
      %61 = vector.load %arg11[%c0_33, %c0_34] : memref<8x128xf32, #tpu.memory_space<vmem>>, vector<8x128xf32>
      tpu.vector_store %arg11[%c0_33, %c0_34], %60 {strides = array<i32>} : memref<8x128xf32, #tpu.memory_space<vmem>>, vector<8x128xf32>,
      %62 = arith.index_cast %24 : i32 to index
      %c0_35 = arith.constant 0 : index
      %63 = vector.load %arg13[%62, %c0_35] : memref<64x128xf32, #tpu.memory_space<vmem>>, vector<8x128xf32>
      tpu.vector_store %arg13[%62, %c0_35], %60 {strides = array<i32>} : memref<64x128xf32, #tpu.memory_space<vmem>>, vector<8x128xf32>,
      %c1_i32_36 = arith.constant 1 : i32
      %c1_i32_37 = arith.constant 1 : i32
      %64 = arith.muli %c1_i32_36, %c1_i32_37 : i32
      %c0_i32_38 = arith.constant 0 : i32
      %65 = arith.addi %c0_i32_38, %64 : i32
      %c0_39 = arith.constant 0 : index
      %c0_40 = arith.constant 0 : index
      %66 = vector.load %arg11[%c0_39, %c0_40] : memref<8x128xf32, #tpu.memory_space<vmem>>, vector<8x128xf32>
      %c8_i32_41 = arith.constant 8 : i32
      %67 = arith.muli %65, %c8_i32_41 : i32
      %68 = tpu.assume_multiple %67, 8 : i32
      %69 = arith.index_cast %68 : i32 to index
      %c0_42 = arith.constant 0 : index
      %70 = vector.load %arg12[%69, %c0_42] : memref<64x384xf32, #tpu.memory_space<vmem>>, vector<8x384xf32>
      %c0_43 = arith.constant 0 : index
      %c0_44 = arith.constant 0 : index
      %71 = vector.load %arg3[%c0_43, %c0_44] : memref<8x384xf32, #tpu.memory_space<vmem>>, vector<8x384xf32>
      %72 = arith.addf %70, %71 : vector<8x384xf32>
      %73 = arith.truncf %66 : vector<8x128xf32> to vector<8x128xbf16>
      %c0_45 = arith.constant 0 : index
      %c0_46 = arith.constant 0 : index
      %74 = vector.load %arg5[%c0_45, %c0_46] : memref<128x384xbf16, #tpu.memory_space<vmem>>, vector<128x384xbf16>
      %cst_47 = arith.constant dense<0.000000e+00> : vector<8x384xf32>
      %75 = tpu.matmul %73, %74, %cst_47 {dimension_numbers = #tpu.dot_dimension_numbers<[1], [0], [0], [1], [0, 0, 1, 1], [], []>} : vector<8x128xbf16>, vector<128x384xbf16>, vector<8x384xf32> -> vector<8x384xf32>
      %76 = vector.extract_strided_slice %72 {offsets = [0, 0], sizes = [8, 128], strides = [1, 1]} : vector<8x384xf32> to vector<8x128xf32>
      %77 = vector.extract_strided_slice %75 {offsets = [0, 0], sizes = [8, 128], strides = [1, 1]} : vector<8x384xf32> to vector<8x128xf32>
      %78 = arith.addf %76, %77 : vector<8x128xf32>
      %79 = arith.negf %78 : vector<8x128xf32>
      %80 = math.exp %79 : vector<8x128xf32>
      %cst_48 = arith.constant 1.000000e+00 : f32
      %81 = vector.broadcast %cst_48 : f32 to vector<8x128xf32>
      %82 = arith.addf %81, %80 : vector<8x128xf32>
      %83 = arith.divf %81, %82 : vector<8x128xf32>
      %84 = vector.extract_strided_slice %72 {offsets = [0, 128], sizes = [8, 128], strides = [1, 1]} : vector<8x384xf32> to vector<8x128xf32>
      %85 = vector.extract_strided_slice %75 {offsets = [0, 128], sizes = [8, 128], strides = [1, 1]} : vector<8x384xf32> to vector<8x128xf32>
      %86 = arith.addf %84, %85 : vector<8x128xf32>
      %87 = arith.negf %86 : vector<8x128xf32>
      %88 = math.exp %87 : vector<8x128xf32>
      %cst_49 = arith.constant 1.000000e+00 : f32
      %89 = vector.broadcast %cst_49 : f32 to vector<8x128xf32>
      %90 = arith.addf %89, %88 : vector<8x128xf32>
      %91 = arith.divf %89, %90 : vector<8x128xf32>
      %92 = vector.extract_strided_slice %72 {offsets = [0, 256], sizes = [8, 128], strides = [1, 1]} : vector<8x384xf32> to vector<8x128xf32>
      %93 = vector.extract_strided_slice %75 {offsets = [0, 256], sizes = [8, 128], strides = [1, 1]} : vector<8x384xf32> to vector<8x128xf32>
      %c0_50 = arith.constant 0 : index
      %c0_51 = arith.constant 0 : index
      %94 = vector.load %arg6[%c0_50, %c0_51] : memref<1x128xf32, #tpu.memory_space<vmem>>, vector<1x128xf32>
      %95 = vector.broadcast %94 : vector<1x128xf32> to vector<8x128xf32>
      %96 = arith.addf %93, %95 : vector<8x128xf32>
      %97 = arith.mulf %83, %96 : vector<8x128xf32>
      %98 = arith.addf %92, %97 : vector<8x128xf32>
      %99 = math.tanh %98 : vector<8x128xf32>
      %cst_52 = arith.constant 1.000000e+00 : f32
      %100 = vector.broadcast %cst_52 : f32 to vector<8x128xf32>
      %101 = arith.subf %100, %91 : vector<8x128xf32>
      %102 = arith.mulf %101, %99 : vector<8x128xf32>
      %103 = arith.mulf %91, %66 : vector<8x128xf32>
      %104 = arith.addf %102, %103 : vector<8x128xf32>
      %c0_53 = arith.constant 0 : index
      %c0_54 = arith.constant 0 : index
      %105 = vector.load %arg11[%c0_53, %c0_54] : memref<8x128xf32, #tpu.memory_space<vmem>>, vector<8x128xf32>
      tpu.vector_store %arg11[%c0_53, %c0_54], %104 {strides = array<i32>} : memref<8x128xf32, #tpu.memory_space<vmem>>, vector<8x128xf32>,
      %106 = arith.index_cast %68 : i32 to index
      %c0_55 = arith.constant 0 : index
      %107 = vector.load %arg13[%106, %c0_55] : memref<64x128xf32, #tpu.memory_space<vmem>>, vector<8x128xf32>
      tpu.vector_store %arg13[%106, %c0_55], %104 {strides = array<i32>} : memref<64x128xf32, #tpu.memory_space<vmem>>, vector<8x128xf32>,
      %c2_i32 = arith.constant 2 : i32
      %c1_i32_56 = arith.constant 1 : i32
      %108 = arith.muli %c2_i32, %c1_i32_56 : i32
      %c0_i32_57 = arith.constant 0 : i32
      %109 = arith.addi %c0_i32_57, %108 : i32
      %c0_58 = arith.constant 0 : index
      %c0_59 = arith.constant 0 : index
      %110 = vector.load %arg11[%c0_58, %c0_59] : memref<8x128xf32, #tpu.memory_space<vmem>>, vector<8x128xf32>
      %c8_i32_60 = arith.constant 8 : i32
      %111 = arith.muli %109, %c8_i32_60 : i32
      %112 = tpu.assume_multiple %111, 8 : i32
      %113 = arith.index_cast %112 : i32 to index
      %c0_61 = arith.constant 0 : index
      %114 = vector.load %arg12[%113, %c0_61] : memref<64x384xf32, #tpu.memory_space<vmem>>, vector<8x384xf32>
      %c0_62 = arith.constant 0 : index
      %c0_63 = arith.constant 0 : index
      %115 = vector.load %arg3[%c0_62, %c0_63] : memref<8x384xf32, #tpu.memory_space<vmem>>, vector<8x384xf32>
      %116 = arith.addf %114, %115 : vector<8x384xf32>
      %117 = arith.truncf %110 : vector<8x128xf32> to vector<8x128xbf16>
      %c0_64 = arith.constant 0 : index
      %c0_65 = arith.constant 0 : index
      %118 = vector.load %arg5[%c0_64, %c0_65] : memref<128x384xbf16, #tpu.memory_space<vmem>>, vector<128x384xbf16>
      %cst_66 = arith.constant dense<0.000000e+00> : vector<8x384xf32>
      %119 = tpu.matmul %117, %118, %cst_66 {dimension_numbers = #tpu.dot_dimension_numbers<[1], [0], [0], [1], [0, 0, 1, 1], [], []>} : vector<8x128xbf16>, vector<128x384xbf16>, vector<8x384xf32> -> vector<8x384xf32>
      %120 = vector.extract_strided_slice %116 {offsets = [0, 0], sizes = [8, 128], strides = [1, 1]} : vector<8x384xf32> to vector<8x128xf32>
      %121 = vector.extract_strided_slice %119 {offsets = [0, 0], sizes = [8, 128], strides = [1, 1]} : vector<8x384xf32> to vector<8x128xf32>
      %122 = arith.addf %120, %121 : vector<8x128xf32>
      %123 = arith.negf %122 : vector<8x128xf32>
      %124 = math.exp %123 : vector<8x128xf32>
      %cst_67 = arith.constant 1.000000e+00 : f32
      %125 = vector.broadcast %cst_67 : f32 to vector<8x128xf32>
      %126 = arith.addf %125, %124 : vector<8x128xf32>
      %127 = arith.divf %125, %126 : vector<8x128xf32>
      %128 = vector.extract_strided_slice %116 {offsets = [0, 128], sizes = [8, 128], strides = [1, 1]} : vector<8x384xf32> to vector<8x128xf32>
      %129 = vector.extract_strided_slice %119 {offsets = [0, 128], sizes = [8, 128], strides = [1, 1]} : vector<8x384xf32> to vector<8x128xf32>
      %130 = arith.addf %128, %129 : vector<8x128xf32>
      %131 = arith.negf %130 : vector<8x128xf32>
      %132 = math.exp %131 : vector<8x128xf32>
      %cst_68 = arith.constant 1.000000e+00 : f32
      %133 = vector.broadcast %cst_68 : f32 to vector<8x128xf32>
      %134 = arith.addf %133, %132 : vector<8x128xf32>
      %135 = arith.divf %133, %134 : vector<8x128xf32>
      %136 = vector.extract_strided_slice %116 {offsets = [0, 256], sizes = [8, 128], strides = [1, 1]} : vector<8x384xf32> to vector<8x128xf32>
      %137 = vector.extract_strided_slice %119 {offsets = [0, 256], sizes = [8, 128], strides = [1, 1]} : vector<8x384xf32> to vector<8x128xf32>
      %c0_69 = arith.constant 0 : index
      %c0_70 = arith.constant 0 : index
      %138 = vector.load %arg6[%c0_69, %c0_70] : memref<1x128xf32, #tpu.memory_space<vmem>>, vector<1x128xf32>
      %139 = vector.broadcast %138 : vector<1x128xf32> to vector<8x128xf32>
      %140 = arith.addf %137, %139 : vector<8x128xf32>
      %141 = arith.mulf %127, %140 : vector<8x128xf32>
      %142 = arith.addf %136, %141 : vector<8x128xf32>
      %143 = math.tanh %142 : vector<8x128xf32>
      %cst_71 = arith.constant 1.000000e+00 : f32
      %144 = vector.broadcast %cst_71 : f32 to vector<8x128xf32>
      %145 = arith.subf %144, %135 : vector<8x128xf32>
      %146 = arith.mulf %145, %143 : vector<8x128xf32>
      %147 = arith.mulf %135, %110 : vector<8x128xf32>
      %148 = arith.addf %146, %147 : vector<8x128xf32>
      %c0_72 = arith.constant 0 : index
      %c0_73 = arith.constant 0 : index
      %149 = vector.load %arg11[%c0_72, %c0_73] : memref<8x128xf32, #tpu.memory_space<vmem>>, vector<8x128xf32>
      tpu.vector_store %arg11[%c0_72, %c0_73], %148 {strides = array<i32>} : memref<8x128xf32, #tpu.memory_space<vmem>>, vector<8x128xf32>,
      %150 = arith.index_cast %112 : i32 to index
      %c0_74 = arith.constant 0 : index
      %151 = vector.load %arg13[%150, %c0_74] : memref<64x128xf32, #tpu.memory_space<vmem>>, vector<8x128xf32>
      tpu.vector_store %arg13[%150, %c0_74], %148 {strides = array<i32>} : memref<64x128xf32, #tpu.memory_space<vmem>>, vector<8x128xf32>,
      %c3_i32 = arith.constant 3 : i32
      %c1_i32_75 = arith.constant 1 : i32
      %152 = arith.muli %c3_i32, %c1_i32_75 : i32
      %c0_i32_76 = arith.constant 0 : i32
      %153 = arith.addi %c0_i32_76, %152 : i32
      %c0_77 = arith.constant 0 : index
      %c0_78 = arith.constant 0 : index
      %154 = vector.load %arg11[%c0_77, %c0_78] : memref<8x128xf32, #tpu.memory_space<vmem>>, vector<8x128xf32>
      %c8_i32_79 = arith.constant 8 : i32
      %155 = arith.muli %153, %c8_i32_79 : i32
      %156 = tpu.assume_multiple %155, 8 : i32
      %157 = arith.index_cast %156 : i32 to index
      %c0_80 = arith.constant 0 : index
      %158 = vector.load %arg12[%157, %c0_80] : memref<64x384xf32, #tpu.memory_space<vmem>>, vector<8x384xf32>
      %c0_81 = arith.constant 0 : index
      %c0_82 = arith.constant 0 : index
      %159 = vector.load %arg3[%c0_81, %c0_82] : memref<8x384xf32, #tpu.memory_space<vmem>>, vector<8x384xf32>
      %160 = arith.addf %158, %159 : vector<8x384xf32>
      %161 = arith.truncf %154 : vector<8x128xf32> to vector<8x128xbf16>
      %c0_83 = arith.constant 0 : index
      %c0_84 = arith.constant 0 : index
      %162 = vector.load %arg5[%c0_83, %c0_84] : memref<128x384xbf16, #tpu.memory_space<vmem>>, vector<128x384xbf16>
      %cst_85 = arith.constant dense<0.000000e+00> : vector<8x384xf32>
      %163 = tpu.matmul %161, %162, %cst_85 {dimension_numbers = #tpu.dot_dimension_numbers<[1], [0], [0], [1], [0, 0, 1, 1], [], []>} : vector<8x128xbf16>, vector<128x384xbf16>, vector<8x384xf32> -> vector<8x384xf32>
      %164 = vector.extract_strided_slice %160 {offsets = [0, 0], sizes = [8, 128], strides = [1, 1]} : vector<8x384xf32> to vector<8x128xf32>
      %165 = vector.extract_strided_slice %163 {offsets = [0, 0], sizes = [8, 128], strides = [1, 1]} : vector<8x384xf32> to vector<8x128xf32>
      %166 = arith.addf %164, %165 : vector<8x128xf32>
      %167 = arith.negf %166 : vector<8x128xf32>
      %168 = math.exp %167 : vector<8x128xf32>
      %cst_86 = arith.constant 1.000000e+00 : f32
      %169 = vector.broadcast %cst_86 : f32 to vector<8x128xf32>
      %170 = arith.addf %169, %168 : vector<8x128xf32>
      %171 = arith.divf %169, %170 : vector<8x128xf32>
      %172 = vector.extract_strided_slice %160 {offsets = [0, 128], sizes = [8, 128], strides = [1, 1]} : vector<8x384xf32> to vector<8x128xf32>
      %173 = vector.extract_strided_slice %163 {offsets = [0, 128], sizes = [8, 128], strides = [1, 1]} : vector<8x384xf32> to vector<8x128xf32>
      %174 = arith.addf %172, %173 : vector<8x128xf32>
      %175 = arith.negf %174 : vector<8x128xf32>
      %176 = math.exp %175 : vector<8x128xf32>
      %cst_87 = arith.constant 1.000000e+00 : f32
      %177 = vector.broadcast %cst_87 : f32 to vector<8x128xf32>
      %178 = arith.addf %177, %176 : vector<8x128xf32>
      %179 = arith.divf %177, %178 : vector<8x128xf32>
      %180 = vector.extract_strided_slice %160 {offsets = [0, 256], sizes = [8, 128], strides = [1, 1]} : vector<8x384xf32> to vector<8x128xf32>
      %181 = vector.extract_strided_slice %163 {offsets = [0, 256], sizes = [8, 128], strides = [1, 1]} : vector<8x384xf32> to vector<8x128xf32>
      %c0_88 = arith.constant 0 : index
      %c0_89 = arith.constant 0 : index
      %182 = vector.load %arg6[%c0_88, %c0_89] : memref<1x128xf32, #tpu.memory_space<vmem>>, vector<1x128xf32>
      %183 = vector.broadcast %182 : vector<1x128xf32> to vector<8x128xf32>
      %184 = arith.addf %181, %183 : vector<8x128xf32>
      %185 = arith.mulf %171, %184 : vector<8x128xf32>
      %186 = arith.addf %180, %185 : vector<8x128xf32>
      %187 = math.tanh %186 : vector<8x128xf32>
      %cst_90 = arith.constant 1.000000e+00 : f32
      %188 = vector.broadcast %cst_90 : f32 to vector<8x128xf32>
      %189 = arith.subf %188, %179 : vector<8x128xf32>
      %190 = arith.mulf %189, %187 : vector<8x128xf32>
      %191 = arith.mulf %179, %154 : vector<8x128xf32>
      %192 = arith.addf %190, %191 : vector<8x128xf32>
      %c0_91 = arith.constant 0 : index
      %c0_92 = arith.constant 0 : index
      %193 = vector.load %arg11[%c0_91, %c0_92] : memref<8x128xf32, #tpu.memory_space<vmem>>, vector<8x128xf32>
      tpu.vector_store %arg11[%c0_91, %c0_92], %192 {strides = array<i32>} : memref<8x128xf32, #tpu.memory_space<vmem>>, vector<8x128xf32>,
      %194 = arith.index_cast %156 : i32 to index
      %c0_93 = arith.constant 0 : index
      %195 = vector.load %arg13[%194, %c0_93] : memref<64x128xf32, #tpu.memory_space<vmem>>, vector<8x128xf32>
      tpu.vector_store %arg13[%194, %c0_93], %192 {strides = array<i32>} : memref<64x128xf32, #tpu.memory_space<vmem>>, vector<8x128xf32>,
      %c4_i32 = arith.constant 4 : i32
      %c1_i32_94 = arith.constant 1 : i32
      %196 = arith.muli %c4_i32, %c1_i32_94 : i32
      %c0_i32_95 = arith.constant 0 : i32
      %197 = arith.addi %c0_i32_95, %196 : i32
      %c0_96 = arith.constant 0 : index
      %c0_97 = arith.constant 0 : index
      %198 = vector.load %arg11[%c0_96, %c0_97] : memref<8x128xf32, #tpu.memory_space<vmem>>, vector<8x128xf32>
      %c8_i32_98 = arith.constant 8 : i32
      %199 = arith.muli %197, %c8_i32_98 : i32
      %200 = tpu.assume_multiple %199, 8 : i32
      %201 = arith.index_cast %200 : i32 to index
      %c0_99 = arith.constant 0 : index
      %202 = vector.load %arg12[%201, %c0_99] : memref<64x384xf32, #tpu.memory_space<vmem>>, vector<8x384xf32>
      %c0_100 = arith.constant 0 : index
      %c0_101 = arith.constant 0 : index
      %203 = vector.load %arg3[%c0_100, %c0_101] : memref<8x384xf32, #tpu.memory_space<vmem>>, vector<8x384xf32>
      %204 = arith.addf %202, %203 : vector<8x384xf32>
      %205 = arith.truncf %198 : vector<8x128xf32> to vector<8x128xbf16>
      %c0_102 = arith.constant 0 : index
      %c0_103 = arith.constant 0 : index
      %206 = vector.load %arg5[%c0_102, %c0_103] : memref<128x384xbf16, #tpu.memory_space<vmem>>, vector<128x384xbf16>
      %cst_104 = arith.constant dense<0.000000e+00> : vector<8x384xf32>
      %207 = tpu.matmul %205, %206, %cst_104 {dimension_numbers = #tpu.dot_dimension_numbers<[1], [0], [0], [1], [0, 0, 1, 1], [], []>} : vector<8x128xbf16>, vector<128x384xbf16>, vector<8x384xf32> -> vector<8x384xf32>
      %208 = vector.extract_strided_slice %204 {offsets = [0, 0], sizes = [8, 128], strides = [1, 1]} : vector<8x384xf32> to vector<8x128xf32>
      %209 = vector.extract_strided_slice %207 {offsets = [0, 0], sizes = [8, 128], strides = [1, 1]} : vector<8x384xf32> to vector<8x128xf32>
      %210 = arith.addf %208, %209 : vector<8x128xf32>
      %211 = arith.negf %210 : vector<8x128xf32>
      %212 = math.exp %211 : vector<8x128xf32>
      %cst_105 = arith.constant 1.000000e+00 : f32
      %213 = vector.broadcast %cst_105 : f32 to vector<8x128xf32>
      %214 = arith.addf %213, %212 : vector<8x128xf32>
      %215 = arith.divf %213, %214 : vector<8x128xf32>
      %216 = vector.extract_strided_slice %204 {offsets = [0, 128], sizes = [8, 128], strides = [1, 1]} : vector<8x384xf32> to vector<8x128xf32>
      %217 = vector.extract_strided_slice %207 {offsets = [0, 128], sizes = [8, 128], strides = [1, 1]} : vector<8x384xf32> to vector<8x128xf32>
      %218 = arith.addf %216, %217 : vector<8x128xf32>
      %219 = arith.negf %218 : vector<8x128xf32>
      %220 = math.exp %219 : vector<8x128xf32>
      %cst_106 = arith.constant 1.000000e+00 : f32
      %221 = vector.broadcast %cst_106 : f32 to vector<8x128xf32>
      %222 = arith.addf %221, %220 : vector<8x128xf32>
      %223 = arith.divf %221, %222 : vector<8x128xf32>
      %224 = vector.extract_strided_slice %204 {offsets = [0, 256], sizes = [8, 128], strides = [1, 1]} : vector<8x384xf32> to vector<8x128xf32>
      %225 = vector.extract_strided_slice %207 {offsets = [0, 256], sizes = [8, 128], strides = [1, 1]} : vector<8x384xf32> to vector<8x128xf32>
      %c0_107 = arith.constant 0 : index
      %c0_108 = arith.constant 0 : index
      %226 = vector.load %arg6[%c0_107, %c0_108] : memref<1x128xf32, #tpu.memory_space<vmem>>, vector<1x128xf32>
      %227 = vector.broadcast %226 : vector<1x128xf32> to vector<8x128xf32>
      %228 = arith.addf %225, %227 : vector<8x128xf32>
      %229 = arith.mulf %215, %228 : vector<8x128xf32>
      %230 = arith.addf %224, %229 : vector<8x128xf32>
      %231 = math.tanh %230 : vector<8x128xf32>
      %cst_109 = arith.constant 1.000000e+00 : f32
      %232 = vector.broadcast %cst_109 : f32 to vector<8x128xf32>
      %233 = arith.subf %232, %223 : vector<8x128xf32>
      %234 = arith.mulf %233, %231 : vector<8x128xf32>
      %235 = arith.mulf %223, %198 : vector<8x128xf32>
      %236 = arith.addf %234, %235 : vector<8x128xf32>
      %c0_110 = arith.constant 0 : index
      %c0_111 = arith.constant 0 : index
      %237 = vector.load %arg11[%c0_110, %c0_111] : memref<8x128xf32, #tpu.memory_space<vmem>>, vector<8x128xf32>
      tpu.vector_store %arg11[%c0_110, %c0_111], %236 {strides = array<i32>} : memref<8x128xf32, #tpu.memory_space<vmem>>, vector<8x128xf32>,
      %238 = arith.index_cast %200 : i32 to index
      %c0_112 = arith.constant 0 : index
      %239 = vector.load %arg13[%238, %c0_112] : memref<64x128xf32, #tpu.memory_space<vmem>>, vector<8x128xf32>
      tpu.vector_store %arg13[%238, %c0_112], %236 {strides = array<i32>} : memref<64x128xf32, #tpu.memory_space<vmem>>, vector<8x128xf32>,
      %c5_i32 = arith.constant 5 : i32
      %c1_i32_113 = arith.constant 1 : i32
      %240 = arith.muli %c5_i32, %c1_i32_113 : i32
      %c0_i32_114 = arith.constant 0 : i32
      %241 = arith.addi %c0_i32_114, %240 : i32
      %c0_115 = arith.constant 0 : index
      %c0_116 = arith.constant 0 : index
      %242 = vector.load %arg11[%c0_115, %c0_116] : memref<8x128xf32, #tpu.memory_space<vmem>>, vector<8x128xf32>
      %c8_i32_117 = arith.constant 8 : i32
      %243 = arith.muli %241, %c8_i32_117 : i32
      %244 = tpu.assume_multiple %243, 8 : i32
      %245 = arith.index_cast %244 : i32 to index
      %c0_118 = arith.constant 0 : index
      %246 = vector.load %arg12[%245, %c0_118] : memref<64x384xf32, #tpu.memory_space<vmem>>, vector<8x384xf32>
      %c0_119 = arith.constant 0 : index
      %c0_120 = arith.constant 0 : index
      %247 = vector.load %arg3[%c0_119, %c0_120] : memref<8x384xf32, #tpu.memory_space<vmem>>, vector<8x384xf32>
      %248 = arith.addf %246, %247 : vector<8x384xf32>
      %249 = arith.truncf %242 : vector<8x128xf32> to vector<8x128xbf16>
      %c0_121 = arith.constant 0 : index
      %c0_122 = arith.constant 0 : index
      %250 = vector.load %arg5[%c0_121, %c0_122] : memref<128x384xbf16, #tpu.memory_space<vmem>>, vector<128x384xbf16>
      %cst_123 = arith.constant dense<0.000000e+00> : vector<8x384xf32>
      %251 = tpu.matmul %249, %250, %cst_123 {dimension_numbers = #tpu.dot_dimension_numbers<[1], [0], [0], [1], [0, 0, 1, 1], [], []>} : vector<8x128xbf16>, vector<128x384xbf16>, vector<8x384xf32> -> vector<8x384xf32>
      %252 = vector.extract_strided_slice %248 {offsets = [0, 0], sizes = [8, 128], strides = [1, 1]} : vector<8x384xf32> to vector<8x128xf32>
      %253 = vector.extract_strided_slice %251 {offsets = [0, 0], sizes = [8, 128], strides = [1, 1]} : vector<8x384xf32> to vector<8x128xf32>
      %254 = arith.addf %252, %253 : vector<8x128xf32>
      %255 = arith.negf %254 : vector<8x128xf32>
      %256 = math.exp %255 : vector<8x128xf32>
      %cst_124 = arith.constant 1.000000e+00 : f32
      %257 = vector.broadcast %cst_124 : f32 to vector<8x128xf32>
      %258 = arith.addf %257, %256 : vector<8x128xf32>
      %259 = arith.divf %257, %258 : vector<8x128xf32>
      %260 = vector.extract_strided_slice %248 {offsets = [0, 128], sizes = [8, 128], strides = [1, 1]} : vector<8x384xf32> to vector<8x128xf32>
      %261 = vector.extract_strided_slice %251 {offsets = [0, 128], sizes = [8, 128], strides = [1, 1]} : vector<8x384xf32> to vector<8x128xf32>
      %262 = arith.addf %260, %261 : vector<8x128xf32>
      %263 = arith.negf %262 : vector<8x128xf32>
      %264 = math.exp %263 : vector<8x128xf32>
      %cst_125 = arith.constant 1.000000e+00 : f32
      %265 = vector.broadcast %cst_125 : f32 to vector<8x128xf32>
      %266 = arith.addf %265, %264 : vector<8x128xf32>
      %267 = arith.divf %265, %266 : vector<8x128xf32>
      %268 = vector.extract_strided_slice %248 {offsets = [0, 256], sizes = [8, 128], strides = [1, 1]} : vector<8x384xf32> to vector<8x128xf32>
      %269 = vector.extract_strided_slice %251 {offsets = [0, 256], sizes = [8, 128], strides = [1, 1]} : vector<8x384xf32> to vector<8x128xf32>
      %c0_126 = arith.constant 0 : index
      %c0_127 = arith.constant 0 : index
      %270 = vector.load %arg6[%c0_126, %c0_127] : memref<1x128xf32, #tpu.memory_space<vmem>>, vector<1x128xf32>
      %271 = vector.broadcast %270 : vector<1x128xf32> to vector<8x128xf32>
      %272 = arith.addf %269, %271 : vector<8x128xf32>
      %273 = arith.mulf %259, %272 : vector<8x128xf32>
      %274 = arith.addf %268, %273 : vector<8x128xf32>
      %275 = math.tanh %274 : vector<8x128xf32>
      %cst_128 = arith.constant 1.000000e+00 : f32
      %276 = vector.broadcast %cst_128 : f32 to vector<8x128xf32>
      %277 = arith.subf %276, %267 : vector<8x128xf32>
      %278 = arith.mulf %277, %275 : vector<8x128xf32>
      %279 = arith.mulf %267, %242 : vector<8x128xf32>
      %280 = arith.addf %278, %279 : vector<8x128xf32>
      %c0_129 = arith.constant 0 : index
      %c0_130 = arith.constant 0 : index
      %281 = vector.load %arg11[%c0_129, %c0_130] : memref<8x128xf32, #tpu.memory_space<vmem>>, vector<8x128xf32>
      tpu.vector_store %arg11[%c0_129, %c0_130], %280 {strides = array<i32>} : memref<8x128xf32, #tpu.memory_space<vmem>>, vector<8x128xf32>,
      %282 = arith.index_cast %244 : i32 to index
      %c0_131 = arith.constant 0 : index
      %283 = vector.load %arg13[%282, %c0_131] : memref<64x128xf32, #tpu.memory_space<vmem>>, vector<8x128xf32>
      tpu.vector_store %arg13[%282, %c0_131], %280 {strides = array<i32>} : memref<64x128xf32, #tpu.memory_space<vmem>>, vector<8x128xf32>,
      %c6_i32 = arith.constant 6 : i32
      %c1_i32_132 = arith.constant 1 : i32
      %284 = arith.muli %c6_i32, %c1_i32_132 : i32
      %c0_i32_133 = arith.constant 0 : i32
      %285 = arith.addi %c0_i32_133, %284 : i32
      %c0_134 = arith.constant 0 : index
      %c0_135 = arith.constant 0 : index
      %286 = vector.load %arg11[%c0_134, %c0_135] : memref<8x128xf32, #tpu.memory_space<vmem>>, vector<8x128xf32>
      %c8_i32_136 = arith.constant 8 : i32
      %287 = arith.muli %285, %c8_i32_136 : i32
      %288 = tpu.assume_multiple %287, 8 : i32
      %289 = arith.index_cast %288 : i32 to index
      %c0_137 = arith.constant 0 : index
      %290 = vector.load %arg12[%289, %c0_137] : memref<64x384xf32, #tpu.memory_space<vmem>>, vector<8x384xf32>
      %c0_138 = arith.constant 0 : index
      %c0_139 = arith.constant 0 : index
      %291 = vector.load %arg3[%c0_138, %c0_139] : memref<8x384xf32, #tpu.memory_space<vmem>>, vector<8x384xf32>
      %292 = arith.addf %290, %291 : vector<8x384xf32>
      %293 = arith.truncf %286 : vector<8x128xf32> to vector<8x128xbf16>
      %c0_140 = arith.constant 0 : index
      %c0_141 = arith.constant 0 : index
      %294 = vector.load %arg5[%c0_140, %c0_141] : memref<128x384xbf16, #tpu.memory_space<vmem>>, vector<128x384xbf16>
      %cst_142 = arith.constant dense<0.000000e+00> : vector<8x384xf32>
      %295 = tpu.matmul %293, %294, %cst_142 {dimension_numbers = #tpu.dot_dimension_numbers<[1], [0], [0], [1], [0, 0, 1, 1], [], []>} : vector<8x128xbf16>, vector<128x384xbf16>, vector<8x384xf32> -> vector<8x384xf32>
      %296 = vector.extract_strided_slice %292 {offsets = [0, 0], sizes = [8, 128], strides = [1, 1]} : vector<8x384xf32> to vector<8x128xf32>
      %297 = vector.extract_strided_slice %295 {offsets = [0, 0], sizes = [8, 128], strides = [1, 1]} : vector<8x384xf32> to vector<8x128xf32>
      %298 = arith.addf %296, %297 : vector<8x128xf32>
      %299 = arith.negf %298 : vector<8x128xf32>
      %300 = math.exp %299 : vector<8x128xf32>
      %cst_143 = arith.constant 1.000000e+00 : f32
      %301 = vector.broadcast %cst_143 : f32 to vector<8x128xf32>
      %302 = arith.addf %301, %300 : vector<8x128xf32>
      %303 = arith.divf %301, %302 : vector<8x128xf32>
      %304 = vector.extract_strided_slice %292 {offsets = [0, 128], sizes = [8, 128], strides = [1, 1]} : vector<8x384xf32> to vector<8x128xf32>
      %305 = vector.extract_strided_slice %295 {offsets = [0, 128], sizes = [8, 128], strides = [1, 1]} : vector<8x384xf32> to vector<8x128xf32>
      %306 = arith.addf %304, %305 : vector<8x128xf32>
      %307 = arith.negf %306 : vector<8x128xf32>
      %308 = math.exp %307 : vector<8x128xf32>
      %cst_144 = arith.constant 1.000000e+00 : f32
      %309 = vector.broadcast %cst_144 : f32 to vector<8x128xf32>
      %310 = arith.addf %309, %308 : vector<8x128xf32>
      %311 = arith.divf %309, %310 : vector<8x128xf32>
      %312 = vector.extract_strided_slice %292 {offsets = [0, 256], sizes = [8, 128], strides = [1, 1]} : vector<8x384xf32> to vector<8x128xf32>
      %313 = vector.extract_strided_slice %295 {offsets = [0, 256], sizes = [8, 128], strides = [1, 1]} : vector<8x384xf32> to vector<8x128xf32>
      %c0_145 = arith.constant 0 : index
      %c0_146 = arith.constant 0 : index
      %314 = vector.load %arg6[%c0_145, %c0_146] : memref<1x128xf32, #tpu.memory_space<vmem>>, vector<1x128xf32>
      %315 = vector.broadcast %314 : vector<1x128xf32> to vector<8x128xf32>
      %316 = arith.addf %313, %315 : vector<8x128xf32>
      %317 = arith.mulf %303, %316 : vector<8x128xf32>
      %318 = arith.addf %312, %317 : vector<8x128xf32>
      %319 = math.tanh %318 : vector<8x128xf32>
      %cst_147 = arith.constant 1.000000e+00 : f32
      %320 = vector.broadcast %cst_147 : f32 to vector<8x128xf32>
      %321 = arith.subf %320, %311 : vector<8x128xf32>
      %322 = arith.mulf %321, %319 : vector<8x128xf32>
      %323 = arith.mulf %311, %286 : vector<8x128xf32>
      %324 = arith.addf %322, %323 : vector<8x128xf32>
      %c0_148 = arith.constant 0 : index
      %c0_149 = arith.constant 0 : index
      %325 = vector.load %arg11[%c0_148, %c0_149] : memref<8x128xf32, #tpu.memory_space<vmem>>, vector<8x128xf32>
      tpu.vector_store %arg11[%c0_148, %c0_149], %324 {strides = array<i32>} : memref<8x128xf32, #tpu.memory_space<vmem>>, vector<8x128xf32>,
      %326 = arith.index_cast %288 : i32 to index
      %c0_150 = arith.constant 0 : index
      %327 = vector.load %arg13[%326, %c0_150] : memref<64x128xf32, #tpu.memory_space<vmem>>, vector<8x128xf32>
      tpu.vector_store %arg13[%326, %c0_150], %324 {strides = array<i32>} : memref<64x128xf32, #tpu.memory_space<vmem>>, vector<8x128xf32>,
      %c7_i32 = arith.constant 7 : i32
      %c1_i32_151 = arith.constant 1 : i32
      %328 = arith.muli %c7_i32, %c1_i32_151 : i32
      %c0_i32_152 = arith.constant 0 : i32
      %329 = arith.addi %c0_i32_152, %328 : i32
      %c0_153 = arith.constant 0 : index
      %c0_154 = arith.constant 0 : index
      %330 = vector.load %arg11[%c0_153, %c0_154] : memref<8x128xf32, #tpu.memory_space<vmem>>, vector<8x128xf32>
      %c8_i32_155 = arith.constant 8 : i32
      %331 = arith.muli %329, %c8_i32_155 : i32
      %332 = tpu.assume_multiple %331, 8 : i32
      %333 = arith.index_cast %332 : i32 to index
      %c0_156 = arith.constant 0 : index
      %334 = vector.load %arg12[%333, %c0_156] : memref<64x384xf32, #tpu.memory_space<vmem>>, vector<8x384xf32>
      %c0_157 = arith.constant 0 : index
      %c0_158 = arith.constant 0 : index
      %335 = vector.load %arg3[%c0_157, %c0_158] : memref<8x384xf32, #tpu.memory_space<vmem>>, vector<8x384xf32>
      %336 = arith.addf %334, %335 : vector<8x384xf32>
      %337 = arith.truncf %330 : vector<8x128xf32> to vector<8x128xbf16>
      %c0_159 = arith.constant 0 : index
      %c0_160 = arith.constant 0 : index
      %338 = vector.load %arg5[%c0_159, %c0_160] : memref<128x384xbf16, #tpu.memory_space<vmem>>, vector<128x384xbf16>
      %cst_161 = arith.constant dense<0.000000e+00> : vector<8x384xf32>
      %339 = tpu.matmul %337, %338, %cst_161 {dimension_numbers = #tpu.dot_dimension_numbers<[1], [0], [0], [1], [0, 0, 1, 1], [], []>} : vector<8x128xbf16>, vector<128x384xbf16>, vector<8x384xf32> -> vector<8x384xf32>
      %340 = vector.extract_strided_slice %336 {offsets = [0, 0], sizes = [8, 128], strides = [1, 1]} : vector<8x384xf32> to vector<8x128xf32>
      %341 = vector.extract_strided_slice %339 {offsets = [0, 0], sizes = [8, 128], strides = [1, 1]} : vector<8x384xf32> to vector<8x128xf32>
      %342 = arith.addf %340, %341 : vector<8x128xf32>
      %343 = arith.negf %342 : vector<8x128xf32>
      %344 = math.exp %343 : vector<8x128xf32>
      %cst_162 = arith.constant 1.000000e+00 : f32
      %345 = vector.broadcast %cst_162 : f32 to vector<8x128xf32>
      %346 = arith.addf %345, %344 : vector<8x128xf32>
      %347 = arith.divf %345, %346 : vector<8x128xf32>
      %348 = vector.extract_strided_slice %336 {offsets = [0, 128], sizes = [8, 128], strides = [1, 1]} : vector<8x384xf32> to vector<8x128xf32>
      %349 = vector.extract_strided_slice %339 {offsets = [0, 128], sizes = [8, 128], strides = [1, 1]} : vector<8x384xf32> to vector<8x128xf32>
      %350 = arith.addf %348, %349 : vector<8x128xf32>
      %351 = arith.negf %350 : vector<8x128xf32>
      %352 = math.exp %351 : vector<8x128xf32>
      %cst_163 = arith.constant 1.000000e+00 : f32
      %353 = vector.broadcast %cst_163 : f32 to vector<8x128xf32>
      %354 = arith.addf %353, %352 : vector<8x128xf32>
      %355 = arith.divf %353, %354 : vector<8x128xf32>
      %356 = vector.extract_strided_slice %336 {offsets = [0, 256], sizes = [8, 128], strides = [1, 1]} : vector<8x384xf32> to vector<8x128xf32>
      %357 = vector.extract_strided_slice %339 {offsets = [0, 256], sizes = [8, 128], strides = [1, 1]} : vector<8x384xf32> to vector<8x128xf32>
      %c0_164 = arith.constant 0 : index
      %c0_165 = arith.constant 0 : index
      %358 = vector.load %arg6[%c0_164, %c0_165] : memref<1x128xf32, #tpu.memory_space<vmem>>, vector<1x128xf32>
      %359 = vector.broadcast %358 : vector<1x128xf32> to vector<8x128xf32>
      %360 = arith.addf %357, %359 : vector<8x128xf32>
      %361 = arith.mulf %347, %360 : vector<8x128xf32>
      %362 = arith.addf %356, %361 : vector<8x128xf32>
      %363 = math.tanh %362 : vector<8x128xf32>
      %cst_166 = arith.constant 1.000000e+00 : f32
      %364 = vector.broadcast %cst_166 : f32 to vector<8x128xf32>
      %365 = arith.subf %364, %355 : vector<8x128xf32>
      %366 = arith.mulf %365, %363 : vector<8x128xf32>
      %367 = arith.mulf %355, %330 : vector<8x128xf32>
      %368 = arith.addf %366, %367 : vector<8x128xf32>
      %c0_167 = arith.constant 0 : index
      %c0_168 = arith.constant 0 : index
      %369 = vector.load %arg11[%c0_167, %c0_168] : memref<8x128xf32, #tpu.memory_space<vmem>>, vector<8x128xf32>
      tpu.vector_store %arg11[%c0_167, %c0_168], %368 {strides = array<i32>} : memref<8x128xf32, #tpu.memory_space<vmem>>, vector<8x128xf32>,
      %370 = arith.index_cast %332 : i32 to index
      %c0_169 = arith.constant 0 : index
      %371 = vector.load %arg13[%370, %c0_169] : memref<64x128xf32, #tpu.memory_space<vmem>>, vector<8x128xf32>
      tpu.vector_store %arg13[%370, %c0_169], %368 {strides = array<i32>} : memref<64x128xf32, #tpu.memory_space<vmem>>, vector<8x128xf32>,
      %c8_i32_170 = arith.constant 8 : i32
    } else {
    }
    %c0 = arith.constant 0 : index
    %c0_4 = arith.constant 0 : index
    %8 = vector.load %arg13[%c0, %c0_4] : memref<64x128xf32, #tpu.memory_space<vmem>>, vector<64x128xf32>
    %9 = arith.truncf %8 : vector<64x128xf32> to vector<64x128xbf16>
    %c0_5 = arith.constant 0 : index
    %c0_6 = arith.constant 0 : index
    %10 = vector.load %arg8[%c0_5, %c0_6] : memref<128x128xbf16, #tpu.memory_space<vmem>>, vector<128x128xbf16>
    %cst = arith.constant dense<0.000000e+00> : vector<64x128xf32>
    %11 = tpu.matmul %9, %10, %cst {dimension_numbers = #tpu.dot_dimension_numbers<[1], [0], [0], [1], [0, 0, 1, 1], [], []>} : vector<64x128xbf16>, vector<128x128xbf16>, vector<64x128xf32> -> vector<64x128xf32>
    %c0_7 = arith.constant 0 : index
    %c0_8 = arith.constant 0 : index
    %12 = vector.load %arg9[%c0_7, %c0_8] : memref<1x128xf32, #tpu.memory_space<vmem>>, vector<1x128xf32>
    %13 = vector.broadcast %12 : vector<1x128xf32> to vector<64x128xf32>
    %14 = arith.addf %11, %13 : vector<64x128xf32>
    %c0_9 = arith.constant 0 : index
    %c0_10 = arith.constant 0 : index
    %15 = vector.load %arg10[%c0_9, %c0_10] : memref<64x128xf32, #tpu.memory_space<vmem>>, vector<64x128xf32>
    tpu.vector_store %arg10[%c0_9, %c0_10], %14 {strides = array<i32>} : memref<64x128xf32, #tpu.memory_space<vmem>>, vector<64x128xf32>,
    return
  }
  func.func @transform_0(%arg0: i32, %arg1: i32) -> (i32, i32) {
    %c0_i32 = arith.constant 0 : i32
    %c0_i32_0 = arith.constant 0 : i32
    return %arg0, %c0_i32 : i32, i32
  }
  func.func @transform_1(%arg0: i32, %arg1: i32) -> (i32, i32) {
    %c0_i32 = arith.constant 0 : i32
    %c0_i32_0 = arith.constant 0 : i32
    %c0_i32_1 = arith.constant 0 : i32
    return %c0_i32, %c0_i32_0 : i32, i32
  }
  func.func @transform_2(%arg0: i32, %arg1: i32) -> (i32, i32) {
    %c0_i32 = arith.constant 0 : i32
    %c0_i32_0 = arith.constant 0 : i32
    %c0_i32_1 = arith.constant 0 : i32
    return %c0_i32, %c0_i32_0 : i32, i32
  }
  func.func @transform_3(%arg0: i32, %arg1: i32) -> (i32, i32) {
    %c0_i32 = arith.constant 0 : i32
    %c0_i32_0 = arith.constant 0 : i32
    %c0_i32_1 = arith.constant 0 : i32
    return %c0_i32, %c0_i32_0 : i32, i32
  }
  func.func @transform_4(%arg0: i32, %arg1: i32) -> (i32, i32) {
    %c0_i32 = arith.constant 0 : i32
    %c0_i32_0 = arith.constant 0 : i32
    %c0_i32_1 = arith.constant 0 : i32
    return %c0_i32, %c0_i32_0 : i32, i32
  }
  func.func @transform_5(%arg0: i32, %arg1: i32) -> (i32, i32) {
    %c0_i32 = arith.constant 0 : i32
    %c0_i32_0 = arith.constant 0 : i32
    %c0_i32_1 = arith.constant 0 : i32
    return %c0_i32, %c0_i32_0 : i32, i32
  }
  func.func @transform_6(%arg0: i32, %arg1: i32) -> (i32, i32) {
    %c0_i32 = arith.constant 0 : i32
    %c0_i32_0 = arith.constant 0 : i32
    return %c0_i32, %arg1 : i32, i32
  }
  func.func @transform_7(%arg0: i32, %arg1: i32) -> (i32, i32) {
    %c0_i32 = arith.constant 0 : i32
    %c0_i32_0 = arith.constant 0 : i32
    return %c0_i32, %arg1 : i32, i32
  }
  func.func @transform_8(%arg0: i32, %arg1: i32) -> (i32, i32) {
    %c0_i32 = arith.constant 0 : i32
    return %arg0, %arg1 : i32, i32
  }
  func.func @transform_9(%arg0: i32, %arg1: i32) -> (i32, i32) {
    %c0_i32 = arith.constant 0 : i32
    %c0_i32_0 = arith.constant 0 : i32
    %c0_i32_1 = arith.constant 0 : i32
    return %c0_i32, %c0_i32_0 : i32, i32
  }
}

</mosaic_0001>

<bundles_post_ra>
// kernel: encoder_decoder_forward.2
= control target key start
LH: loop header
LB: loop body
LE: loop exit
PB: predicated region body
PF: predicated region fallthrough
CT: control target
= control target key end

     0   :  { %v3387_v1 = vmov 0   ;;  %v3388_v38 = vmov 0.0   ;;  %vm3389_vm0 = vmmov 0   ;;  %s4216_s1 = inlined_call_operand.vmem [shape: bf16[128,384], index: 1, kind: input, shape index: {}]   ;;  %s4217_s0 = inlined_call_operand.vmem [shape: bf16[64,128], index: 0, kind: input, shape index: {}]   ;;  %s4218_s2 = inlined_call_operand.vmem [shape: bf16[128,384], index: 2, kind: input, shape index: {}]   ;;  %s4219_s5 = inlined_call_operand.vmem [shape: f32[8,128], index: 5, kind: input, shape index: {}]   ;;  %s4220_s3 = inlined_call_operand.vmem [shape: f32[1,384], index: 3, kind: input, shape index: {}]   ;;  %s4221_s4 = inlined_call_operand.vmem [shape: f32[1,128], index: 4, kind: input, shape index: {}]   ;;  %s4222_s6 = inlined_call_operand.vmem [shape: f32[8,128], index: 6, kind: output, shape index: {}]  }
   0x1   :  { %v3159_v0 = vld [vmem:[%s4216_s1 + $0xac] ss:$12 sps:$4 sm:$0xff]   ;;  %271 = vmatprep.mubr.bf16.mxu0 %v3387_v1  ;;  %v3161_v2 = vld [vmem:[%s4216_s1 + $0xa8] ss:$12 sps:$4 sm:$0xff]   ;;  %v3164_v4 = vld [vmem:[%s4216_s1 + $0x90] ss:$12 sps:$4 sm:$0xff]  }
   0x2   :  { %239 = vmatprep.subr.bf16.mxu0 %v3159_v0  ;;  %v3162_v3 = vld [vmem:[%s4216_s1 + $0x94] ss:$12 sps:$4 sm:$0xff]   ;;  %v3165_v5 = vld [vmem:[%s4216_s1 + $0x7c] ss:$12 sps:$4 sm:$0xff]   ;;  %v3167_v6 = vld [vmem:[%s4216_s1 + $0x78] ss:$12 sps:$4 sm:$0xff]   ;;  %v72_v0 = vlaneseq }
   0x3   :  { %240 = vmatpush1.bf16.msra.mxu0 %v3161_v2  ;;  %v3168_v7 = vld [vmem:[%s4216_s1 + $0x64] ss:$12 sps:$4 sm:$0xff]   ;;  %v3170_v9 = vld [vmem:[%s4216_s1 + $0x60] ss:$12 sps:$4 sm:$0xff]   ;;  %v3173_v13 = vld [vmem:[%s4216_s1 + $0x48] ss:$12 sps:$4 sm:$0xff]  }
   0x4   :  { %241 = vmatprep.subr.bf16.mxu0 %v3162_v3  ;;  %v3180_v8 = vld [vmem:[%s4216_s1 + $0xb0] ss:$12 sps:$4 sm:$0xff]   ;;  %v3171_v10 = vld [vmem:[%s4216_s1 + $0x4c] ss:$12 sps:$4 sm:$0xff]   ;;  %v3185_v12 = vld [vmem:[%s4217_s0] sm:$0xff]   ;;  %v73_v2 = vshrl.u32 %v72_v0, 7 }
   0x5   :  { %2972 = vmatprep.subr.bf16.mxu1 %v3180_v8  ;;  %v3184_v11 = vld [vmem:[%s4216_s1 + $0x98] ss:$12 sps:$4 sm:$0xff]   ;;  %v3189_v14 = vld [vmem:[%s4216_s1 + $0x80] ss:$12 sps:$4 sm:$0xff]   ;;  %2988 = vmatprep.mubr.bf16.mxu1 %v3185_v12  ;;  %v3193_v16 = vld [vmem:[%s4216_s1 + $0x68] ss:$12 sps:$4 sm:$0xff]  }
   0x6   :  { %2973 = vmatpush3.bf16.msra.mxu1 %v3180_v8  ;;  %v3174_v15 = vld [vmem:[%s4216_s1 + $0x34] ss:$12 sps:$4 sm:$0xff]   ;;  %v3176_v17 = vld [vmem:[%s4216_s1 + $0x30] ss:$12 sps:$4 sm:$0xff]   ;;  %v3179_v20 = vld [vmem:[%s4216_s1 + $0x18] ss:$12 sps:$4 sm:$0xff]  }
   0x7   :  { %242 = vmatpush1.bf16.msra.mxu0 %v3164_v4  ;;  %2974 = vmatprep.subr.bf16.mxu1 %v3184_v11  ;;  %v3177_v18 = vld [vmem:[%s4216_s1 + $0x1c] ss:$12 sps:$4 sm:$0xff]   ;;  %v3181_v21 = vld [vmem:[%s4216_s1 + $0x4] ss:$12 sps:$4 sm:$0xff]   ;;  %v3183_v23 = vld [vmem:[%s4216_s1] ss:$12 sps:$4 sm:$0xff]  }
   0x8   :  { %243 = vmatprep.subr.bf16.mxu0 %v3165_v5  ;;  %v3198_v19 = vld [vmem:[%s4216_s1 + $0x50] ss:$12 sps:$4 sm:$0xff]   ;;  %v3202_v22 = vld [vmem:[%s4216_s1 + $0x38] ss:$12 sps:$4 sm:$0xff]   ;;  %v3207_v25 = vld [vmem:[%s4216_s1 + $0x20] ss:$12 sps:$4 sm:$0xff]  }
   0x9   :  { %v3498_v24 = vld [vmem:[%s4218_s2 + $0xac] ss:$12 sps:$4 sm:$0xff]   ;;  %v3506_v26 = vld [vmem:[%s4218_s2 + $0xa8] ss:$12 sps:$4 sm:$0xff]   ;;  %v3521_v29 = vld [vmem:[%s4218_s2 + $0x90] ss:$12 sps:$4 sm:$0xff]  }
   0xa   :  { %2975 = vmatpush3.bf16.msra.mxu1 %v3184_v11  ;;  %v3512_v27 = vld [vmem:[%s4218_s2 + $0x94] ss:$12 sps:$4 sm:$0xff]   ;;  %v3528_v30 = vld [vmem:[%s4218_s2 + $0x7c] ss:$12 sps:$4 sm:$0xff]   ;;  %v3537_v32 = vld [vmem:[%s4218_s2 + $0x78] ss:$12 sps:$4 sm:$0xff]  }
   0xb   :  { %244 = vmatpush1.bf16.msra.mxu0 %v3167_v6  ;;  %2976 = vmatprep.subr.bf16.mxu1 %v3189_v14  ;;  %v3211_v28 = vld [vmem:[%s4216_s1 + $0x8] ss:$12 sps:$4 sm:$0xff]   ;;  %v3543_v33 = vld [vmem:[%s4218_s2 + $0x64] ss:$12 sps:$4 sm:$0xff]   ;;  %v3548_v34 = vld [vmem:[%s4218_s2 + $0x60] ss:$12 sps:$4 sm:$0xff]  }
   0xc   :  { %245 = vmatprep.subr.bf16.mxu0 %v3168_v7  ;;  %v3194_v31 = vld [vmem:[%s4217_s0 + $0x8] sm:$0xff]   ;;  %v3203_v35 = vld [vmem:[%s4217_s0 + $0x10] sm:$0xff]   ;;  %v3220_v39 = vld [vmem:[%s4218_s2 + $0x98] ss:$12 sps:$4 sm:$0xff]   ;;  %v74_v3 = vsub.s32 0, %v73_v2  ;;  %v78_v6 = vsub.s32 1, %v73_v2 }
   0xd   :  { %v3219_v36 = vld [vmem:[%s4218_s2 + $0xb0] ss:$12 sps:$4 sm:$0xff]   ;;  %v3559_v37 = vld [vmem:[%s4218_s2 + $0x4c] ss:$12 sps:$4 sm:$0xff]   ;;  %v3571_v40 = vld [vmem:[%s4218_s2 + $0x48] ss:$12 sps:$4 sm:$0xff]  }
   0xe   :  { %2977 = vmatpush3.bf16.msra.mxu1 %v3189_v14  ;;  %v3576_v41 = vld [vmem:[%s4218_s2 + $0x34] ss:$12 sps:$4 sm:$0xff]   ;;  %v3212_v43 = vld [vmem:[%s4217_s0 + $0x18] sm:$0xff]   ;;  %v3614_v48 = vld [vmem:[%s4218_s2 + $0x4] ss:$12 sps:$4 sm:$0xff]  }
   0xf   :  { %246 = vmatpush1.bf16.msra.mxu0 %v3170_v9  ;;  %2978 = vmatprep.subr.bf16.mxu1 %v3193_v16  ;;  %v3221_v42 = vld [vmem:[%s4218_s2 + $0x80] ss:$12 sps:$4 sm:$0xff]   ;;  %v3590_v44 = vld [vmem:[%s4218_s2 + $0x30] ss:$12 sps:$4 sm:$0xff]   ;;  %v3222_v46 = vld [vmem:[%s4218_s2 + $0x68] ss:$12 sps:$4 sm:$0xff]  }
  0x10   :  { %247 = vmatprep.subr.bf16.mxu0 %v3171_v10  ;;  %v3595_v45 = vld [vmem:[%s4218_s2 + $0x1c] ss:$12 sps:$4 sm:$0xff]   ;;  %v3607_v47 = vld [vmem:[%s4218_s2 + $0x18] ss:$12 sps:$4 sm:$0xff]   ;;  %v3625_v50 = vld [vmem:[%s4218_s2] ss:$12 sps:$4 sm:$0xff]  }
  0x11   :  { %v3223_v49 = vld [vmem:[%s4218_s2 + $0x50] ss:$12 sps:$4 sm:$0xff]   ;;  %v3630_v51 = vld [vmem:[%s4219_s5] sm:$0xff]  ;;  %v3226_v55 = vld [vmem:[%s4218_s2 + $0x8] ss:$12 sps:$4 sm:$0xff]   ;;  %v82_v9 = vsub.s32 2, %v73_v2 }
  0x12   :  { %2979 = vmatpush3.bf16.msra.mxu1 %v3193_v16  ;;  %v3224_v52 = vld [vmem:[%s4218_s2 + $0x38] ss:$12 sps:$4 sm:$0xff]   ;;  %v408_v53 = vpack.c.bf16 %v3630_v51, %v3630_v51  ;;  %v3225_v54 = vld [vmem:[%s4218_s2 + $0x20] ss:$12 sps:$4 sm:$0xff]   ;;  %v3227_v56 = vld [vmem:[%s4218_s2 + $0xb0] ss:$12 sps:$4 sm:$0xff]  }
  0x13   :  { %248 = vmatpush1.bf16.msra.mxu0 %v3173_v13  ;;  %2980 = vmatprep.subr.bf16.mxu1 %v3198_v19  ;;  %v3228_v57 = vld [vmem:[%s4218_s2 + $0x98] ss:$12 sps:$4 sm:$0xff]   ;;  %v3229_v58 = vld [vmem:[%s4218_s2 + $0x80] ss:$12 sps:$4 sm:$0xff]   ;;  %v3230_v59 = vld [vmem:[%s4218_s2 + $0x68] ss:$12 sps:$4 sm:$0xff]  }
  0x14   :  { %249 = vmatprep.subr.bf16.mxu0 %v3174_v15  ;;  %v3231_v60 = vld [vmem:[%s4218_s2 + $0x50] ss:$12 sps:$4 sm:$0xff]   ;;  %v3232_v61 = vld [vmem:[%s4218_s2 + $0x38] ss:$12 sps:$4 sm:$0xff]   ;;  %v3233_v62 = vld [vmem:[%s4218_s2 + $0x20] ss:$12 sps:$4 sm:$0xff]  }
  0x15   :  { %v3234_v63 = vld [vmem:[%s4218_s2 + $0x8] ss:$12 sps:$4 sm:$0xff]   ;;  %v70_v4 = vld [vmem:[%s4220_s3] sm:$0x7] }
  0x16   :  { %2981 = vmatpush3.bf16.msra.mxu1 %v3198_v19  ;;  %v75_v8 = vrot.slane %v70_v4, %v74_v3  ;;  %v79_v11 = vrot.slane %v70_v4, %v78_v6  ;;  %v3711_v15 = vrot.slane %v70_v4, %v82_v9 }
  0x17   :  { %250 = vmatpush1.bf16.msra.mxu0 %v3176_v17  ;;  %2982 = vmatprep.subr.bf16.mxu1 %v3202_v22 }
  0x18   :  { %251 = vmatprep.subr.bf16.mxu0 %v3177_v18 }
  0x1a   :  { %2983 = vmatpush3.bf16.msra.mxu1 %v3202_v22 }
  0x1b   :  { %252 = vmatpush1.bf16.msra.mxu0 %v3179_v20  ;;  %2984 = vmatprep.subr.bf16.mxu1 %v3207_v25 }
  0x1c   :  { %253 = vmatprep.subr.bf16.mxu0 %v3181_v21 }
  0x1e   :  { %2985 = vmatpush3.bf16.msra.mxu1 %v3207_v25 }
  0x1f   :  { %254 = vmatpush1.bf16.msra.mxu0 %v3183_v23  ;;  %2986 = vmatprep.subr.bf16.mxu1 %v3211_v28 }
  0x20   :  { %569 = vmatprep.subr.bf16.mxu0 %v3498_v24 }
  0x22   :  { %272 = vmatmul.mubr.bf16.vlgmr.msra.gmra.mxu0 %v3185_v12  ;;  %2987 = vmatpush3.bf16.msra.mxu1 %v3211_v28 }
  0x23   :  { %570 = vmatpush1.bf16.msra.mxu0 %v3506_v26  ;;  %281 = vmatprep.mubr.bf16.mxu0 %v3387_v1 }
  0x24   :  { %571 = vmatprep.subr.bf16.mxu0 %v3512_v27  ;;  %2996 = vmatprep.subr.bf16.mxu1 %v3388_v38 }
  0x25   :  { %2989 = vmatmul.mubr.bf16.vlgmr.msra.gmra.mxu1 %v3194_v31 }
  0x26   :  { %2997 = vmatpush3.bf16.msra.mxu1 %v3219_v36  ;;  %2992 = vmatprep.mubr.bf16.mxu1 %v3203_v35 }
  0x27   :  { %572 = vmatpush1.bf16.msra.mxu0 %v3521_v29  ;;  %2998 = vmatprep.subr.bf16.mxu1 %v3388_v38 }
  0x28   :  { %573 = vmatprep.subr.bf16.mxu0 %v3528_v30 }
  0x2a   :  { %282 = vmatmul.mubr.bf16.gmra.mxu0 %v3194_v31  ;;  %2999 = vmatpush3.bf16.msra.mxu1 %v3220_v39 }
  0x2b   :  { %574 = vmatpush1.bf16.msra.mxu0 %v3537_v32  ;;  %291 = vmatprep.mubr.bf16.mxu0 %v3387_v1 }
  0x2c   :  { %575 = vmatprep.subr.bf16.mxu0 %v3543_v33  ;;  %3000 = vmatprep.subr.bf16.mxu1 %v3388_v38 }
  0x2d   :  { %2993 = vmatmul.mubr.bf16.gmra.mxu1 %v3212_v43 }
  0x2e   :  { %3001 = vmatpush3.bf16.msra.mxu1 %v3221_v42  ;;  %3012 = vmatprep.mubr.msk.bf16.mxu1 %vm3389_vm0, %v3388_v38 }
  0x2f   :  { %576 = vmatpush1.bf16.msra.mxu0 %v3548_v34  ;;  %3002 = vmatprep.subr.bf16.mxu1 %v3388_v38 }
  0x30   :  { %577 = vmatprep.subr.bf16.mxu0 %v3559_v37 }
  0x32   :  { %292 = vmatmul.mubr.bf16.gmra.mxu0 %v3203_v35  ;;  %3003 = vmatpush3.bf16.msra.mxu1 %v3222_v46 }
  0x33   :  { %578 = vmatpush1.bf16.msra.mxu0 %v3571_v40  ;;  %301 = vmatprep.mubr.bf16.mxu0 %v3387_v1 }
  0x34   :  { %579 = vmatprep.subr.bf16.mxu0 %v3576_v41  ;;  %3004 = vmatprep.subr.bf16.mxu1 %v3388_v38 }
  0x36   :  { %3005 = vmatpush3.bf16.msra.mxu1 %v3223_v49 }
  0x37   :  { %580 = vmatpush1.bf16.msra.mxu0 %v3590_v44  ;;  %3006 = vmatprep.subr.bf16.mxu1 %v3388_v38 }
  0x38   :  { %581 = vmatprep.subr.bf16.mxu0 %v3595_v45 }
  0x3a   :  { %302 = vmatmul.mubr.bf16.gmra.mxu0 %v3212_v43  ;;  %3007 = vmatpush3.bf16.msra.mxu1 %v3224_v52 }
  0x3b   :  { %582 = vmatpush1.bf16.msra.mxu0 %v3607_v47  ;;  %601 = vmatprep.mubr.bf16.mxu0 %v3387_v1 }
  0x3c   :  { %583 = vmatprep.subr.bf16.mxu0 %v3614_v48  ;;  %3008 = vmatprep.subr.bf16.mxu1 %v3388_v38 }
  0x3e   :  { %3009 = vmatpush3.bf16.msra.mxu1 %v3225_v54 }
  0x3f   :  { %584 = vmatpush1.bf16.msra.mxu0 %v3625_v50  ;;  %3010 = vmatprep.subr.bf16.mxu1 %v3388_v38 }
  0x40   :  { %848 = vmatprep.subr.bf16.mxu0 %v3498_v24 }
  0x42   :  { %602 = vmatmul.mubr.bf16.vlgmr.msra.gmra.mxu0 %v408_v53  ;;  %3011 = vmatpush3.bf16.msra.mxu1 %v3226_v55 }
  0x43   :  { %849 = vmatpush1.bf16.msra.mxu0 %v3506_v26  ;;  %880 = vmatprep.mubr.bf16.mxu0 %v3387_v1 }
  0x44   :  { %850 = vmatprep.subr.bf16.mxu0 %v3512_v27  ;;  %3016 = vmatprep.subr.bf16.mxu1 %v3388_v38 }
  0x45   :  { %3013 = vmatmul.mubr.bf16.vlgmr.msra.gmra.mxu1 %v408_v53 }
  0x46   :  { %3032 = vmatprep.mubr.msk.bf16.mxu1 %vm3389_vm0, %v3388_v38  ;;  %3017 = vmatpush3.bf16.msra.mxu1 %v3227_v56 }
  0x47   :  { %851 = vmatpush1.bf16.msra.mxu0 %v3521_v29  ;;  %3018 = vmatprep.subr.bf16.mxu1 %v3388_v38 }
  0x48   :  { %852 = vmatprep.subr.bf16.mxu0 %v3528_v30 }
  0x4a   :  { %3019 = vmatpush3.bf16.msra.mxu1 %v3228_v57 }
  0x4b   :  { %853 = vmatpush1.bf16.msra.mxu0 %v3537_v32  ;;  %3020 = vmatprep.subr.bf16.mxu1 %v3388_v38 }
  0x4c   :  { %854 = vmatprep.subr.bf16.mxu0 %v3543_v33 }
  0x4e   :  { %3021 = vmatpush3.bf16.msra.mxu1 %v3229_v58 }
  0x4f   :  { %855 = vmatpush1.bf16.msra.mxu0 %v3548_v34  ;;  %3022 = vmatprep.subr.bf16.mxu1 %v3388_v38 }
  0x50   :  { %856 = vmatprep.subr.bf16.mxu0 %v3559_v37 }
  0x52   :  { %3023 = vmatpush3.bf16.msra.mxu1 %v3230_v59 }
  0x53   :  { %857 = vmatpush1.bf16.msra.mxu0 %v3571_v40  ;;  %3024 = vmatprep.subr.bf16.mxu1 %v3388_v38 }
  0x54   :  { %858 = vmatprep.subr.bf16.mxu0 %v3576_v41 }
  0x56   :  { %3025 = vmatpush3.bf16.msra.mxu1 %v3231_v60 }
  0x57   :  { %859 = vmatpush1.bf16.msra.mxu0 %v3590_v44  ;;  %3026 = vmatprep.subr.bf16.mxu1 %v3388_v38 }
  0x58   :  { %860 = vmatprep.subr.bf16.mxu0 %v3595_v45 }
  0x5a   :  { %3027 = vmatpush3.bf16.msra.mxu1 %v3232_v61 }
  0x5b   :  { %861 = vmatpush1.bf16.msra.mxu0 %v3607_v47  ;;  %3028 = vmatprep.subr.bf16.mxu1 %v3388_v38 }
  0x5c   :  { %862 = vmatprep.subr.bf16.mxu0 %v3614_v48 }
  0x5e   :  { %3029 = vmatpush3.bf16.msra.mxu1 %v3233_v62 }
  0x5f   :  { %863 = vmatpush1.bf16.msra.mxu0 %v3625_v50  ;;  %3030 = vmatprep.subr.bf16.mxu1 %v3388_v38 }
  0x60   :  { %1127 = vmatprep.subr.bf16.mxu0 %v3498_v24 }
  0x62   :  { %3031 = vmatpush3.bf16.msra.mxu1 %v3234_v63 }
  0x63   :  { %3036 = vmatprep.subr.bf16.mxu1 %v3388_v38 }
  0xe2   :  { %v273_v5 = vpop.f32.mrf.mxu0 }
  0xe4   :  { %v275_v7 = vpop.f32.mrf.mxu0 }
  0xe5   :  { %v2990_v19 = vpop.f32.mrf.mxu1 }
  0xe6   :  { %v277_v10 = vpop.f32.mrf.mxu0  ;;  %v3718_v21 = vadd.f32 %v2990_v19, %v3711_v15 }
  0xe7   :  { %v3707_v12 = vadd.f32 %v277_v10, %v75_v8  ;;  %v346_v23 = vpop.f32.mrf.mxu1 }
  0xe8   :  { %v279_v13 = vpop.f32.mrf.mxu0 }
  0xe9   :  { %v3709_v14 = vadd.f32 %v279_v13, %v79_v11  ;;  %v2991_v31 = vpop.f32.mrf.mxu1 }
  0xea   :  { %v283_v16 = vpop.f32.mrf.mxu0  ;;  %v3725_v36 = vadd.f32 %v2991_v31, %v3711_v15 }
  0xeb   :  { %v3713_v17 = vadd.f32 %v283_v16, %v75_v8  ;;  %v349_v42 = vpop.f32.mrf.mxu1  ;;  %v274_v16 = vadd.f32 %v273_v5, %v75_v8 }
  0xec   :  { %v285_v18 = vpop.f32.mrf.mxu0  ;;  %v3730_v46 = vadd.f32 %v349_v42, %v3711_v15  ;;  %v276_v42 = vadd.f32 %v275_v7, %v79_v11 }
  0xed   :  { %v3715_v20 = vadd.f32 %v285_v18, %v79_v11  ;;  %v2994_v52 = vpop.f32.mrf.mxu1 }
  0xee   :  { %v287_v22 = vpop.f32.mrf.mxu0  ;;  %v3735_v54 = vadd.f32 %v2994_v52, %v3711_v15 }
  0xef   :  { %v3720_v25 = vadd.f32 %v287_v22, %v75_v8  ;;  %v362_v56 = vpop.f32.mrf.mxu1 }
  0xf0   :  { %v289_v28 = vpop.f32.mrf.mxu0  ;;  %v3740_v58 = vadd.f32 %v362_v56, %v3711_v15 }
  0xf1   :  { %v3722_v35 = vadd.f32 %v289_v28, %v79_v11  ;;  %v2995_v60 = vpop.f32.mrf.mxu1 }
  0xf2   :  { %v293_v39 = vpop.f32.mrf.mxu0  ;;  %v3745_v62 = vadd.f32 %v2995_v60, %v3711_v15 }
  0xf3   :  { %v3727_v43 = vadd.f32 %v293_v39, %v75_v8  ;;  %v365_v0 = vpop.f32.mrf.mxu1 }
  0xf4   :  { %v295_v49 = vpop.f32.mrf.mxu0  ;;  %v3750_v3 = vadd.f32 %v365_v0, %v3711_v15 }
  0xf5   :  { %v3732_v53 = vadd.f32 %v295_v49, %v79_v11 }
  0xf6   :  { %v297_v55 = vpop.f32.mrf.mxu0 }
  0xf7   :  { %v3737_v57 = vadd.f32 %v297_v55, %v75_v8 }
  0xf8   :  { %v299_v59 = vpop.f32.mrf.mxu0 }
  0xf9   :  { %v3742_v61 = vadd.f32 %v299_v59, %v79_v11 }
  0xfa   :  { %v303_v63 = vpop.f32.mrf.mxu0 }
  0xfb   :  { %v3747_v2 = vadd.f32 %v303_v63, %v75_v8 }
  0xfc   :  { %v305_v4 = vpop.f32.mrf.mxu0 }
  0xfd   :  { %v3752_v6 = vadd.f32 %v305_v4, %v79_v11 }
  0xfe   :  { %v307_v9 = vpop.f32.mrf.mxu0 }
  0xff   :  { %v3754_v10 = vadd.f32 %v307_v9, %v75_v8  ;;  %v3761_v8 = vld [vmem:[%s4221_s4] ss:$0 sm:$0xff] }
 0x100   :  { %v309_v13 = vpop.f32.mrf.mxu0 }
 0x101   :  { %v3756_v18 = vadd.f32 %v309_v13, %v79_v11  ;;  %v347_v13 = vadd.f32 %v346_v23, %v3711_v15  ;;  %v3236_v15 = vld [vmem:[%s4218_s2 + $0x98] ss:$12 sps:$4 sm:$0xff]   ;;  %v3237_v23 = vld [vmem:[%s4218_s2 + $0x80] ss:$12 sps:$4 sm:$0xff]  }
 0x102   :  { %v603_v19 = vpop.f32.mrf.mxu0 }
 0x103   :  { %v650_v22 = vadd.f32 %v603_v19, %v274_v16 }
 0x104   :  { %v605_v28 = vpop.f32.mrf.mxu0 }
 0x105   :  { %v2696_v31 = vmul.f32 -1.442695, %v650_v22  ;;  %v657_v52 = vadd.f32 %v605_v28, %v276_v42  ;;  %v644_v55 = vpop.f32.mrf.mxu1 }
 0x106   :  { %v607_v39 = vpop.f32.mrf.mxu0  ;;  %v671_v7 = vadd.f32 %v3761_v8, %v644_v55  ;;  %v3239_v55 = vld [vmem:[%s4218_s2 + $0x50] ss:$12 sps:$4 sm:$0xff]  }
 0x107   :  { %3307 = vpow2.f32 %v2696_v31  ;;  %v2697_v56 = vmul.f32 -1.442695, %v657_v52  ;;  %v3014_v59 = vpop.f32.mrf.mxu1 }
 0x108   :  { %v608_v49 = vpop.f32.mrf.mxu0  ;;  %v3241_v59 = vld [vmem:[%s4218_s2 + $0x20] ss:$12 sps:$4 sm:$0xff]  }
 0x109   :  { %v647_v60 = vpop.f32.mrf.mxu1  ;;  %3309 = vpow2.f32 %v2697_v56  ;;  %v3240_v56 = vld [vmem:[%s4218_s2 + $0x38] ss:$12 sps:$4 sm:$0xff]  }
 0x10a   :  { %v3242_v60 = vld [vmem:[%s4218_s2 + $0x8] ss:$12 sps:$4 sm:$0xff]  }
 0x10b   :  { %v3015_v63 = vpop.f32.mrf.mxu1 }
 0x114   :  { %v3308_v0 = vpop.eup %3307 }
 0x115   :  { %v654_v4 = vadd.f32 1.0, %v3308_v0 }
 0x116   :  { %v3310_v5 = vpop.eup %3309 }
 0x117   :  { %3311 = vrcp.f32 %v654_v4  ;;  %v661_v9 = vadd.f32 1.0, %v3310_v5 }
 0x119   :  { %3313 = vrcp.f32 %v661_v9 }
 0x124   :  { %v3312_v11 = vpop.eup %3311 }
 0x125   :  { %v672_v16 = vmul.f32 %v3312_v11, %v671_v7 }
 0x126   :  { %v3314_v22 = vpop.eup %3313 }
 0x127   :  { %v673_v19 = vadd.f32 %v672_v16, %v347_v13  ;;  %v675_v28 = vsub.f32 1.0, %v3314_v22  ;;  %v677_v39 = vmul.f32 %v3314_v22, %v3630_v51  ;;  %v3235_v51 = vld [vmem:[%s4218_s2 + $0xb0] ss:$12 sps:$4 sm:$0xff]  }
 0x129   :  { %3315 = vtanh.f32 %v673_v19 }
 0x136   :  { %v3316_v31 = vpop.eup %3315 }
 0x137   :  { %v676_v42 = vmul.f32 %v3316_v31, %v675_v28 }
 0x139   :  { %v3766_v49 = vadd.f32 %v677_v39, %v676_v42 }
 0x13b   :  { %v687_v52 = vpack.c.bf16 %v3766_v49, %v3766_v49 }
 0x13d   :  { %881 = vmatmul.mubr.bf16.vlgmr.msra.gmra.mxu0 %v687_v52  ;;  %3033 = vmatmul.mubr.bf16.vlgmr.msra.gmra.mxu1 %v687_v52 }
 0x13e   :  { %1128 = vmatpush1.bf16.msra.mxu0 %v3506_v26  ;;  %1159 = vmatprep.mubr.bf16.mxu0 %v3387_v1 }
 0x13f   :  { %1129 = vmatprep.subr.bf16.mxu0 %v3512_v27  ;;  %3052 = vmatprep.mubr.msk.bf16.mxu1 %vm3389_vm0, %v3388_v38 }
 0x140   :  { %3037 = vmatpush3.bf16.msra.mxu1 %v3235_v51 }
 0x141   :  { %3038 = vmatprep.subr.bf16.mxu1 %v3388_v38 }
 0x142   :  { %1130 = vmatpush1.bf16.msra.mxu0 %v3521_v29 }
 0x143   :  { %1131 = vmatprep.subr.bf16.mxu0 %v3528_v30 }
 0x144   :  { %3039 = vmatpush3.bf16.msra.mxu1 %v3236_v15 }
 0x145   :  { %3040 = vmatprep.subr.bf16.mxu1 %v3388_v38 }
 0x146   :  { %1132 = vmatpush1.bf16.msra.mxu0 %v3537_v32 }
 0x147   :  { %1133 = vmatprep.subr.bf16.mxu0 %v3543_v33 }
 0x148   :  { %3041 = vmatpush3.bf16.msra.mxu1 %v3237_v23 }
 0x149   :  { %3042 = vmatprep.subr.bf16.mxu1 %v3388_v38 }
 0x14a   :  { %1134 = vmatpush1.bf16.msra.mxu0 %v3548_v34 }
 0x14b   :  { %1135 = vmatprep.subr.bf16.mxu0 %v3559_v37 }
 0x14e   :  { %1136 = vmatpush1.bf16.msra.mxu0 %v3571_v40 }
 0x14f   :  { %1137 = vmatprep.subr.bf16.mxu0 %v3576_v41 }
 0x152   :  { %1138 = vmatpush1.bf16.msra.mxu0 %v3590_v44 }
 0x153   :  { %1139 = vmatprep.subr.bf16.mxu0 %v3595_v45 }
 0x156   :  { %1140 = vmatpush1.bf16.msra.mxu0 %v3607_v47 }
 0x157   :  { %1141 = vmatprep.subr.bf16.mxu0 %v3614_v48 }
 0x15a   :  { %1142 = vmatpush1.bf16.msra.mxu0 %v3625_v50 }
 0x15b   :  { %1406 = vmatprep.subr.bf16.mxu0 %v3498_v24  ;;  %v3238_v24 = vld [vmem:[%s4218_s2 + $0x68] ss:$12 sps:$4 sm:$0xff]  }
 0x15c   :  { %3043 = vmatpush3.bf16.msra.mxu1 %v3238_v24 }
 0x15d   :  { %3044 = vmatprep.subr.bf16.mxu1 %v3388_v38 }
 0x160   :  { %3045 = vmatpush3.bf16.msra.mxu1 %v3239_v55 }
 0x161   :  { %3046 = vmatprep.subr.bf16.mxu1 %v3388_v38 }
 0x164   :  { %3047 = vmatpush3.bf16.msra.mxu1 %v3240_v56 }
 0x165   :  { %3048 = vmatprep.subr.bf16.mxu1 %v3388_v38 }
 0x168   :  { %3049 = vmatpush3.bf16.msra.mxu1 %v3241_v59 }
 0x169   :  { %3050 = vmatprep.subr.bf16.mxu1 %v3388_v38 }
 0x16c   :  { %3051 = vmatpush3.bf16.msra.mxu1 %v3242_v60 }
 0x16d   :  { %3056 = vmatprep.subr.bf16.mxu1 %v3388_v38 }
 0x1fd   :  { %v882_v63 = vpop.f32.mrf.mxu0  ;;  %v923_v0 = vpop.f32.mrf.mxu1 }
 0x1fe   :  { %v929_v4 = vadd.f32 %v882_v63, %v3707_v12  ;;  %v950_v51 = vadd.f32 %v3761_v8, %v923_v0 }
 0x1ff   :  { %v884_v5 = vpop.f32.mrf.mxu0  ;;  %v3034_v9 = vpop.f32.mrf.mxu1 }
 0x200   :  { %v2723_v7 = vmul.f32 -1.442695, %v929_v4  ;;  %v936_v22 = vadd.f32 %v884_v5, %v3709_v14 }
 0x201   :  { %v886_v11 = vpop.f32.mrf.mxu0  ;;  %v926_v13 = vpop.f32.mrf.mxu1 }
 0x202   :  { %3317 = vpow2.f32 %v2723_v7  ;;  %v2724_v28 = vmul.f32 -1.442695, %v936_v22 }
 0x203   :  { %v887_v16 = vpop.f32.mrf.mxu0  ;;  %v3035_v19 = vpop.f32.mrf.mxu1 }
 0x204   :  { %3319 = vpow2.f32 %v2724_v28 }
 0x20f   :  { %v3318_v31 = vpop.eup %3317 }
 0x210   :  { %v933_v39 = vadd.f32 1.0, %v3318_v31 }
 0x211   :  { %v3320_v42 = vpop.eup %3319 }
 0x212   :  { %3321 = vrcp.f32 %v933_v39  ;;  %v940_v52 = vadd.f32 1.0, %v3320_v42 }
 0x214   :  { %3323 = vrcp.f32 %v940_v52 }
 0x21f   :  { %v3322_v12 = vpop.eup %3321 }
 0x220   :  { %v951_v15 = vmul.f32 %v3322_v12, %v950_v51  ;;  %v3900_v12 = vld [vmem:[%s4218_s2 + $0xa8] ss:$12 sps:$4 sm:$0xff]  }
 0x221   :  { %v3324_v24 = vpop.eup %3323 }
 0x222   :  { %v952_v23 = vadd.f32 %v951_v15, %v3730_v46  ;;  %v954_v55 = vsub.f32 1.0, %v3324_v24  ;;  %v956_v14 = vmul.f32 %v3324_v24, %v3766_v49  ;;  %v3254_v15 = vld [vmem:[%s4218_s2 + $0xb0] ss:$12 sps:$4 sm:$0xff]  }
 0x223   :  { %v3916_v24 = vld [vmem:[%s4218_s2 + $0x90] ss:$12 sps:$4 sm:$0xff]  }
 0x224   :  { %3325 = vtanh.f32 %v952_v23  ;;  %v3910_v23 = vld [vmem:[%s4218_s2 + $0x94] ss:$12 sps:$4 sm:$0xff]  }
 0x231   :  { %v3326_v56 = vpop.eup %3325 }
 0x232   :  { %v955_v59 = vmul.f32 %v3326_v56, %v954_v55  ;;  %v3258_v55 = vld [vmem:[%s4218_s2 + $0x98] ss:$12 sps:$4 sm:$0xff]   ;;  %v3926_v56 = vld [vmem:[%s4218_s2 + $0x7c] ss:$12 sps:$4 sm:$0xff]  }
 0x234   :  { %v3826_v60 = vadd.f32 %v956_v14, %v955_v59  ;;  %v3932_v59 = vld [vmem:[%s4218_s2 + $0x78] ss:$12 sps:$4 sm:$0xff]   ;;  %v3262_v14 = vld [vmem:[%s4218_s2 + $0x80] ss:$12 sps:$4 sm:$0xff]  }
 0x236   :  { %v966_v63 = vpack.c.bf16 %v3826_v60, %v3826_v60 }
 0x238   :  { %1160 = vmatmul.mubr.bf16.vlgmr.msra.gmra.mxu0 %v966_v63  ;;  %3053 = vmatmul.mubr.bf16.vlgmr.msra.gmra.mxu1 %v966_v63  ;;  %v3948_v63 = vld [vmem:[%s4218_s2 + $0x60] ss:$12 sps:$4 sm:$0xff]  }
 0x239   :  { %1407 = vmatpush1.bf16.msra.mxu0 %v3506_v26  ;;  %1438 = vmatprep.mubr.bf16.mxu0 %v3387_v1  ;;  %v3243_v26 = vld [vmem:[%s4218_s2 + $0xb0] ss:$12 sps:$4 sm:$0xff]  }
 0x23a   :  { %1408 = vmatprep.subr.bf16.mxu0 %v3512_v27  ;;  %3072 = vmatprep.mubr.msk.bf16.mxu1 %vm3389_vm0, %v3388_v38  ;;  %v3244_v27 = vld [vmem:[%s4218_s2 + $0x98] ss:$12 sps:$4 sm:$0xff]  }
 0x23b   :  { %3057 = vmatpush3.bf16.msra.mxu1 %v3243_v26  ;;  %v3266_v26 = vld [vmem:[%s4218_s2 + $0x68] ss:$12 sps:$4 sm:$0xff]  }
 0x23c   :  { %3058 = vmatprep.subr.bf16.mxu1 %v3388_v38 }
 0x23d   :  { %1409 = vmatpush1.bf16.msra.mxu0 %v3521_v29  ;;  %v3245_v29 = vld [vmem:[%s4218_s2 + $0x80] ss:$12 sps:$4 sm:$0xff]  }
 0x23e   :  { %1410 = vmatprep.subr.bf16.mxu0 %v3528_v30  ;;  %v3246_v30 = vld [vmem:[%s4218_s2 + $0x68] ss:$12 sps:$4 sm:$0xff]  }
 0x23f   :  { %3059 = vmatpush3.bf16.msra.mxu1 %v3244_v27  ;;  %v3958_v27 = vld [vmem:[%s4218_s2 + $0x4c] ss:$12 sps:$4 sm:$0xff]  }
 0x240   :  { %3060 = vmatprep.subr.bf16.mxu1 %v3388_v38 }
 0x241   :  { %1411 = vmatpush1.bf16.msra.mxu0 %v3537_v32  ;;  %v3247_v32 = vld [vmem:[%s4218_s2 + $0x50] ss:$12 sps:$4 sm:$0xff]  }
 0x242   :  { %1412 = vmatprep.subr.bf16.mxu0 %v3543_v33  ;;  %v3248_v33 = vld [vmem:[%s4218_s2 + $0x38] ss:$12 sps:$4 sm:$0xff]  }
 0x243   :  { %3061 = vmatpush3.bf16.msra.mxu1 %v3245_v29  ;;  %v3964_v29 = vld [vmem:[%s4218_s2 + $0x48] ss:$12 sps:$4 sm:$0xff]  }
 0x244   :  { %3062 = vmatprep.subr.bf16.mxu1 %v3388_v38 }
 0x245   :  { %1413 = vmatpush1.bf16.msra.mxu0 %v3548_v34  ;;  %v3249_v34 = vld [vmem:[%s4218_s2 + $0x20] ss:$12 sps:$4 sm:$0xff]  }
 0x246   :  { %1414 = vmatprep.subr.bf16.mxu0 %v3559_v37  ;;  %v3250_v37 = vld [vmem:[%s4218_s2 + $0x8] ss:$12 sps:$4 sm:$0xff]  }
 0x247   :  { %3063 = vmatpush3.bf16.msra.mxu1 %v3246_v30  ;;  %v3270_v30 = vld [vmem:[%s4218_s2 + $0x50] ss:$12 sps:$4 sm:$0xff]  }
 0x248   :  { %3064 = vmatprep.subr.bf16.mxu1 %v3388_v38 }
 0x249   :  { %1415 = vmatpush1.bf16.msra.mxu0 %v3571_v40 }
 0x24a   :  { %1416 = vmatprep.subr.bf16.mxu0 %v3576_v41 }
 0x24b   :  { %3065 = vmatpush3.bf16.msra.mxu1 %v3247_v32  ;;  %v3974_v32 = vld [vmem:[%s4218_s2 + $0x34] ss:$12 sps:$4 sm:$0xff]  }
 0x24c   :  { %3066 = vmatprep.subr.bf16.mxu1 %v3388_v38 }
 0x24d   :  { %1417 = vmatpush1.bf16.msra.mxu0 %v3590_v44 }
 0x24e   :  { %1418 = vmatprep.subr.bf16.mxu0 %v3595_v45 }
 0x24f   :  { %3067 = vmatpush3.bf16.msra.mxu1 %v3248_v33  ;;  %v3980_v33 = vld [vmem:[%s4218_s2 + $0x30] ss:$12 sps:$4 sm:$0xff]  }
 0x250   :  { %3068 = vmatprep.subr.bf16.mxu1 %v3388_v38 }
 0x251   :  { %1419 = vmatpush1.bf16.msra.mxu0 %v3607_v47 }
 0x252   :  { %1420 = vmatprep.subr.bf16.mxu0 %v3614_v48 }
 0x253   :  { %3069 = vmatpush3.bf16.msra.mxu1 %v3249_v34  ;;  %v3274_v34 = vld [vmem:[%s4218_s2 + $0x38] ss:$12 sps:$4 sm:$0xff]  }
 0x254   :  { %3070 = vmatprep.subr.bf16.mxu1 %v3388_v38 }
 0x255   :  { %1421 = vmatpush1.bf16.msra.mxu0 %v3625_v50 }
 0x257   :  { %3071 = vmatpush3.bf16.msra.mxu1 %v3250_v37  ;;  %v3990_v37 = vld [vmem:[%s4218_s2 + $0x1c] ss:$12 sps:$4 sm:$0xff]  }
 0x258   :  { %3076 = vmatprep.subr.bf16.mxu1 %v3388_v38 }
 0x2f8   :  { %v1161_v40 = vpop.f32.mrf.mxu0  ;;  %v1202_v41 = vpop.f32.mrf.mxu1 }
 0x2f9   :  { %v1208_v44 = vadd.f32 %v1161_v40, %v3713_v17  ;;  %v1229_v16 = vadd.f32 %v3761_v8, %v1202_v41  ;;  %v3996_v40 = vld [vmem:[%s4218_s2 + $0x18] ss:$12 sps:$4 sm:$0xff]   ;;  %v3278_v41 = vld [vmem:[%s4218_s2 + $0x20] ss:$12 sps:$4 sm:$0xff]  }
 0x2fa   :  { %v1163_v45 = vpop.f32.mrf.mxu0  ;;  %v3054_v47 = vpop.f32.mrf.mxu1 }
 0x2fb   :  { %v2750_v48 = vmul.f32 -1.442695, %v1208_v44  ;;  %v1215_v4 = vadd.f32 %v1163_v45, %v3715_v20  ;;  %v4006_v44 = vld [vmem:[%s4218_s2 + $0x4] ss:$12 sps:$4 sm:$0xff]   ;;  %v4012_v45 = vld [vmem:[%s4218_s2] ss:$12 sps:$4 sm:$0xff]  }
 0x2fc   :  { %v1165_v50 = vpop.f32.mrf.mxu0  ;;  %v1205_v46 = vpop.f32.mrf.mxu1  ;;  %v3282_v47 = vld [vmem:[%s4218_s2 + $0x8] ss:$12 sps:$4 sm:$0xff]  }
 0x2fd   :  { %3327 = vpow2.f32 %v2750_v48  ;;  %v2751_v5 = vmul.f32 -1.442695, %v1215_v4 }
 0x2fe   :  { %v1166_v49 = vpop.f32.mrf.mxu0  ;;  %v3055_v0 = vpop.f32.mrf.mxu1 }
 0x2ff   :  { %3329 = vpow2.f32 %v2751_v5 }
 0x30a   :  { %v3328_v9 = vpop.eup %3327 }
 0x30b   :  { %v1212_v7 = vadd.f32 1.0, %v3328_v9 }
 0x30c   :  { %v3330_v11 = vpop.eup %3329 }
 0x30d   :  { %3331 = vrcp.f32 %v1212_v7  ;;  %v1219_v13 = vadd.f32 1.0, %v3330_v11 }
 0x30f   :  { %3333 = vrcp.f32 %v1219_v13 }
 0x31a   :  { %v3332_v17 = vpop.eup %3331 }
 0x31b   :  { %v1230_v19 = vmul.f32 %v3332_v17, %v1229_v16 }
 0x31c   :  { %v3334_v28 = vpop.eup %3333 }
 0x31d   :  { %v1231_v22 = vadd.f32 %v1230_v19, %v3718_v21  ;;  %v1233_v31 = vsub.f32 1.0, %v3334_v28  ;;  %v1235_v20 = vmul.f32 %v3334_v28, %v3826_v60  ;;  %v3895_v21 = vld [vmem:[%s4218_s2 + $0xac] ss:$12 sps:$4 sm:$0xff]   ;;  %v3942_v60 = vld [vmem:[%s4218_s2 + $0x64] ss:$12 sps:$4 sm:$0xff]  }
 0x31e   :  { %1685 = vmatprep.subr.bf16.mxu0 %v3895_v21 }
 0x31f   :  { %3335 = vtanh.f32 %v1231_v22 }
 0x32c   :  { %v3336_v39 = vpop.eup %3335 }
 0x32d   :  { %v1234_v42 = vmul.f32 %v3336_v39, %v1233_v31 }
 0x32f   :  { %v3885_v52 = vadd.f32 %v1235_v20, %v1234_v42 }
 0x331   :  { %v1245_v51 = vpack.c.bf16 %v3885_v52, %v3885_v52 }
 0x333   :  { %1439 = vmatmul.mubr.bf16.vlgmr.msra.gmra.mxu0 %v1245_v51  ;;  %3073 = vmatmul.mubr.bf16.vlgmr.msra.gmra.mxu1 %v1245_v51 }
 0x334   :  { %1717 = vmatprep.mubr.bf16.mxu0 %v3387_v1  ;;  %3092 = vmatprep.mubr.msk.bf16.mxu1 %vm3389_vm0, %v3388_v38 }
 0x335   :  { %1686 = vmatpush1.bf16.msra.mxu0 %v3900_v12  ;;  %3077 = vmatpush3.bf16.msra.mxu1 %v3254_v15 }
 0x336   :  { %3078 = vmatprep.subr.bf16.mxu1 %v3388_v38  ;;  %1687 = vmatprep.subr.bf16.mxu0 %v3910_v23 }
 0x339   :  { %1688 = vmatpush1.bf16.msra.mxu0 %v3916_v24  ;;  %3079 = vmatpush3.bf16.msra.mxu1 %v3258_v55 }
 0x33a   :  { %3080 = vmatprep.subr.bf16.mxu1 %v3388_v38  ;;  %1689 = vmatprep.subr.bf16.mxu0 %v3926_v56 }
 0x33d   :  { %1690 = vmatpush1.bf16.msra.mxu0 %v3932_v59  ;;  %3081 = vmatpush3.bf16.msra.mxu1 %v3262_v14 }
 0x33e   :  { %3082 = vmatprep.subr.bf16.mxu1 %v3388_v38  ;;  %1691 = vmatprep.subr.bf16.mxu0 %v3942_v60 }
 0x341   :  { %1692 = vmatpush1.bf16.msra.mxu0 %v3948_v63  ;;  %3083 = vmatpush3.bf16.msra.mxu1 %v3266_v26 }
 0x342   :  { %3084 = vmatprep.subr.bf16.mxu1 %v3388_v38  ;;  %1693 = vmatprep.subr.bf16.mxu0 %v3958_v27 }
 0x345   :  { %1694 = vmatpush1.bf16.msra.mxu0 %v3964_v29  ;;  %3085 = vmatpush3.bf16.msra.mxu1 %v3270_v30  ;;  %v3285_v30 = vld [vmem:[%s4218_s2 + $0x80] ss:$12 sps:$4 sm:$0xff]  }
 0x346   :  { %3086 = vmatprep.subr.bf16.mxu1 %v3388_v38  ;;  %1695 = vmatprep.subr.bf16.mxu0 %v3974_v32 }
 0x349   :  { %1696 = vmatpush1.bf16.msra.mxu0 %v3980_v33  ;;  %3087 = vmatpush3.bf16.msra.mxu1 %v3274_v34  ;;  %v3286_v34 = vld [vmem:[%s4218_s2 + $0x68] ss:$12 sps:$4 sm:$0xff]  }
 0x34a   :  { %3088 = vmatprep.subr.bf16.mxu1 %v3388_v38  ;;  %1697 = vmatprep.subr.bf16.mxu0 %v3990_v37 }
 0x34d   :  { %1698 = vmatpush1.bf16.msra.mxu0 %v3996_v40  ;;  %3089 = vmatpush3.bf16.msra.mxu1 %v3278_v41  ;;  %v3287_v41 = vld [vmem:[%s4218_s2 + $0x50] ss:$12 sps:$4 sm:$0xff]  }
 0x34e   :  { %3090 = vmatprep.subr.bf16.mxu1 %v3388_v38  ;;  %1699 = vmatprep.subr.bf16.mxu0 %v4006_v44 }
 0x351   :  { %1700 = vmatpush1.bf16.msra.mxu0 %v4012_v45  ;;  %3091 = vmatpush3.bf16.msra.mxu1 %v3282_v47  ;;  %v3288_v47 = vld [vmem:[%s4218_s2 + $0x38] ss:$12 sps:$4 sm:$0xff]  }
 0x352   :  { %1964 = vmatprep.subr.bf16.mxu0 %v3895_v21  ;;  %3096 = vmatprep.subr.bf16.mxu1 %v3388_v38 }
 0x3f3   :  { %v1440_v48 = vpop.f32.mrf.mxu0  ;;  %v1481_v50 = vpop.f32.mrf.mxu1 }
 0x3f4   :  { %v1487_v46 = vadd.f32 %v1440_v48, %v3720_v25  ;;  %v1508_v31 = vadd.f32 %v3761_v8, %v1481_v50  ;;  %v3289_v48 = vld [vmem:[%s4218_s2 + $0x20] ss:$12 sps:$4 sm:$0xff]   ;;  %v3290_v50 = vld [vmem:[%s4218_s2 + $0x8] ss:$12 sps:$4 sm:$0xff]  }
 0x3f5   :  { %v1442_v49 = vpop.f32.mrf.mxu0  ;;  %v3074_v0 = vpop.f32.mrf.mxu1 }
 0x3f6   :  { %v2777_v4 = vmul.f32 -1.442695, %v1487_v46  ;;  %v1494_v13 = vadd.f32 %v1442_v49, %v3722_v35 }
 0x3f7   :  { %v1444_v5 = vpop.f32.mrf.mxu0  ;;  %v1484_v9 = vpop.f32.mrf.mxu1 }
 0x3f8   :  { %3337 = vpow2.f32 %v2777_v4  ;;  %v2778_v16 = vmul.f32 -1.442695, %v1494_v13 }
 0x3f9   :  { %v1445_v7 = vpop.f32.mrf.mxu0  ;;  %v3075_v11 = vpop.f32.mrf.mxu1 }
 0x3fa   :  { %3339 = vpow2.f32 %v2778_v16 }
 0x405   :  { %v3338_v17 = vpop.eup %3337 }
 0x406   :  { %v1491_v19 = vadd.f32 1.0, %v3338_v17 }
 0x407   :  { %v3340_v22 = vpop.eup %3339 }
 0x408   :  { %3341 = vrcp.f32 %v1491_v19  ;;  %v1498_v28 = vadd.f32 1.0, %v3340_v22 }
 0x40a   :  { %3343 = vrcp.f32 %v1498_v28 }
 0x415   :  { %v3342_v25 = vpop.eup %3341 }
 0x416   :  { %v1509_v39 = vmul.f32 %v3342_v25, %v1508_v31 }
 0x417   :  { %v3344_v20 = vpop.eup %3343 }
 0x418   :  { %v1510_v42 = vadd.f32 %v1509_v39, %v3725_v36  ;;  %v1512_v51 = vsub.f32 1.0, %v3344_v20  ;;  %v1514_v35 = vmul.f32 %v3344_v20, %v3885_v52  ;;  %v3283_v36 = vld [vmem:[%s4218_s2 + $0xb0] ss:$12 sps:$4 sm:$0xff]   ;;  %v3284_v52 = vld [vmem:[%s4218_s2 + $0x98] ss:$12 sps:$4 sm:$0xff]  }
 0x41a   :  { %3345 = vtanh.f32 %v1510_v42 }
 0x427   :  { %v3346_v15 = vpop.eup %3345 }
 0x428   :  { %v1513_v55 = vmul.f32 %v3346_v15, %v1512_v51 }
 0x42a   :  { %v4026_v14 = vadd.f32 %v1514_v35, %v1513_v55 }
 0x42c   :  { %v1524_v26 = vpack.c.bf16 %v4026_v14, %v4026_v14 }
 0x42e   :  { %1718 = vmatmul.mubr.bf16.vlgmr.msra.gmra.mxu0 %v1524_v26  ;;  %3093 = vmatmul.mubr.bf16.vlgmr.msra.gmra.mxu1 %v1524_v26 }
 0x42f   :  { %1965 = vmatpush1.bf16.msra.mxu0 %v3900_v12  ;;  %1996 = vmatprep.mubr.bf16.mxu0 %v3387_v1 }
 0x430   :  { %1966 = vmatprep.subr.bf16.mxu0 %v3910_v23  ;;  %3112 = vmatprep.mubr.msk.bf16.mxu1 %vm3389_vm0, %v3388_v38 }
 0x431   :  { %3097 = vmatpush3.bf16.msra.mxu1 %v3283_v36 }
 0x432   :  { %3098 = vmatprep.subr.bf16.mxu1 %v3388_v38 }
 0x433   :  { %1967 = vmatpush1.bf16.msra.mxu0 %v3916_v24 }
 0x434   :  { %1968 = vmatprep.subr.bf16.mxu0 %v3926_v56 }
 0x435   :  { %3099 = vmatpush3.bf16.msra.mxu1 %v3284_v52  ;;  %v3295_v52 = vld [vmem:[%s4218_s2 + $0x50] ss:$12 sps:$4 sm:$0xff]  }
 0x436   :  { %3100 = vmatprep.subr.bf16.mxu1 %v3388_v38 }
 0x437   :  { %1969 = vmatpush1.bf16.msra.mxu0 %v3932_v59 }
 0x438   :  { %1970 = vmatprep.subr.bf16.mxu0 %v3942_v60 }
 0x439   :  { %3101 = vmatpush3.bf16.msra.mxu1 %v3285_v30  ;;  %v3296_v30 = vld [vmem:[%s4218_s2 + $0x38] ss:$12 sps:$4 sm:$0xff]  }
 0x43a   :  { %3102 = vmatprep.subr.bf16.mxu1 %v3388_v38 }
 0x43b   :  { %1971 = vmatpush1.bf16.msra.mxu0 %v3948_v63 }
 0x43c   :  { %1972 = vmatprep.subr.bf16.mxu0 %v3958_v27 }
 0x43d   :  { %3103 = vmatpush3.bf16.msra.mxu1 %v3286_v34  ;;  %v3297_v34 = vld [vmem:[%s4218_s2 + $0x20] ss:$12 sps:$4 sm:$0xff]  }
 0x43e   :  { %3104 = vmatprep.subr.bf16.mxu1 %v3388_v38 }
 0x43f   :  { %1973 = vmatpush1.bf16.msra.mxu0 %v3964_v29 }
 0x440   :  { %1974 = vmatprep.subr.bf16.mxu0 %v3974_v32 }
 0x441   :  { %3105 = vmatpush3.bf16.msra.mxu1 %v3287_v41  ;;  %v3298_v41 = vld [vmem:[%s4218_s2 + $0x8] ss:$12 sps:$4 sm:$0xff]  }
 0x442   :  { %3106 = vmatprep.subr.bf16.mxu1 %v3388_v38 }
 0x443   :  { %1975 = vmatpush1.bf16.msra.mxu0 %v3980_v33 }
 0x444   :  { %1976 = vmatprep.subr.bf16.mxu0 %v3990_v37 }
 0x445   :  { %3107 = vmatpush3.bf16.msra.mxu1 %v3288_v47 }
 0x446   :  { %3108 = vmatprep.subr.bf16.mxu1 %v3388_v38 }
 0x447   :  { %1977 = vmatpush1.bf16.msra.mxu0 %v3996_v40 }
 0x448   :  { %1978 = vmatprep.subr.bf16.mxu0 %v4006_v44 }
 0x449   :  { %3109 = vmatpush3.bf16.msra.mxu1 %v3289_v48 }
 0x44a   :  { %3110 = vmatprep.subr.bf16.mxu1 %v3388_v38 }
 0x44b   :  { %1979 = vmatpush1.bf16.msra.mxu0 %v4012_v45 }
 0x44c   :  { %2243 = vmatprep.subr.bf16.mxu0 %v3895_v21 }
 0x44d   :  { %3111 = vmatpush3.bf16.msra.mxu1 %v3290_v50 }
 0x44e   :  { %3116 = vmatprep.subr.bf16.mxu1 %v3388_v38 }
 0x4ee   :  { %v1719_v46 = vpop.f32.mrf.mxu0  ;;  %v1760_v49 = vpop.f32.mrf.mxu1 }
 0x4ef   :  { %v1766_v0 = vadd.f32 %v1719_v46, %v3727_v43  ;;  %v1787_v39 = vadd.f32 %v3761_v8, %v1760_v49  ;;  %v3292_v8 = vld [vmem:[%s4218_s2 + $0x98] ss:$12 sps:$4 sm:$0xff]  }
 0x4f0   :  { %v1721_v4 = vpop.f32.mrf.mxu0  ;;  %v3094_v5 = vpop.f32.mrf.mxu1 }
 0x4f1   :  { %v2804_v9 = vmul.f32 -1.442695, %v1766_v0  ;;  %v1773_v17 = vadd.f32 %v1721_v4, %v3732_v53 }
 0x4f2   :  { %v1723_v7 = vpop.f32.mrf.mxu0  ;;  %v1763_v11 = vpop.f32.mrf.mxu1 }
 0x4f3   :  { %3347 = vpow2.f32 %v2804_v9  ;;  %v2805_v19 = vmul.f32 -1.442695, %v1773_v17 }
 0x4f4   :  { %v1724_v13 = vpop.f32.mrf.mxu0  ;;  %v3095_v16 = vpop.f32.mrf.mxu1 }
 0x4f5   :  { %3349 = vpow2.f32 %v2805_v19 }
 0x500   :  { %v3348_v22 = vpop.eup %3347 }
 0x501   :  { %v1770_v28 = vadd.f32 1.0, %v3348_v22 }
 0x502   :  { %v3350_v31 = vpop.eup %3349 }
 0x503   :  { %3351 = vrcp.f32 %v1770_v28  ;;  %v1777_v25 = vadd.f32 1.0, %v3350_v31 }
 0x505   :  { %3353 = vrcp.f32 %v1777_v25 }
 0x510   :  { %v3352_v43 = vpop.eup %3351 }
 0x511   :  { %v1788_v42 = vmul.f32 %v3352_v43, %v1787_v39 }
 0x512   :  { %v3354_v51 = vpop.eup %3353 }
 0x513   :  { %v1789_v20 = vadd.f32 %v1788_v42, %v3740_v58  ;;  %v1791_v15 = vsub.f32 1.0, %v3354_v51  ;;  %v1793_v53 = vmul.f32 %v3354_v51, %v4026_v14  ;;  %v3291_v58 = vld [vmem:[%s4218_s2 + $0xb0] ss:$12 sps:$4 sm:$0xff]   ;;  %v3293_v14 = vld [vmem:[%s4218_s2 + $0x80] ss:$12 sps:$4 sm:$0xff]  }
 0x515   :  { %3355 = vtanh.f32 %v1789_v20 }
 0x522   :  { %v3356_v55 = vpop.eup %3355 }
 0x523   :  { %v1792_v35 = vmul.f32 %v3356_v55, %v1791_v15 }
 0x525   :  { %v4086_v26 = vadd.f32 %v1793_v53, %v1792_v35 }
 0x527   :  { %v1803_v36 = vpack.c.bf16 %v4086_v26, %v4086_v26 }
 0x529   :  { %1997 = vmatmul.mubr.bf16.vlgmr.msra.gmra.mxu0 %v1803_v36  ;;  %3113 = vmatmul.mubr.bf16.vlgmr.msra.gmra.mxu1 %v1803_v36 }
 0x52a   :  { %2244 = vmatpush1.bf16.msra.mxu0 %v3900_v12  ;;  %2275 = vmatprep.mubr.bf16.mxu0 %v3387_v1 }
 0x52b   :  { %2245 = vmatprep.subr.bf16.mxu0 %v3910_v23  ;;  %3132 = vmatprep.mubr.msk.bf16.mxu1 %vm3389_vm0, %v3388_v38 }
 0x52c   :  { %3117 = vmatpush3.bf16.msra.mxu1 %v3291_v58 }
 0x52d   :  { %3118 = vmatprep.subr.bf16.mxu1 %v3388_v38 }
 0x52e   :  { %2246 = vmatpush1.bf16.msra.mxu0 %v3916_v24 }
 0x52f   :  { %2247 = vmatprep.subr.bf16.mxu0 %v3926_v56 }
 0x530   :  { %3119 = vmatpush3.bf16.msra.mxu1 %v3292_v8 }
 0x531   :  { %3120 = vmatprep.subr.bf16.mxu1 %v3388_v38 }
 0x532   :  { %2248 = vmatpush1.bf16.msra.mxu0 %v3932_v59 }
 0x533   :  { %2249 = vmatprep.subr.bf16.mxu0 %v3942_v60 }
 0x534   :  { %3121 = vmatpush3.bf16.msra.mxu1 %v3293_v14 }
 0x535   :  { %3122 = vmatprep.subr.bf16.mxu1 %v3388_v38 }
 0x536   :  { %2250 = vmatpush1.bf16.msra.mxu0 %v3948_v63 }
 0x537   :  { %2251 = vmatprep.subr.bf16.mxu0 %v3958_v27 }
 0x53a   :  { %2252 = vmatpush1.bf16.msra.mxu0 %v3964_v29 }
 0x53b   :  { %2253 = vmatprep.subr.bf16.mxu0 %v3974_v32 }
 0x53e   :  { %2254 = vmatpush1.bf16.msra.mxu0 %v3980_v33 }
 0x53f   :  { %2255 = vmatprep.subr.bf16.mxu0 %v3990_v37 }
 0x542   :  { %2256 = vmatpush1.bf16.msra.mxu0 %v3996_v40 }
 0x543   :  { %2257 = vmatprep.subr.bf16.mxu0 %v4006_v44 }
 0x546   :  { %2258 = vmatpush1.bf16.msra.mxu0 %v4012_v45 }
 0x547   :  { %2522 = vmatprep.subr.bf16.mxu0 %v3895_v21  ;;  %v3294_v21 = vld [vmem:[%s4218_s2 + $0x68] ss:$12 sps:$4 sm:$0xff]  }
 0x548   :  { %3123 = vmatpush3.bf16.msra.mxu1 %v3294_v21 }
 0x549   :  { %3124 = vmatprep.subr.bf16.mxu1 %v3388_v38 }
 0x54c   :  { %3125 = vmatpush3.bf16.msra.mxu1 %v3295_v52 }
 0x54d   :  { %3126 = vmatprep.subr.bf16.mxu1 %v3388_v38 }
 0x550   :  { %3127 = vmatpush3.bf16.msra.mxu1 %v3296_v30 }
 0x551   :  { %3128 = vmatprep.subr.bf16.mxu1 %v3388_v38 }
 0x554   :  { %3129 = vmatpush3.bf16.msra.mxu1 %v3297_v34 }
 0x555   :  { %3130 = vmatprep.subr.bf16.mxu1 %v3388_v38 }
 0x558   :  { %3131 = vmatpush3.bf16.msra.mxu1 %v3298_v41 }
 0x559   :  { %3136 = vmatprep.subr.bf16.mxu1 %v3388_v38 }
 0x5e9   :  { %v1998_v47 = vpop.f32.mrf.mxu0  ;;  %v2039_v48 = vpop.f32.mrf.mxu1 }
 0x5ea   :  { %v2045_v50 = vadd.f32 %v1998_v47, %v3737_v57  ;;  %v4146_v57 = vld [vmem:[%s4221_s4] ss:$0 sm:$0xff] }
 0x5eb   :  { %v2000_v46 = vpop.f32.mrf.mxu0  ;;  %v3114_v49 = vpop.f32.mrf.mxu1  ;;  %v2066_v28 = vadd.f32 %v4146_v57, %v2039_v48 }
 0x5ec   :  { %v2831_v0 = vmul.f32 -1.442695, %v2045_v50  ;;  %v2052_v11 = vadd.f32 %v2000_v46, %v3742_v61 }
 0x5ed   :  { %v2002_v4 = vpop.f32.mrf.mxu0  ;;  %v2042_v5 = vpop.f32.mrf.mxu1 }
 0x5ee   :  { %3357 = vpow2.f32 %v2831_v0  ;;  %v2832_v13 = vmul.f32 -1.442695, %v2052_v11 }
 0x5ef   :  { %v2003_v9 = vpop.f32.mrf.mxu0  ;;  %v3115_v7 = vpop.f32.mrf.mxu1 }
 0x5f0   :  { %3359 = vpow2.f32 %v2832_v13 }
 0x5fb   :  { %v3358_v16 = vpop.eup %3357 }
 0x5fc   :  { %v2049_v17 = vadd.f32 1.0, %v3358_v16 }
 0x5fd   :  { %v3360_v19 = vpop.eup %3359 }
 0x5fe   :  { %3361 = vrcp.f32 %v2049_v17  ;;  %v2056_v22 = vadd.f32 1.0, %v3360_v19 }
 0x600   :  { %3363 = vrcp.f32 %v2056_v22 }
 0x60b   :  { %v3362_v31 = vpop.eup %3361 }
 0x60c   :  { %v2067_v25 = vmul.f32 %v3362_v31, %v2066_v28 }
 0x60d   :  { %v3364_v61 = vpop.eup %3363 }
 0x60e   :  { %v2068_v39 = vadd.f32 %v2067_v25, %v3750_v3  ;;  %v2070_v43 = vsub.f32 1.0, %v3364_v61  ;;  %v2072_v51 = vmul.f32 %v3364_v61, %v4086_v26  ;;  %v3300_v3 = vld [vmem:[%s4218_s2 + $0x98] ss:$12 sps:$4 sm:$0xff]  }
 0x610   :  { %3365 = vtanh.f32 %v2068_v39 }
 0x61d   :  { %v3366_v42 = vpop.eup %3365 }
 0x61e   :  { %v2071_v20 = vmul.f32 %v3366_v42, %v2070_v43 }
 0x620   :  { %v4151_v15 = vadd.f32 %v2072_v51, %v2071_v20 }
 0x622   :  { %v2082_v55 = vpack.c.bf16 %v4151_v15, %v4151_v15 }
 0x624   :  { %2276 = vmatmul.mubr.bf16.vlgmr.msra.gmra.mxu0 %v2082_v55  ;;  %3133 = vmatmul.mubr.bf16.vlgmr.msra.gmra.mxu1 %v2082_v55 }
 0x625   :  { %2523 = vmatpush1.bf16.msra.mxu0 %v3900_v12  ;;  %2554 = vmatprep.mubr.bf16.mxu0 %v3387_v1  ;;  %v3299_v1 = vld [vmem:[%s4218_s2 + $0xb0] ss:$12 sps:$4 sm:$0xff]   ;;  %v3301_v12 = vld [vmem:[%s4218_s2 + $0x80] ss:$12 sps:$4 sm:$0xff]  }
 0x626   :  { %2524 = vmatprep.subr.bf16.mxu0 %v3910_v23  ;;  %3152 = vmatprep.mubr.msk.bf16.mxu1 %vm3389_vm0, %v3388_v38  ;;  %v3302_v23 = vld [vmem:[%s4218_s2 + $0x68] ss:$12 sps:$4 sm:$0xff]  }
 0x627   :  { %3137 = vmatpush3.bf16.msra.mxu1 %v3299_v1 }
 0x628   :  { %3138 = vmatprep.subr.bf16.mxu1 %v3388_v38 }
 0x629   :  { %2525 = vmatpush1.bf16.msra.mxu0 %v3916_v24  ;;  %v3303_v24 = vld [vmem:[%s4218_s2 + $0x50] ss:$12 sps:$4 sm:$0xff]  }
 0x62a   :  { %2526 = vmatprep.subr.bf16.mxu0 %v3926_v56  ;;  %v3304_v56 = vld [vmem:[%s4218_s2 + $0x38] ss:$12 sps:$4 sm:$0xff]  }
 0x62b   :  { %3139 = vmatpush3.bf16.msra.mxu1 %v3300_v3 }
 0x62c   :  { %3140 = vmatprep.subr.bf16.mxu1 %v3388_v38 }
 0x62d   :  { %2527 = vmatpush1.bf16.msra.mxu0 %v3932_v59  ;;  %v3305_v59 = vld [vmem:[%s4218_s2 + $0x20] ss:$12 sps:$4 sm:$0xff]  }
 0x62e   :  { %2528 = vmatprep.subr.bf16.mxu0 %v3942_v60  ;;  %v3306_v60 = vld [vmem:[%s4218_s2 + $0x8] ss:$12 sps:$4 sm:$0xff]  }
 0x62f   :  { %3141 = vmatpush3.bf16.msra.mxu1 %v3301_v12 }
 0x630   :  { %3142 = vmatprep.subr.bf16.mxu1 %v3388_v38 }
 0x631   :  { %2529 = vmatpush1.bf16.msra.mxu0 %v3948_v63 }
 0x632   :  { %2530 = vmatprep.subr.bf16.mxu0 %v3958_v27 }
 0x633   :  { %3143 = vmatpush3.bf16.msra.mxu1 %v3302_v23 }
 0x634   :  { %3144 = vmatprep.subr.bf16.mxu1 %v3388_v38 }
 0x635   :  { %2531 = vmatpush1.bf16.msra.mxu0 %v3964_v29 }
 0x636   :  { %2532 = vmatprep.subr.bf16.mxu0 %v3974_v32 }
 0x637   :  { %3145 = vmatpush3.bf16.msra.mxu1 %v3303_v24 }
 0x638   :  { %3146 = vmatprep.subr.bf16.mxu1 %v3388_v38 }
 0x639   :  { %2533 = vmatpush1.bf16.msra.mxu0 %v3980_v33 }
 0x63a   :  { %2534 = vmatprep.subr.bf16.mxu0 %v3990_v37 }
 0x63b   :  { %3147 = vmatpush3.bf16.msra.mxu1 %v3304_v56 }
 0x63c   :  { %3148 = vmatprep.subr.bf16.mxu1 %v3388_v38 }
 0x63d   :  { %2535 = vmatpush1.bf16.msra.mxu0 %v3996_v40 }
 0x63e   :  { %2536 = vmatprep.subr.bf16.mxu0 %v4006_v44 }
 0x63f   :  { %3149 = vmatpush3.bf16.msra.mxu1 %v3305_v59 }
 0x640   :  { %3150 = vmatprep.subr.bf16.mxu1 %v3388_v38 }
 0x641   :  { %2537 = vmatpush1.bf16.msra.mxu0 %v4012_v45 }
 0x643   :  { %3151 = vmatpush3.bf16.msra.mxu1 %v3306_v60 }
 0x6e4   :  { %v2277_v63 = vpop.f32.mrf.mxu0  ;;  %v2318_v27 = vpop.f32.mrf.mxu1 }
 0x6e5   :  { %v2324_v29 = vadd.f32 %v2277_v63, %v3747_v2  ;;  %v2345_v14 = vadd.f32 %v4146_v57, %v2318_v27 }
 0x6e6   :  { %v2279_v32 = vpop.f32.mrf.mxu0  ;;  %v3134_v33 = vpop.f32.mrf.mxu1 }
 0x6e7   :  { %v2858_v37 = vmul.f32 -1.442695, %v2324_v29  ;;  %v2331_v53 = vadd.f32 %v2279_v32, %v3752_v6 }
 0x6e8   :  { %v2281_v40 = vpop.f32.mrf.mxu0  ;;  %v2321_v44 = vpop.f32.mrf.mxu1 }
 0x6e9   :  { %3367 = vpow2.f32 %v2858_v37  ;;  %v2859_v38 = vmul.f32 -1.442695, %v2331_v53 }
 0x6ea   :  { %v2282_v45 = vpop.f32.mrf.mxu0  ;;  %v3135_v35 = vpop.f32.mrf.mxu1 }
 0x6eb   :  { %3369 = vpow2.f32 %v2859_v38 }
 0x6f6   :  { %v3368_v26 = vpop.eup %3367 }
 0x6f7   :  { %v2328_v36 = vadd.f32 1.0, %v3368_v26 }
 0x6f8   :  { %v3370_v58 = vpop.eup %3369 }
 0x6f9   :  { %3371 = vrcp.f32 %v2328_v36  ;;  %v2335_v8 = vadd.f32 1.0, %v3370_v58 }
 0x6fb   :  { %3373 = vrcp.f32 %v2335_v8 }
 0x706   :  { %v3372_v2 = vpop.eup %3371 }
 0x707   :  { %v2346_v21 = vmul.f32 %v3372_v2, %v2345_v14 }
 0x708   :  { %v3374_v30 = vpop.eup %3373 }
 0x709   :  { %v2347_v52 = vadd.f32 %v2346_v21, %v3735_v54  ;;  %v2349_v34 = vsub.f32 1.0, %v3374_v30  ;;  %v2351_v6 = vmul.f32 %v3374_v30, %v4151_v15 }
 0x70b   :  { %3375 = vtanh.f32 %v2347_v52 }
 0x718   :  { %v3376_v41 = vpop.eup %3375 }
 0x719   :  { %v2350_v47 = vmul.f32 %v3376_v41, %v2349_v34 }
 0x71b   :  { %v2352_v48 = vadd.f32 %v2351_v6, %v2350_v47 }
 0x71d   :  { %v2361_v50 = vpack.c.bf16 %v2352_v48, %v2352_v48 }
 0x71f   :  { %2555 = vmatmul.mubr.bf16.vlgmr.msra.gmra.mxu0 %v2361_v50  ;;  %3153 = vmatmul.mubr.bf16.vlgmr.msra.gmra.mxu1 %v2361_v50 }
 0x7df   :  { %v2556_v46 = vpop.f32.mrf.mxu0  ;;  %v2597_v49 = vpop.f32.mrf.mxu1 }
 0x7e0   :  { %v2603_v0 = vadd.f32 %v2556_v46, %v3754_v10  ;;  %v2624_v25 = vadd.f32 %v4146_v57, %v2597_v49 }
 0x7e1   :  { %v2558_v4 = vpop.f32.mrf.mxu0  ;;  %v3154_v5 = vpop.f32.mrf.mxu1 }
 0x7e2   :  { %v2885_v9 = vmul.f32 -1.442695, %v2603_v0  ;;  %v2610_v16 = vadd.f32 %v2558_v4, %v3756_v18 }
 0x7e3   :  { %v2560_v7 = vpop.f32.mrf.mxu0  ;;  %v2600_v54 = vpop.f32.mrf.mxu1 }
 0x7e4   :  { %3377 = vpow2.f32 %v2885_v9  ;;  %v2886_v17 = vmul.f32 -1.442695, %v2610_v16 }
 0x7e5   :  { %v2561_v11 = vpop.f32.mrf.mxu0  ;;  %v3155_v13 = vpop.f32.mrf.mxu1 }
 0x7e6   :  { %3379 = vpow2.f32 %v2886_v17 }
 0x7f1   :  { %v3378_v19 = vpop.eup %3377 }
 0x7f2   :  { %v2607_v22 = vadd.f32 1.0, %v3378_v19 }
 0x7f3   :  { %v3380_v28 = vpop.eup %3379 }
 0x7f4   :  { %3381 = vrcp.f32 %v2607_v22  ;;  %v2614_v31 = vadd.f32 1.0, %v3380_v28 }
 0x7f6   :  { %3383 = vrcp.f32 %v2614_v31 }
 0x801   :  { %v3382_v10 = vpop.eup %3381 }
 0x802   :  { %v2625_v39 = vmul.f32 %v3382_v10, %v2624_v25 }
 0x803   :  { %v3384_v43 = vpop.eup %3383 }
 0x804   :  { %v2626_v61 = vadd.f32 %v2625_v39, %v3745_v62  ;;  %v2628_v42 = vsub.f32 1.0, %v3384_v43  ;;  %v2630_v18 = vmul.f32 %v3384_v43, %v2352_v48 }
 0x806   :  { %3385 = vtanh.f32 %v2626_v61 }
 0x813   :  { %v3386_v20 = vpop.eup %3385 }
 0x814   :  { %v2629_v51 = vmul.f32 %v3386_v20, %v2628_v42 }
 0x816   :  { %v2631_v15 = vadd.f32 %v2630_v18, %v2629_v51 }
 0x818   :  { %2632 = vst [vmem:[%s4222_s6] sm:$0xff] %v2631_v15 }

// kernel: encoder_decoder_forward.3
= control target key start
LH: loop header
LB: loop body
LE: loop exit
PB: predicated region body
PF: predicated region fallthrough
CT: control target
= control target key end

     0   :  { %v3659_v1 = vmov 0   ;;  %v3660_v48 = vmov 0.0   ;;  %vm3661_vm0 = vmmov 0   ;;  %s4566_s2 = inlined_call_operand.vmem [shape: bf16[128,384], index: 2, kind: input, shape index: {}]   ;;  %s4567_s3 = inlined_call_operand.vmem [shape: bf16[128,384], index: 3, kind: input, shape index: {}]   ;;  %s4568_s0 = inlined_call_operand.vmem [shape: bf16[64,128], index: 0, kind: input, shape index: {}]   ;;  %s4569_s5 = inlined_call_operand.vmem [shape: f32[8,128], index: 5, kind: input, shape index: {}]   ;;  %s4570_s1 = inlined_call_operand.vmem [shape: f32[8,384], index: 1, kind: input, shape index: {}]   ;;  %s4571_s4 = inlined_call_operand.vmem [shape: f32[1,128], index: 4, kind: input, shape index: {}]   ;;  %s4572_s6 = inlined_call_operand.vmem [shape: bf16[128,128], index: 6, kind: input, shape index: {}]   ;;  %s4573_s7 = inlined_call_operand.vmem [shape: f32[1,128], index: 7, kind: input, shape index: {}]   ;;  %s4574_s8 = inlined_call_operand.vmem [shape: f32[64,128], index: 8, kind: output, shape index: {0}]   ;;  %s4575_s9 = inlined_call_operand.vmem [shape: f32[8,128], index: 9, kind: output, shape index: {1}]  }
   0x1   :  { %v3423_v0 = vld [vmem:[%s4566_s2 + $0xac] ss:$12 sps:$4 sm:$0xff]   ;;  %267 = vmatprep.mubr.bf16.mxu1 %v3659_v1  ;;  %603 = vmatprep.mubr.bf16.mxu0 %v3659_v1  ;;  %v3425_v2 = vld [vmem:[%s4566_s2 + $0xa8] ss:$12 sps:$4 sm:$0xff]   ;;  %v3431_v6 = vld [vmem:[%s4566_s2 + $0x90] ss:$12 sps:$4 sm:$0xff]  }
   0x2   :  { %235 = vmatprep.subr.bf16.mxu1 %v3423_v0  ;;  %v3723_v3 = vld [vmem:[%s4567_s3 + $0xac] ss:$12 sps:$4 sm:$0xff]   ;;  %v3728_v4 = vld [vmem:[%s4567_s3 + $0xa8] ss:$12 sps:$4 sm:$0xff]   ;;  %v3746_v8 = vld [vmem:[%s4567_s3 + $0x90] ss:$12 sps:$4 sm:$0xff]  }
   0x3   :  { %236 = vmatpush1.bf16.msra.mxu1 %v3425_v2  ;;  %v3429_v5 = vld [vmem:[%s4566_s2 + $0x94] ss:$12 sps:$4 sm:$0xff]   ;;  %571 = vmatprep.subr.bf16.mxu0 %v3723_v3  ;;  %v3435_v9 = vld [vmem:[%s4566_s2 + $0x7c] ss:$12 sps:$4 sm:$0xff]   ;;  %v3437_v10 = vld [vmem:[%s4566_s2 + $0x78] ss:$12 sps:$4 sm:$0xff]  }
   0x4   :  { %v3740_v7 = vld [vmem:[%s4567_s3 + $0x94] ss:$12 sps:$4 sm:$0xff]   ;;  %572 = vmatpush1.bf16.msra.mxu0 %v3728_v4  ;;  %237 = vmatprep.subr.bf16.mxu1 %v3429_v5  ;;  %v3758_v11 = vld [vmem:[%s4567_s3 + $0x7c] ss:$12 sps:$4 sm:$0xff]   ;;  %v3441_v12 = vld [vmem:[%s4566_s2 + $0x64] ss:$12 sps:$4 sm:$0xff]  }
   0x5   :  { %573 = vmatprep.subr.bf16.mxu0 %v3740_v7  ;;  %v3767_v13 = vld [vmem:[%s4567_s3 + $0x78] ss:$12 sps:$4 sm:$0xff]   ;;  %v3443_v15 = vld [vmem:[%s4566_s2 + $0x60] ss:$12 sps:$4 sm:$0xff]   ;;  %v3449_v19 = vld [vmem:[%s4566_s2 + $0x48] ss:$12 sps:$4 sm:$0xff]  }
   0x6   :  { %v3773_v14 = vld [vmem:[%s4567_s3 + $0x64] ss:$12 sps:$4 sm:$0xff]   ;;  %v3447_v16 = vld [vmem:[%s4566_s2 + $0x4c] ss:$12 sps:$4 sm:$0xff]   ;;  %v3453_v20 = vld [vmem:[%s4566_s2 + $0x34] ss:$12 sps:$4 sm:$0xff]  }
   0x7   :  { %238 = vmatpush1.bf16.msra.mxu1 %v3431_v6  ;;  %v3785_v17 = vld [vmem:[%s4567_s3 + $0x60] ss:$12 sps:$4 sm:$0xff]   ;;  %v3803_v21 = vld [vmem:[%s4567_s3 + $0x48] ss:$12 sps:$4 sm:$0xff]   ;;  %v3455_v23 = vld [vmem:[%s4566_s2 + $0x30] ss:$12 sps:$4 sm:$0xff]  }
   0x8   :  { %239 = vmatprep.subr.bf16.mxu1 %v3435_v9  ;;  %574 = vmatpush1.bf16.msra.mxu0 %v3746_v8  ;;  %v3791_v18 = vld [vmem:[%s4567_s3 + $0x4c] ss:$12 sps:$4 sm:$0xff]   ;;  %v3809_v22 = vld [vmem:[%s4567_s3 + $0x34] ss:$12 sps:$4 sm:$0xff]   ;;  %v3459_v24 = vld [vmem:[%s4566_s2 + $0x1c] ss:$12 sps:$4 sm:$0xff]  }
   0x9   :  { %575 = vmatprep.subr.bf16.mxu0 %v3758_v11  ;;  %v3821_v25 = vld [vmem:[%s4567_s3 + $0x30] ss:$12 sps:$4 sm:$0xff]   ;;  %v3461_v27 = vld [vmem:[%s4566_s2 + $0x18] ss:$12 sps:$4 sm:$0xff]   ;;  %v3467_v30 = vld [vmem:[%s4566_s2] ss:$12 sps:$4 sm:$0xff]  }
   0xa   :  { %v3827_v26 = vld [vmem:[%s4567_s3 + $0x1c] ss:$12 sps:$4 sm:$0xff]   ;;  %v3835_v28 = vld [vmem:[%s4567_s3 + $0x18] ss:$12 sps:$4 sm:$0xff]   ;;  %v3853_v32 = vld [vmem:[%s4567_s3] ss:$12 sps:$4 sm:$0xff]  }
   0xb   :  { %240 = vmatpush1.bf16.msra.mxu1 %v3437_v10  ;;  %v3465_v29 = vld [vmem:[%s4566_s2 + $0x4] ss:$12 sps:$4 sm:$0xff]   ;;  %v3475_v38 = vld [vmem:[%s4566_s2 + $0x80] ss:$12 sps:$4 sm:$0xff]   ;;  %v3476_v40 = vld [vmem:[%s4566_s2 + $0x68] ss:$12 sps:$4 sm:$0xff]  }
   0xc   :  { %241 = vmatprep.subr.bf16.mxu1 %v3441_v12  ;;  %576 = vmatpush1.bf16.msra.mxu0 %v3767_v13  ;;  %v3848_v31 = vld [vmem:[%s4567_s3 + $0x4] ss:$12 sps:$4 sm:$0xff]   ;;  %v3474_v39 = vld [vmem:[%s4568_s0 + $0x8] sm:$0xff]   ;;  %v3480_v45 = vld [vmem:[%s4568_s0 + $0x18] sm:$0xff]  }
   0xd   :  { %577 = vmatprep.subr.bf16.mxu0 %v3773_v14  ;;  %v3472_v33 = vld [vmem:[%s4566_s2 + $0xb0] ss:$12 sps:$4 sm:$0xff]   ;;  %v3862_v34 = vld [vmem:[%s4569_s5] sm:$0xff]  ;;  %v3482_v46 = vld [vmem:[%s4566_s2 + $0x8] ss:$12 sps:$4 sm:$0xff]  }
   0xe   :  { %v3471_v35 = vld [vmem:[%s4568_s0] sm:$0xff]   ;;  %v3870_v36 = vpack.c.bf16 %v3862_v34, %v3862_v34  ;;  %v3478_v41 = vld [vmem:[%s4566_s2 + $0x50] ss:$12 sps:$4 sm:$0xff]   ;;  %v3486_v51 = vld [vmem:[%s4567_s3 + $0x68] ss:$12 sps:$4 sm:$0xff]  }
   0xf   :  { %242 = vmatpush1.bf16.msra.mxu1 %v3443_v15  ;;  %v3473_v37 = vld [vmem:[%s4566_s2 + $0x98] ss:$12 sps:$4 sm:$0xff]   ;;  %v3477_v42 = vld [vmem:[%s4568_s0 + $0x10] sm:$0xff]   ;;  %v3481_v44 = vld [vmem:[%s4566_s2 + $0x20] ss:$12 sps:$4 sm:$0xff]  }
  0x10   :  { %243 = vmatprep.subr.bf16.mxu1 %v3447_v16  ;;  %578 = vmatpush1.bf16.msra.mxu0 %v3785_v17  ;;  %v3479_v43 = vld [vmem:[%s4566_s2 + $0x38] ss:$12 sps:$4 sm:$0xff]   ;;  %v3483_v47 = vld [vmem:[%s4567_s3 + $0xb0] ss:$12 sps:$4 sm:$0xff]   ;;  %v3485_v50 = vld [vmem:[%s4567_s3 + $0x80] ss:$12 sps:$4 sm:$0xff]  }
  0x11   :  { %579 = vmatprep.subr.bf16.mxu0 %v3791_v18  ;;  %v3484_v49 = vld [vmem:[%s4567_s3 + $0x98] ss:$12 sps:$4 sm:$0xff]   ;;  %v3487_v52 = vld [vmem:[%s4567_s3 + $0x50] ss:$12 sps:$4 sm:$0xff]   ;;  %v3489_v54 = vld [vmem:[%s4567_s3 + $0x20] ss:$12 sps:$4 sm:$0xff]  }
  0x12   :  { %v3488_v53 = vld [vmem:[%s4567_s3 + $0x38] ss:$12 sps:$4 sm:$0xff]   ;;  %v3490_v55 = vld [vmem:[%s4567_s3 + $0x8] ss:$12 sps:$4 sm:$0xff]   ;;  %v3491_v56 = vld [vmem:[%s4567_s3 + $0xb0] ss:$12 sps:$4 sm:$0xff]  }
  0x13   :  { %244 = vmatpush1.bf16.msra.mxu1 %v3449_v19  ;;  %v3492_v57 = vld [vmem:[%s4567_s3 + $0x98] ss:$12 sps:$4 sm:$0xff]   ;;  %v3493_v58 = vld [vmem:[%s4567_s3 + $0x80] ss:$12 sps:$4 sm:$0xff]   ;;  %v3494_v59 = vld [vmem:[%s4567_s3 + $0x68] ss:$12 sps:$4 sm:$0xff]  }
  0x14   :  { %245 = vmatprep.subr.bf16.mxu1 %v3453_v20  ;;  %580 = vmatpush1.bf16.msra.mxu0 %v3803_v21  ;;  %v3495_v60 = vld [vmem:[%s4567_s3 + $0x50] ss:$12 sps:$4 sm:$0xff]   ;;  %v3496_v61 = vld [vmem:[%s4567_s3 + $0x38] ss:$12 sps:$4 sm:$0xff]   ;;  %v3497_v62 = vld [vmem:[%s4567_s3 + $0x20] ss:$12 sps:$4 sm:$0xff]  }
  0x15   :  { %581 = vmatprep.subr.bf16.mxu0 %v3809_v22  ;;  %v3498_v63 = vld [vmem:[%s4567_s3 + $0x8] ss:$12 sps:$4 sm:$0xff]   ;;  %v404_v5 = vld [vmem:[%s4570_s1] sm:$0xff] }
  0x16   :  { %v405_v12 = vld [vmem:[%s4570_s1 + $0x8] sm:$0xff] }
  0x17   :  { %246 = vmatpush1.bf16.msra.mxu1 %v3455_v23 }
  0x18   :  { %247 = vmatprep.subr.bf16.mxu1 %v3459_v24  ;;  %582 = vmatpush1.bf16.msra.mxu0 %v3821_v25 }
  0x19   :  { %583 = vmatprep.subr.bf16.mxu0 %v3827_v26 }
  0x1b   :  { %248 = vmatpush1.bf16.msra.mxu1 %v3461_v27 }
  0x1c   :  { %249 = vmatprep.subr.bf16.mxu1 %v3465_v29  ;;  %584 = vmatpush1.bf16.msra.mxu0 %v3835_v28 }
  0x1d   :  { %585 = vmatprep.subr.bf16.mxu0 %v3848_v31 }
  0x1f   :  { %250 = vmatpush1.bf16.msra.mxu1 %v3467_v30 }
  0x20   :  { %3212 = vmatprep.subr.bf16.mxu1 %v3472_v33  ;;  %586 = vmatpush1.bf16.msra.mxu0 %v3853_v32 }
  0x21   :  { %857 = vmatprep.subr.bf16.mxu0 %v3723_v3 }
  0x22   :  { %268 = vmatmul.mubr.bf16.vlgmr.msra.gmra.mxu1 %v3471_v35 }
  0x23   :  { %3213 = vmatpush3.bf16.msra.mxu1 %v3472_v33  ;;  %277 = vmatprep.mubr.bf16.mxu1 %v3659_v1 }
  0x24   :  { %604 = vmatmul.mubr.bf16.vlgmr.msra.gmra.mxu0 %v3870_v36  ;;  %3214 = vmatprep.subr.bf16.mxu1 %v3473_v37 }
  0x25   :  { %858 = vmatpush1.bf16.msra.mxu0 %v3728_v4  ;;  %889 = vmatprep.mubr.bf16.mxu0 %v3659_v1 }
  0x26   :  { %859 = vmatprep.subr.bf16.mxu0 %v3740_v7 }
  0x27   :  { %3215 = vmatpush3.bf16.msra.mxu1 %v3473_v37 }
  0x28   :  { %3216 = vmatprep.subr.bf16.mxu1 %v3475_v38 }
  0x29   :  { %860 = vmatpush1.bf16.msra.mxu0 %v3746_v8 }
  0x2a   :  { %278 = vmatmul.mubr.bf16.gmra.mxu1 %v3474_v39  ;;  %861 = vmatprep.subr.bf16.mxu0 %v3758_v11 }
  0x2b   :  { %3217 = vmatpush3.bf16.msra.mxu1 %v3475_v38  ;;  %287 = vmatprep.mubr.bf16.mxu1 %v3659_v1 }
  0x2c   :  { %3218 = vmatprep.subr.bf16.mxu1 %v3476_v40 }
  0x2d   :  { %862 = vmatpush1.bf16.msra.mxu0 %v3767_v13 }
  0x2e   :  { %863 = vmatprep.subr.bf16.mxu0 %v3773_v14 }
  0x2f   :  { %3219 = vmatpush3.bf16.msra.mxu1 %v3476_v40 }
  0x30   :  { %3220 = vmatprep.subr.bf16.mxu1 %v3478_v41 }
  0x31   :  { %864 = vmatpush1.bf16.msra.mxu0 %v3785_v17 }
  0x32   :  { %288 = vmatmul.mubr.bf16.gmra.mxu1 %v3477_v42  ;;  %865 = vmatprep.subr.bf16.mxu0 %v3791_v18 }
  0x33   :  { %3221 = vmatpush3.bf16.msra.mxu1 %v3478_v41  ;;  %297 = vmatprep.mubr.bf16.mxu1 %v3659_v1 }
  0x34   :  { %3222 = vmatprep.subr.bf16.mxu1 %v3479_v43 }
  0x35   :  { %866 = vmatpush1.bf16.msra.mxu0 %v3803_v21 }
  0x36   :  { %867 = vmatprep.subr.bf16.mxu0 %v3809_v22 }
  0x37   :  { %3223 = vmatpush3.bf16.msra.mxu1 %v3479_v43 }
  0x38   :  { %3224 = vmatprep.subr.bf16.mxu1 %v3481_v44 }
  0x39   :  { %868 = vmatpush1.bf16.msra.mxu0 %v3821_v25 }
  0x3a   :  { %298 = vmatmul.mubr.bf16.gmra.mxu1 %v3480_v45  ;;  %869 = vmatprep.subr.bf16.mxu0 %v3827_v26 }
  0x3b   :  { %3225 = vmatpush3.bf16.msra.mxu1 %v3481_v44  ;;  %3228 = vmatprep.mubr.bf16.mxu1 %v3471_v35 }
  0x3c   :  { %3226 = vmatprep.subr.bf16.mxu1 %v3482_v46 }
  0x3d   :  { %870 = vmatpush1.bf16.msra.mxu0 %v3835_v28 }
  0x3e   :  { %871 = vmatprep.subr.bf16.mxu0 %v3848_v31 }
  0x3f   :  { %3227 = vmatpush3.bf16.msra.mxu1 %v3482_v46 }
  0x40   :  { %3236 = vmatprep.subr.bf16.mxu1 %v3660_v48 }
  0x41   :  { %872 = vmatpush1.bf16.msra.mxu0 %v3853_v32 }
  0x42   :  { %3229 = vmatmul.mubr.bf16.vlgmr.msra.gmra.mxu1 %v3474_v39  ;;  %1144 = vmatprep.subr.bf16.mxu0 %v3723_v3 }
  0x43   :  { %3237 = vmatpush3.bf16.msra.mxu1 %v3483_v47  ;;  %3232 = vmatprep.mubr.bf16.mxu1 %v3477_v42 }
  0x44   :  { %3238 = vmatprep.subr.bf16.mxu1 %v3660_v48 }
  0x47   :  { %3239 = vmatpush3.bf16.msra.mxu1 %v3484_v49 }
  0x48   :  { %3240 = vmatprep.subr.bf16.mxu1 %v3660_v48 }
  0x4a   :  { %3233 = vmatmul.mubr.bf16.gmra.mxu1 %v3480_v45 }
  0x4b   :  { %3241 = vmatpush3.bf16.msra.mxu1 %v3485_v50  ;;  %3252 = vmatprep.mubr.msk.bf16.mxu1 %vm3661_vm0, %v3660_v48 }
  0x4c   :  { %3242 = vmatprep.subr.bf16.mxu1 %v3660_v48 }
  0x4f   :  { %3243 = vmatpush3.bf16.msra.mxu1 %v3486_v51 }
  0x50   :  { %3244 = vmatprep.subr.bf16.mxu1 %v3660_v48 }
  0x53   :  { %3245 = vmatpush3.bf16.msra.mxu1 %v3487_v52 }
  0x54   :  { %3246 = vmatprep.subr.bf16.mxu1 %v3660_v48 }
  0x57   :  { %3247 = vmatpush3.bf16.msra.mxu1 %v3488_v53 }
  0x58   :  { %3248 = vmatprep.subr.bf16.mxu1 %v3660_v48 }
  0x5b   :  { %3249 = vmatpush3.bf16.msra.mxu1 %v3489_v54 }
  0x5c   :  { %3250 = vmatprep.subr.bf16.mxu1 %v3660_v48 }
  0x5f   :  { %3251 = vmatpush3.bf16.msra.mxu1 %v3490_v55 }
  0x60   :  { %3256 = vmatprep.subr.bf16.mxu1 %v3660_v48 }
  0x62   :  { %3253 = vmatmul.mubr.bf16.vlgmr.msra.gmra.mxu1 %v3870_v36 }
  0x63   :  { %3272 = vmatprep.mubr.msk.bf16.mxu1 %vm3661_vm0, %v3660_v48  ;;  %3257 = vmatpush3.bf16.msra.mxu1 %v3491_v56  ;;  %v979_v56 = vld [vmem:[%s4570_s1 + $0x10] sm:$0xff] }
  0x64   :  { %3258 = vmatprep.subr.bf16.mxu1 %v3660_v48 }
  0x67   :  { %3259 = vmatpush3.bf16.msra.mxu1 %v3492_v57 }
  0x68   :  { %3260 = vmatprep.subr.bf16.mxu1 %v3660_v48 }
  0x6b   :  { %3261 = vmatpush3.bf16.msra.mxu1 %v3493_v58 }
  0x6c   :  { %3262 = vmatprep.subr.bf16.mxu1 %v3660_v48 }
  0x6f   :  { %3263 = vmatpush3.bf16.msra.mxu1 %v3494_v59 }
  0x70   :  { %3264 = vmatprep.subr.bf16.mxu1 %v3660_v48 }
  0x73   :  { %3265 = vmatpush3.bf16.msra.mxu1 %v3495_v60 }
  0x74   :  { %3266 = vmatprep.subr.bf16.mxu1 %v3660_v48 }
  0x77   :  { %3267 = vmatpush3.bf16.msra.mxu1 %v3496_v61 }
  0x78   :  { %3268 = vmatprep.subr.bf16.mxu1 %v3660_v48 }
  0x7b   :  { %3269 = vmatpush3.bf16.msra.mxu1 %v3497_v62 }
  0x7c   :  { %3270 = vmatprep.subr.bf16.mxu1 %v3660_v48 }
  0x7f   :  { %3271 = vmatpush3.bf16.msra.mxu1 %v3498_v63 }
  0x80   :  { %3276 = vmatprep.subr.bf16.mxu1 %v3660_v48 }
  0xe2   :  { %v269_v0 = vpop.f32.mrf.mxu1 }
  0xe3   :  { %v407_v42 = vadd.f32 %v404_v5, %v269_v0 }
  0xe4   :  { %v271_v2 = vpop.f32.mrf.mxu1  ;;  %v605_v3 = vpop.f32.mrf.mxu0 }
  0xe5   :  { %v652_v47 = vadd.f32 %v605_v3, %v407_v42  ;;  %v408_v61 = vadd.f32 %v405_v12, %v271_v2 }
  0xe6   :  { %v273_v6 = vpop.f32.mrf.mxu1  ;;  %v607_v9 = vpop.f32.mrf.mxu0 }
  0xe7   :  { %v3998_v10 = vadd.f32 %v404_v5, %v273_v6  ;;  %v2915_v53 = vmul.f32 -1.442695, %v652_v47  ;;  %v659_v3 = vadd.f32 %v607_v9, %v408_v61 }
  0xe8   :  { %v275_v15 = vpop.f32.mrf.mxu1  ;;  %v609_v16 = vpop.f32.mrf.mxu0 }
  0xe9   :  { %v4003_v19 = vadd.f32 %v405_v12, %v275_v15  ;;  %3579 = vpow2.f32 %v2915_v53 }
  0xea   :  { %v279_v20 = vpop.f32.mrf.mxu1  ;;  %v610_v23 = vpop.f32.mrf.mxu0 }
  0xeb   :  { %v4005_v24 = vadd.f32 %v404_v5, %v279_v20  ;;  %v2916_v20 = vmul.f32 -1.442695, %v659_v3 }
  0xec   :  { %v281_v27 = vpop.f32.mrf.mxu1 }
  0xed   :  { %v4007_v29 = vadd.f32 %v405_v12, %v281_v27  ;;  %3581 = vpow2.f32 %v2916_v20 }
  0xee   :  { %v283_v30 = vpop.f32.mrf.mxu1 }
  0xef   :  { %v4009_v33 = vadd.f32 %v404_v5, %v283_v30 }
  0xf0   :  { %v285_v35 = vpop.f32.mrf.mxu1 }
  0xf1   :  { %v4011_v36 = vadd.f32 %v405_v12, %v285_v35 }
  0xf2   :  { %v289_v37 = vpop.f32.mrf.mxu1 }
  0xf3   :  { %v4013_v38 = vadd.f32 %v404_v5, %v289_v37 }
  0xf4   :  { %v291_v39 = vpop.f32.mrf.mxu1 }
  0xf5   :  { %v4015_v40 = vadd.f32 %v405_v12, %v291_v39  ;;  %v4049_v39 = vld [vmem:[%s4571_s4] ss:$0 sm:$0xff] }
  0xf6   :  { %v293_v41 = vpop.f32.mrf.mxu1  ;;  %v3580_v35 = vpop.eup %3579 }
  0xf7   :  { %v4017_v43 = vadd.f32 %v404_v5, %v293_v41 }
  0xf8   :  { %v295_v44 = vpop.f32.mrf.mxu1 }
  0xf9   :  { %v4019_v45 = vadd.f32 %v405_v12, %v295_v44 }
  0xfa   :  { %v299_v46 = vpop.f32.mrf.mxu1  ;;  %v3582_v9 = vpop.eup %3581 }
  0xfb   :  { %v4021_v49 = vadd.f32 %v404_v5, %v299_v46  ;;  %v663_v41 = vadd.f32 1.0, %v3582_v9 }
  0xfc   :  { %v301_v50 = vpop.f32.mrf.mxu1 }
  0xfd   :  { %v4023_v51 = vadd.f32 %v405_v12, %v301_v50 }
  0xfe   :  { %v303_v52 = vpop.f32.mrf.mxu1 }
  0xff   :  { %v4025_v54 = vadd.f32 %v404_v5, %v303_v52 }
 0x100   :  { %v305_v55 = vpop.f32.mrf.mxu1 }
 0x101   :  { %v4030_v57 = vadd.f32 %v405_v12, %v305_v55  ;;  %v656_v12 = vadd.f32 1.0, %v3580_v35 }
 0x102   :  { %v3230_v58 = vpop.f32.mrf.mxu1 }
 0x103   :  { %v4032_v59 = vadd.f32 %v3230_v58, %v979_v56  ;;  %3583 = vrcp.f32 %v656_v12 }
 0x104   :  { %v342_v60 = vpop.f32.mrf.mxu1  ;;  %3585 = vrcp.f32 %v663_v41 }
 0x105   :  { %v409_v50 = vadd.f32 %v979_v56, %v342_v60 }
 0x106   :  { %v3231_v62 = vpop.f32.mrf.mxu1 }
 0x107   :  { %v4034_v63 = vadd.f32 %v3231_v62, %v979_v56 }
 0x108   :  { %v345_v0 = vpop.f32.mrf.mxu1 }
 0x109   :  { %v4036_v5 = vadd.f32 %v979_v56, %v345_v0 }
 0x10a   :  { %v3234_v6 = vpop.f32.mrf.mxu1 }
 0x10b   :  { %v4038_v15 = vadd.f32 %v3234_v6, %v979_v56 }
 0x10c   :  { %v358_v16 = vpop.f32.mrf.mxu1 }
 0x10d   :  { %v4040_v23 = vadd.f32 %v979_v56, %v358_v16 }
 0x10e   :  { %v3235_v27 = vpop.f32.mrf.mxu1 }
 0x10f   :  { %v4042_v30 = vadd.f32 %v3235_v27, %v979_v56 }
 0x110   :  { %v361_v37 = vpop.f32.mrf.mxu1  ;;  %v3584_v46 = vpop.eup %3583 }
 0x111   :  { %v4044_v2 = vadd.f32 %v979_v56, %v361_v37  ;;  %v3586_v61 = vpop.eup %3585 }
 0x112   :  { %v677_v62 = vsub.f32 1.0, %v3586_v61  ;;  %v679_v3 = vmul.f32 %v3586_v61, %v3862_v34  ;;  %v4127_v61 = vld [vmem:[%s4567_s3 + $0xa8] ss:$12 sps:$4 sm:$0xff]  }
 0x122   :  { %v646_v42 = vpop.f32.mrf.mxu1 }
 0x123   :  { %v673_v44 = vadd.f32 %v4049_v39, %v646_v42 }
 0x124   :  { %v3254_v47 = vpop.f32.mrf.mxu1 }
 0x125   :  { %v674_v52 = vmul.f32 %v3584_v46, %v673_v44 }
 0x126   :  { %v649_v53 = vpop.f32.mrf.mxu1 }
 0x127   :  { %v675_v55 = vadd.f32 %v674_v52, %v409_v50 }
 0x128   :  { %v3255_v58 = vpop.f32.mrf.mxu1 }
 0x129   :  { %3587 = vtanh.f32 %v675_v55 }
 0x136   :  { %v3588_v0 = vpop.eup %3587 }
 0x137   :  { %v678_v6 = vmul.f32 %v3588_v0, %v677_v62  ;;  %v3510_v62 = vld [vmem:[%s4567_s3 + $0xb0] ss:$12 sps:$4 sm:$0xff]   ;;  %v4137_v0 = vld [vmem:[%s4567_s3 + $0x94] ss:$12 sps:$4 sm:$0xff]  }
 0x139   :  { %v4053_v16 = vadd.f32 %v679_v3, %v678_v6  ;;  %v4143_v3 = vld [vmem:[%s4567_s3 + $0x90] ss:$12 sps:$4 sm:$0xff]   ;;  %v3514_v6 = vld [vmem:[%s4567_s3 + $0x98] ss:$12 sps:$4 sm:$0xff]  }
 0x13b   :  { %v696_v20 = vpack.c.bf16 %v4053_v16, %v4053_v16 }
 0x13d   :  { %890 = vmatmul.mubr.bf16.vlgmr.msra.gmra.mxu0 %v696_v20  ;;  %3273 = vmatmul.mubr.bf16.vlgmr.msra.gmra.mxu1 %v696_v20  ;;  %v4153_v20 = vld [vmem:[%s4567_s3 + $0x7c] ss:$12 sps:$4 sm:$0xff]  }
 0x13e   :  { %1145 = vmatpush1.bf16.msra.mxu0 %v3728_v4  ;;  %1176 = vmatprep.mubr.bf16.mxu0 %v3659_v1  ;;  %v3499_v4 = vld [vmem:[%s4567_s3 + $0xb0] ss:$12 sps:$4 sm:$0xff]  }
 0x13f   :  { %1146 = vmatprep.subr.bf16.mxu0 %v3740_v7  ;;  %3292 = vmatprep.mubr.msk.bf16.mxu1 %vm3661_vm0, %v3660_v48  ;;  %v3500_v7 = vld [vmem:[%s4567_s3 + $0x98] ss:$12 sps:$4 sm:$0xff]  }
 0x140   :  { %3277 = vmatpush3.bf16.msra.mxu1 %v3499_v4  ;;  %v4159_v4 = vld [vmem:[%s4567_s3 + $0x78] ss:$12 sps:$4 sm:$0xff]  }
 0x141   :  { %3278 = vmatprep.subr.bf16.mxu1 %v3660_v48 }
 0x142   :  { %1147 = vmatpush1.bf16.msra.mxu0 %v3746_v8  ;;  %v3501_v8 = vld [vmem:[%s4567_s3 + $0x80] ss:$12 sps:$4 sm:$0xff]  }
 0x143   :  { %1148 = vmatprep.subr.bf16.mxu0 %v3758_v11  ;;  %v3502_v11 = vld [vmem:[%s4567_s3 + $0x68] ss:$12 sps:$4 sm:$0xff]  }
 0x144   :  { %3279 = vmatpush3.bf16.msra.mxu1 %v3500_v7  ;;  %v3518_v7 = vld [vmem:[%s4567_s3 + $0x80] ss:$12 sps:$4 sm:$0xff]  }
 0x145   :  { %3280 = vmatprep.subr.bf16.mxu1 %v3660_v48 }
 0x146   :  { %1149 = vmatpush1.bf16.msra.mxu0 %v3767_v13  ;;  %v3503_v13 = vld [vmem:[%s4567_s3 + $0x50] ss:$12 sps:$4 sm:$0xff]  }
 0x147   :  { %1150 = vmatprep.subr.bf16.mxu0 %v3773_v14  ;;  %v3504_v14 = vld [vmem:[%s4567_s3 + $0x38] ss:$12 sps:$4 sm:$0xff]  }
 0x148   :  { %3281 = vmatpush3.bf16.msra.mxu1 %v3501_v8  ;;  %v4169_v8 = vld [vmem:[%s4567_s3 + $0x64] ss:$12 sps:$4 sm:$0xff]  }
 0x149   :  { %3282 = vmatprep.subr.bf16.mxu1 %v3660_v48 }
 0x14a   :  { %1151 = vmatpush1.bf16.msra.mxu0 %v3785_v17  ;;  %v3505_v17 = vld [vmem:[%s4567_s3 + $0x20] ss:$12 sps:$4 sm:$0xff]  }
 0x14b   :  { %1152 = vmatprep.subr.bf16.mxu0 %v3791_v18  ;;  %v3506_v18 = vld [vmem:[%s4567_s3 + $0x8] ss:$12 sps:$4 sm:$0xff]  }
 0x14c   :  { %3283 = vmatpush3.bf16.msra.mxu1 %v3502_v11  ;;  %v4175_v11 = vld [vmem:[%s4567_s3 + $0x60] ss:$12 sps:$4 sm:$0xff]  }
 0x14d   :  { %3284 = vmatprep.subr.bf16.mxu1 %v3660_v48 }
 0x14e   :  { %1153 = vmatpush1.bf16.msra.mxu0 %v3803_v21 }
 0x14f   :  { %1154 = vmatprep.subr.bf16.mxu0 %v3809_v22 }
 0x150   :  { %3285 = vmatpush3.bf16.msra.mxu1 %v3503_v13  ;;  %v3522_v13 = vld [vmem:[%s4567_s3 + $0x68] ss:$12 sps:$4 sm:$0xff]  }
 0x151   :  { %3286 = vmatprep.subr.bf16.mxu1 %v3660_v48 }
 0x152   :  { %1155 = vmatpush1.bf16.msra.mxu0 %v3821_v25 }
 0x153   :  { %1156 = vmatprep.subr.bf16.mxu0 %v3827_v26 }
 0x154   :  { %3287 = vmatpush3.bf16.msra.mxu1 %v3504_v14  ;;  %v4185_v14 = vld [vmem:[%s4567_s3 + $0x4c] ss:$12 sps:$4 sm:$0xff]  }
 0x155   :  { %3288 = vmatprep.subr.bf16.mxu1 %v3660_v48 }
 0x156   :  { %1157 = vmatpush1.bf16.msra.mxu0 %v3835_v28 }
 0x157   :  { %1158 = vmatprep.subr.bf16.mxu0 %v3848_v31 }
 0x158   :  { %3289 = vmatpush3.bf16.msra.mxu1 %v3505_v17  ;;  %v4191_v17 = vld [vmem:[%s4567_s3 + $0x48] ss:$12 sps:$4 sm:$0xff]  }
 0x159   :  { %3290 = vmatprep.subr.bf16.mxu1 %v3660_v48 }
 0x15a   :  { %1159 = vmatpush1.bf16.msra.mxu0 %v3853_v32 }
 0x15c   :  { %3291 = vmatpush3.bf16.msra.mxu1 %v3506_v18  ;;  %v3526_v18 = vld [vmem:[%s4567_s3 + $0x50] ss:$12 sps:$4 sm:$0xff]  }
 0x15d   :  { %3296 = vmatprep.subr.bf16.mxu1 %v3660_v48 }
 0x1fd   :  { %v891_v21 = vpop.f32.mrf.mxu0  ;;  %v932_v22 = vpop.f32.mrf.mxu1 }
 0x1fe   :  { %v938_v25 = vadd.f32 %v891_v21, %v3998_v10  ;;  %v959_v42 = vadd.f32 %v4049_v39, %v932_v22  ;;  %v4201_v21 = vld [vmem:[%s4567_s3 + $0x34] ss:$12 sps:$4 sm:$0xff]   ;;  %v4207_v22 = vld [vmem:[%s4567_s3 + $0x30] ss:$12 sps:$4 sm:$0xff]  }
 0x1ff   :  { %v893_v26 = vpop.f32.mrf.mxu0  ;;  %v3274_v28 = vpop.f32.mrf.mxu1 }
 0x200   :  { %v2942_v31 = vmul.f32 -1.442695, %v938_v25  ;;  %v945_v27 = vadd.f32 %v893_v26, %v4003_v19  ;;  %v3530_v25 = vld [vmem:[%s4567_s3 + $0x38] ss:$12 sps:$4 sm:$0xff]   ;;  %v4217_v26 = vld [vmem:[%s4567_s3 + $0x1c] ss:$12 sps:$4 sm:$0xff]  }
 0x201   :  { %v895_v32 = vpop.f32.mrf.mxu0  ;;  %v935_v34 = vpop.f32.mrf.mxu1  ;;  %v4223_v28 = vld [vmem:[%s4567_s3 + $0x18] ss:$12 sps:$4 sm:$0xff]  }
 0x202   :  { %3589 = vpow2.f32 %v2942_v31  ;;  %v2943_v35 = vmul.f32 -1.442695, %v945_v27  ;;  %v3534_v31 = vld [vmem:[%s4567_s3 + $0x20] ss:$12 sps:$4 sm:$0xff]   ;;  %v4233_v32 = vld [vmem:[%s4567_s3 + $0x4] ss:$12 sps:$4 sm:$0xff]  }
 0x203   :  { %v896_v56 = vpop.f32.mrf.mxu0  ;;  %v3275_v60 = vpop.f32.mrf.mxu1  ;;  %v4239_v34 = vld [vmem:[%s4567_s3] ss:$12 sps:$4 sm:$0xff]  }
 0x204   :  { %3591 = vpow2.f32 %v2943_v35  ;;  %v3538_v56 = vld [vmem:[%s4567_s3 + $0x8] ss:$12 sps:$4 sm:$0xff]  }
 0x20f   :  { %v3590_v37 = vpop.eup %3589 }
 0x210   :  { %v942_v12 = vadd.f32 1.0, %v3590_v37 }
 0x211   :  { %v3592_v9 = vpop.eup %3591 }
 0x212   :  { %3593 = vrcp.f32 %v942_v12  ;;  %v949_v41 = vadd.f32 1.0, %v3592_v9 }
 0x214   :  { %3595 = vrcp.f32 %v949_v41 }
 0x21f   :  { %v3594_v10 = vpop.eup %3593 }
 0x220   :  { %v960_v44 = vmul.f32 %v3594_v10, %v959_v42 }
 0x221   :  { %v3596_v47 = vpop.eup %3595 }
 0x222   :  { %v961_v46 = vadd.f32 %v960_v44, %v4036_v5  ;;  %v963_v50 = vsub.f32 1.0, %v3596_v47  ;;  %v965_v19 = vmul.f32 %v3596_v47, %v4053_v16  ;;  %v4122_v5 = vld [vmem:[%s4567_s3 + $0xac] ss:$12 sps:$4 sm:$0xff]  }
 0x223   :  { %1431 = vmatprep.subr.bf16.mxu0 %v4122_v5 }
 0x224   :  { %3597 = vtanh.f32 %v961_v46 }
 0x231   :  { %v3598_v52 = vpop.eup %3597 }
 0x232   :  { %v964_v53 = vmul.f32 %v3598_v52, %v963_v50 }
 0x234   :  { %v4112_v55 = vadd.f32 %v965_v19, %v964_v53 }
 0x236   :  { %v983_v58 = vpack.c.bf16 %v4112_v55, %v4112_v55 }
 0x238   :  { %1177 = vmatmul.mubr.bf16.vlgmr.msra.gmra.mxu0 %v983_v58  ;;  %3293 = vmatmul.mubr.bf16.vlgmr.msra.gmra.mxu1 %v983_v58 }
 0x239   :  { %1463 = vmatprep.mubr.bf16.mxu0 %v3659_v1  ;;  %3312 = vmatprep.mubr.msk.bf16.mxu1 %vm3661_vm0, %v3660_v48 }
 0x23a   :  { %1432 = vmatpush1.bf16.msra.mxu0 %v4127_v61  ;;  %3297 = vmatpush3.bf16.msra.mxu1 %v3510_v62 }
 0x23b   :  { %3298 = vmatprep.subr.bf16.mxu1 %v3660_v48  ;;  %1433 = vmatprep.subr.bf16.mxu0 %v4137_v0 }
 0x23e   :  { %1434 = vmatpush1.bf16.msra.mxu0 %v4143_v3  ;;  %3299 = vmatpush3.bf16.msra.mxu1 %v3514_v6 }
 0x23f   :  { %3300 = vmatprep.subr.bf16.mxu1 %v3660_v48  ;;  %1435 = vmatprep.subr.bf16.mxu0 %v4153_v20 }
 0x242   :  { %1436 = vmatpush1.bf16.msra.mxu0 %v4159_v4  ;;  %3301 = vmatpush3.bf16.msra.mxu1 %v3518_v7 }
 0x243   :  { %3302 = vmatprep.subr.bf16.mxu1 %v3660_v48  ;;  %1437 = vmatprep.subr.bf16.mxu0 %v4169_v8 }
 0x246   :  { %1438 = vmatpush1.bf16.msra.mxu0 %v4175_v11  ;;  %3303 = vmatpush3.bf16.msra.mxu1 %v3522_v13 }
 0x247   :  { %3304 = vmatprep.subr.bf16.mxu1 %v3660_v48  ;;  %1439 = vmatprep.subr.bf16.mxu0 %v4185_v14 }
 0x24a   :  { %1440 = vmatpush1.bf16.msra.mxu0 %v4191_v17  ;;  %3305 = vmatpush3.bf16.msra.mxu1 %v3526_v18 }
 0x24b   :  { %3306 = vmatprep.subr.bf16.mxu1 %v3660_v48  ;;  %1441 = vmatprep.subr.bf16.mxu0 %v4201_v21 }
 0x24e   :  { %1442 = vmatpush1.bf16.msra.mxu0 %v4207_v22  ;;  %3307 = vmatpush3.bf16.msra.mxu1 %v3530_v25 }
 0x24f   :  { %3308 = vmatprep.subr.bf16.mxu1 %v3660_v48  ;;  %1443 = vmatprep.subr.bf16.mxu0 %v4217_v26 }
 0x252   :  { %1444 = vmatpush1.bf16.msra.mxu0 %v4223_v28  ;;  %3309 = vmatpush3.bf16.msra.mxu1 %v3534_v31 }
 0x253   :  { %3310 = vmatprep.subr.bf16.mxu1 %v3660_v48  ;;  %1445 = vmatprep.subr.bf16.mxu0 %v4233_v32 }
 0x256   :  { %1446 = vmatpush1.bf16.msra.mxu0 %v4239_v34  ;;  %3311 = vmatpush3.bf16.msra.mxu1 %v3538_v56 }
 0x257   :  { %1718 = vmatprep.subr.bf16.mxu0 %v4122_v5  ;;  %3316 = vmatprep.subr.bf16.mxu1 %v3660_v48 }
 0x2f8   :  { %v1178_v60 = vpop.f32.mrf.mxu0  ;;  %v1219_v27 = vpop.f32.mrf.mxu1 }
 0x2f9   :  { %v1225_v35 = vadd.f32 %v1178_v60, %v4005_v24  ;;  %v1246_v58 = vadd.f32 %v4049_v39, %v1219_v27  ;;  %v3540_v60 = vld [vmem:[%s4567_s3 + $0x98] ss:$12 sps:$4 sm:$0xff]   ;;  %v3541_v27 = vld [vmem:[%s4567_s3 + $0x80] ss:$12 sps:$4 sm:$0xff]  }
 0x2fa   :  { %v1180_v37 = vpop.f32.mrf.mxu0  ;;  %v3294_v12 = vpop.f32.mrf.mxu1 }
 0x2fb   :  { %v2969_v9 = vmul.f32 -1.442695, %v1225_v35  ;;  %v1232_v46 = vadd.f32 %v1180_v37, %v4007_v29  ;;  %v3542_v35 = vld [vmem:[%s4567_s3 + $0x68] ss:$12 sps:$4 sm:$0xff]   ;;  %v3543_v37 = vld [vmem:[%s4567_s3 + $0x50] ss:$12 sps:$4 sm:$0xff]  }
 0x2fc   :  { %v1182_v41 = vpop.f32.mrf.mxu0  ;;  %v1222_v42 = vpop.f32.mrf.mxu1  ;;  %v3544_v12 = vld [vmem:[%s4567_s3 + $0x38] ss:$12 sps:$4 sm:$0xff]  }
 0x2fd   :  { %3599 = vpow2.f32 %v2969_v9  ;;  %v2970_v47 = vmul.f32 -1.442695, %v1232_v46  ;;  %v3545_v9 = vld [vmem:[%s4567_s3 + $0x20] ss:$12 sps:$4 sm:$0xff]   ;;  %v3546_v41 = vld [vmem:[%s4567_s3 + $0x8] ss:$12 sps:$4 sm:$0xff]  }
 0x2fe   :  { %v1183_v10 = vpop.f32.mrf.mxu0  ;;  %v3295_v44 = vpop.f32.mrf.mxu1 }
 0x2ff   :  { %3601 = vpow2.f32 %v2970_v47 }
 0x30a   :  { %v3600_v50 = vpop.eup %3599 }
 0x30b   :  { %v1229_v52 = vadd.f32 1.0, %v3600_v50 }
 0x30c   :  { %v3602_v53 = vpop.eup %3601 }
 0x30d   :  { %3603 = vrcp.f32 %v1229_v52  ;;  %v1236_v19 = vadd.f32 1.0, %v3602_v53 }
 0x30f   :  { %3605 = vrcp.f32 %v1236_v19 }
 0x31a   :  { %v3604_v24 = vpop.eup %3603 }
 0x31b   :  { %v1247_v62 = vmul.f32 %v3604_v24, %v1246_v58 }
 0x31c   :  { %v3606_v7 = vpop.eup %3605 }
 0x31d   :  { %v1248_v6 = vadd.f32 %v1247_v62, %v4032_v59  ;;  %v1250_v13 = vsub.f32 1.0, %v3606_v7  ;;  %v1252_v29 = vmul.f32 %v3606_v7, %v4112_v55  ;;  %v3539_v59 = vld [vmem:[%s4567_s3 + $0xb0] ss:$12 sps:$4 sm:$0xff]  }
 0x31f   :  { %3607 = vtanh.f32 %v1248_v6 }
 0x32c   :  { %v3608_v18 = vpop.eup %3607 }
 0x32d   :  { %v1251_v25 = vmul.f32 %v3608_v18, %v1250_v13 }
 0x32f   :  { %v4253_v31 = vadd.f32 %v1252_v29, %v1251_v25 }
 0x331   :  { %v1270_v56 = vpack.c.bf16 %v4253_v31, %v4253_v31 }
 0x333   :  { %1464 = vmatmul.mubr.bf16.vlgmr.msra.gmra.mxu0 %v1270_v56  ;;  %3313 = vmatmul.mubr.bf16.vlgmr.msra.gmra.mxu1 %v1270_v56 }
 0x334   :  { %1719 = vmatpush1.bf16.msra.mxu0 %v4127_v61  ;;  %1750 = vmatprep.mubr.bf16.mxu0 %v3659_v1 }
 0x335   :  { %1720 = vmatprep.subr.bf16.mxu0 %v4137_v0  ;;  %3332 = vmatprep.mubr.msk.bf16.mxu1 %vm3661_vm0, %v3660_v48 }
 0x336   :  { %3317 = vmatpush3.bf16.msra.mxu1 %v3539_v59 }
 0x337   :  { %3318 = vmatprep.subr.bf16.mxu1 %v3660_v48 }
 0x338   :  { %1721 = vmatpush1.bf16.msra.mxu0 %v4143_v3 }
 0x339   :  { %1722 = vmatprep.subr.bf16.mxu0 %v4153_v20 }
 0x33a   :  { %3319 = vmatpush3.bf16.msra.mxu1 %v3540_v60 }
 0x33b   :  { %3320 = vmatprep.subr.bf16.mxu1 %v3660_v48 }
 0x33c   :  { %1723 = vmatpush1.bf16.msra.mxu0 %v4159_v4 }
 0x33d   :  { %1724 = vmatprep.subr.bf16.mxu0 %v4169_v8 }
 0x33e   :  { %3321 = vmatpush3.bf16.msra.mxu1 %v3541_v27 }
 0x33f   :  { %3322 = vmatprep.subr.bf16.mxu1 %v3660_v48 }
 0x340   :  { %1725 = vmatpush1.bf16.msra.mxu0 %v4175_v11 }
 0x341   :  { %1726 = vmatprep.subr.bf16.mxu0 %v4185_v14 }
 0x342   :  { %3323 = vmatpush3.bf16.msra.mxu1 %v3542_v35 }
 0x343   :  { %3324 = vmatprep.subr.bf16.mxu1 %v3660_v48 }
 0x344   :  { %1727 = vmatpush1.bf16.msra.mxu0 %v4191_v17 }
 0x345   :  { %1728 = vmatprep.subr.bf16.mxu0 %v4201_v21 }
 0x346   :  { %3325 = vmatpush3.bf16.msra.mxu1 %v3543_v37 }
 0x347   :  { %3326 = vmatprep.subr.bf16.mxu1 %v3660_v48 }
 0x348   :  { %1729 = vmatpush1.bf16.msra.mxu0 %v4207_v22 }
 0x349   :  { %1730 = vmatprep.subr.bf16.mxu0 %v4217_v26 }
 0x34a   :  { %3327 = vmatpush3.bf16.msra.mxu1 %v3544_v12 }
 0x34b   :  { %3328 = vmatprep.subr.bf16.mxu1 %v3660_v48 }
 0x34c   :  { %1731 = vmatpush1.bf16.msra.mxu0 %v4223_v28 }
 0x34d   :  { %1732 = vmatprep.subr.bf16.mxu0 %v4233_v32 }
 0x34e   :  { %3329 = vmatpush3.bf16.msra.mxu1 %v3545_v9  ;;  %v3548_v9 = vld [vmem:[%s4567_s3 + $0x98] ss:$12 sps:$4 sm:$0xff]  }
 0x34f   :  { %3330 = vmatprep.subr.bf16.mxu1 %v3660_v48 }
 0x350   :  { %1733 = vmatpush1.bf16.msra.mxu0 %v4239_v34 }
 0x351   :  { %2005 = vmatprep.subr.bf16.mxu0 %v4122_v5 }
 0x352   :  { %3331 = vmatpush3.bf16.msra.mxu1 %v3546_v41  ;;  %v3549_v41 = vld [vmem:[%s4567_s3 + $0x80] ss:$12 sps:$4 sm:$0xff]  }
 0x353   :  { %3336 = vmatprep.subr.bf16.mxu1 %v3660_v48 }
 0x3f3   :  { %v1465_v42 = vpop.f32.mrf.mxu0  ;;  %v1506_v10 = vpop.f32.mrf.mxu1 }
 0x3f4   :  { %v1512_v44 = vadd.f32 %v1465_v42, %v4009_v33  ;;  %v1533_v25 = vadd.f32 %v4049_v39, %v1506_v10  ;;  %v3550_v42 = vld [vmem:[%s4567_s3 + $0x68] ss:$12 sps:$4 sm:$0xff]   ;;  %v3551_v10 = vld [vmem:[%s4567_s3 + $0x50] ss:$12 sps:$4 sm:$0xff]  }
 0x3f5   :  { %v1467_v46 = vpop.f32.mrf.mxu0  ;;  %v3314_v47 = vpop.f32.mrf.mxu1 }
 0x3f6   :  { %v2996_v50 = vmul.f32 -1.442695, %v1512_v44  ;;  %v1519_v24 = vadd.f32 %v1467_v46, %v4011_v36  ;;  %v3552_v44 = vld [vmem:[%s4567_s3 + $0x38] ss:$12 sps:$4 sm:$0xff]   ;;  %v3553_v46 = vld [vmem:[%s4567_s3 + $0x20] ss:$12 sps:$4 sm:$0xff]  }
 0x3f7   :  { %v1469_v52 = vpop.f32.mrf.mxu0  ;;  %v1509_v53 = vpop.f32.mrf.mxu1  ;;  %v3554_v47 = vld [vmem:[%s4567_s3 + $0x8] ss:$12 sps:$4 sm:$0xff]  }
 0x3f8   :  { %3609 = vpow2.f32 %v2996_v50  ;;  %v2997_v62 = vmul.f32 -1.442695, %v1519_v24 }
 0x3f9   :  { %v1470_v19 = vpop.f32.mrf.mxu0  ;;  %v3315_v58 = vpop.f32.mrf.mxu1 }
 0x3fa   :  { %3611 = vpow2.f32 %v2997_v62 }
 0x405   :  { %v3610_v6 = vpop.eup %3609 }
 0x406   :  { %v1516_v7 = vadd.f32 1.0, %v3610_v6 }
 0x407   :  { %v3612_v13 = vpop.eup %3611 }
 0x408   :  { %3613 = vrcp.f32 %v1516_v7  ;;  %v1523_v18 = vadd.f32 1.0, %v3612_v13 }
 0x40a   :  { %3615 = vrcp.f32 %v1523_v18 }
 0x415   :  { %v3614_v33 = vpop.eup %3613 }
 0x416   :  { %v1534_v29 = vmul.f32 %v3614_v33, %v1533_v25 }
 0x417   :  { %v3616_v59 = vpop.eup %3615 }
 0x418   :  { %v1535_v56 = vadd.f32 %v1534_v29, %v4034_v63  ;;  %v1537_v60 = vsub.f32 1.0, %v3616_v59  ;;  %v1539_v36 = vmul.f32 %v3616_v59, %v4253_v31  ;;  %v3547_v63 = vld [vmem:[%s4567_s3 + $0xb0] ss:$12 sps:$4 sm:$0xff]  }
 0x41a   :  { %3617 = vtanh.f32 %v1535_v56 }
 0x427   :  { %v3618_v27 = vpop.eup %3617 }
 0x428   :  { %v1538_v35 = vmul.f32 %v3618_v27, %v1537_v60 }
 0x42a   :  { %v4313_v37 = vadd.f32 %v1539_v36, %v1538_v35 }
 0x42c   :  { %v1557_v12 = vpack.c.bf16 %v4313_v37, %v4313_v37 }
 0x42e   :  { %1751 = vmatmul.mubr.bf16.vlgmr.msra.gmra.mxu0 %v1557_v12  ;;  %3333 = vmatmul.mubr.bf16.vlgmr.msra.gmra.mxu1 %v1557_v12 }
 0x42f   :  { %2006 = vmatpush1.bf16.msra.mxu0 %v4127_v61  ;;  %2037 = vmatprep.mubr.bf16.mxu0 %v3659_v1 }
 0x430   :  { %2007 = vmatprep.subr.bf16.mxu0 %v4137_v0  ;;  %3352 = vmatprep.mubr.msk.bf16.mxu1 %vm3661_vm0, %v3660_v48 }
 0x431   :  { %3337 = vmatpush3.bf16.msra.mxu1 %v3547_v63 }
 0x432   :  { %3338 = vmatprep.subr.bf16.mxu1 %v3660_v48 }
 0x433   :  { %2008 = vmatpush1.bf16.msra.mxu0 %v4143_v3 }
 0x434   :  { %2009 = vmatprep.subr.bf16.mxu0 %v4153_v20 }
 0x435   :  { %3339 = vmatpush3.bf16.msra.mxu1 %v3548_v9 }
 0x436   :  { %3340 = vmatprep.subr.bf16.mxu1 %v3660_v48 }
 0x437   :  { %2010 = vmatpush1.bf16.msra.mxu0 %v4159_v4 }
 0x438   :  { %2011 = vmatprep.subr.bf16.mxu0 %v4169_v8 }
 0x439   :  { %3341 = vmatpush3.bf16.msra.mxu1 %v3549_v41 }
 0x43a   :  { %3342 = vmatprep.subr.bf16.mxu1 %v3660_v48 }
 0x43b   :  { %2012 = vmatpush1.bf16.msra.mxu0 %v4175_v11 }
 0x43c   :  { %2013 = vmatprep.subr.bf16.mxu0 %v4185_v14 }
 0x43d   :  { %3343 = vmatpush3.bf16.msra.mxu1 %v3550_v42 }
 0x43e   :  { %3344 = vmatprep.subr.bf16.mxu1 %v3660_v48 }
 0x43f   :  { %2014 = vmatpush1.bf16.msra.mxu0 %v4191_v17 }
 0x440   :  { %2015 = vmatprep.subr.bf16.mxu0 %v4201_v21 }
 0x441   :  { %3345 = vmatpush3.bf16.msra.mxu1 %v3551_v10  ;;  %v3557_v10 = vld [vmem:[%s4567_s3 + $0x80] ss:$12 sps:$4 sm:$0xff]  }
 0x442   :  { %3346 = vmatprep.subr.bf16.mxu1 %v3660_v48 }
 0x443   :  { %2016 = vmatpush1.bf16.msra.mxu0 %v4207_v22 }
 0x444   :  { %2017 = vmatprep.subr.bf16.mxu0 %v4217_v26 }
 0x445   :  { %3347 = vmatpush3.bf16.msra.mxu1 %v3552_v44  ;;  %v3559_v44 = vld [vmem:[%s4567_s3 + $0x50] ss:$12 sps:$4 sm:$0xff]  }
 0x446   :  { %3348 = vmatprep.subr.bf16.mxu1 %v3660_v48 }
 0x447   :  { %2018 = vmatpush1.bf16.msra.mxu0 %v4223_v28 }
 0x448   :  { %2019 = vmatprep.subr.bf16.mxu0 %v4233_v32 }
 0x449   :  { %3349 = vmatpush3.bf16.msra.mxu1 %v3553_v46  ;;  %v3560_v46 = vld [vmem:[%s4567_s3 + $0x38] ss:$12 sps:$4 sm:$0xff]  }
 0x44a   :  { %3350 = vmatprep.subr.bf16.mxu1 %v3660_v48 }
 0x44b   :  { %2020 = vmatpush1.bf16.msra.mxu0 %v4239_v34 }
 0x44c   :  { %2292 = vmatprep.subr.bf16.mxu0 %v4122_v5 }
 0x44d   :  { %3351 = vmatpush3.bf16.msra.mxu1 %v3554_v47  ;;  %v3561_v47 = vld [vmem:[%s4567_s3 + $0x20] ss:$12 sps:$4 sm:$0xff]  }
 0x44e   :  { %3356 = vmatprep.subr.bf16.mxu1 %v3660_v48 }
 0x4ee   :  { %v1752_v50 = vpop.f32.mrf.mxu0  ;;  %v1793_v52 = vpop.f32.mrf.mxu1 }
 0x4ef   :  { %v1799_v53 = vadd.f32 %v1752_v50, %v4013_v38  ;;  %v1820_v60 = vadd.f32 %v4049_v39, %v1793_v52  ;;  %v3556_v39 = vld [vmem:[%s4567_s3 + $0x98] ss:$12 sps:$4 sm:$0xff]   ;;  %v3562_v50 = vld [vmem:[%s4567_s3 + $0x8] ss:$12 sps:$4 sm:$0xff]  }
 0x4f0   :  { %v1754_v19 = vpop.f32.mrf.mxu0  ;;  %v3334_v58 = vpop.f32.mrf.mxu1 }
 0x4f1   :  { %v3023_v24 = vmul.f32 -1.442695, %v1799_v53  ;;  %v1806_v18 = vadd.f32 %v1754_v19, %v4015_v40 }
 0x4f2   :  { %v1756_v62 = vpop.f32.mrf.mxu0  ;;  %v1796_v6 = vpop.f32.mrf.mxu1 }
 0x4f3   :  { %3619 = vpow2.f32 %v3023_v24  ;;  %v3024_v25 = vmul.f32 -1.442695, %v1806_v18 }
 0x4f4   :  { %v1757_v7 = vpop.f32.mrf.mxu0  ;;  %v3335_v13 = vpop.f32.mrf.mxu1 }
 0x4f5   :  { %3621 = vpow2.f32 %v3024_v25 }
 0x500   :  { %v3620_v33 = vpop.eup %3619 }
 0x501   :  { %v1803_v29 = vadd.f32 1.0, %v3620_v33 }
 0x502   :  { %v3622_v56 = vpop.eup %3621 }
 0x503   :  { %3623 = vrcp.f32 %v1803_v29  ;;  %v1810_v59 = vadd.f32 1.0, %v3622_v56 }
 0x505   :  { %3625 = vrcp.f32 %v1810_v59 }
 0x510   :  { %v3624_v38 = vpop.eup %3623 }
 0x511   :  { %v1821_v27 = vmul.f32 %v3624_v38, %v1820_v60 }
 0x512   :  { %v3626_v36 = vpop.eup %3625 }
 0x513   :  { %v1822_v35 = vadd.f32 %v1821_v27, %v4040_v23  ;;  %v1824_v12 = vsub.f32 1.0, %v3626_v36  ;;  %v1826_v40 = vmul.f32 %v3626_v36, %v4313_v37  ;;  %v3555_v23 = vld [vmem:[%s4567_s3 + $0xb0] ss:$12 sps:$4 sm:$0xff]  }
 0x515   :  { %3627 = vtanh.f32 %v1822_v35 }
 0x522   :  { %v3628_v63 = vpop.eup %3627 }
 0x523   :  { %v1825_v9 = vmul.f32 %v3628_v63, %v1824_v12 }
 0x525   :  { %v4373_v41 = vadd.f32 %v1826_v40, %v1825_v9 }
 0x527   :  { %v1844_v42 = vpack.c.bf16 %v4373_v41, %v4373_v41 }
 0x529   :  { %2038 = vmatmul.mubr.bf16.vlgmr.msra.gmra.mxu0 %v1844_v42  ;;  %3353 = vmatmul.mubr.bf16.vlgmr.msra.gmra.mxu1 %v1844_v42 }
 0x52a   :  { %2293 = vmatpush1.bf16.msra.mxu0 %v4127_v61  ;;  %2324 = vmatprep.mubr.bf16.mxu0 %v3659_v1 }
 0x52b   :  { %2294 = vmatprep.subr.bf16.mxu0 %v4137_v0  ;;  %3372 = vmatprep.mubr.msk.bf16.mxu1 %vm3661_vm0, %v3660_v48 }
 0x52c   :  { %3357 = vmatpush3.bf16.msra.mxu1 %v3555_v23 }
 0x52d   :  { %3358 = vmatprep.subr.bf16.mxu1 %v3660_v48 }
 0x52e   :  { %2295 = vmatpush1.bf16.msra.mxu0 %v4143_v3 }
 0x52f   :  { %2296 = vmatprep.subr.bf16.mxu0 %v4153_v20 }
 0x530   :  { %3359 = vmatpush3.bf16.msra.mxu1 %v3556_v39 }
 0x531   :  { %3360 = vmatprep.subr.bf16.mxu1 %v3660_v48 }
 0x532   :  { %2297 = vmatpush1.bf16.msra.mxu0 %v4159_v4 }
 0x533   :  { %2298 = vmatprep.subr.bf16.mxu0 %v4169_v8 }
 0x534   :  { %3361 = vmatpush3.bf16.msra.mxu1 %v3557_v10 }
 0x535   :  { %3362 = vmatprep.subr.bf16.mxu1 %v3660_v48 }
 0x536   :  { %2299 = vmatpush1.bf16.msra.mxu0 %v4175_v11 }
 0x537   :  { %2300 = vmatprep.subr.bf16.mxu0 %v4185_v14 }
 0x53a   :  { %2301 = vmatpush1.bf16.msra.mxu0 %v4191_v17 }
 0x53b   :  { %2302 = vmatprep.subr.bf16.mxu0 %v4201_v21 }
 0x53e   :  { %2303 = vmatpush1.bf16.msra.mxu0 %v4207_v22 }
 0x53f   :  { %2304 = vmatprep.subr.bf16.mxu0 %v4217_v26 }
 0x542   :  { %2305 = vmatpush1.bf16.msra.mxu0 %v4223_v28 }
 0x543   :  { %2306 = vmatprep.subr.bf16.mxu0 %v4233_v32 }
 0x546   :  { %2307 = vmatpush1.bf16.msra.mxu0 %v4239_v34 }
 0x547   :  { %2579 = vmatprep.subr.bf16.mxu0 %v4122_v5  ;;  %v3558_v5 = vld [vmem:[%s4567_s3 + $0x68] ss:$12 sps:$4 sm:$0xff]  }
 0x548   :  { %3363 = vmatpush3.bf16.msra.mxu1 %v3558_v5 }
 0x549   :  { %3364 = vmatprep.subr.bf16.mxu1 %v3660_v48 }
 0x54c   :  { %3365 = vmatpush3.bf16.msra.mxu1 %v3559_v44 }
 0x54d   :  { %3366 = vmatprep.subr.bf16.mxu1 %v3660_v48 }
 0x550   :  { %3367 = vmatpush3.bf16.msra.mxu1 %v3560_v46 }
 0x551   :  { %3368 = vmatprep.subr.bf16.mxu1 %v3660_v48 }
 0x554   :  { %3369 = vmatpush3.bf16.msra.mxu1 %v3561_v47 }
 0x555   :  { %3370 = vmatprep.subr.bf16.mxu1 %v3660_v48 }
 0x558   :  { %3371 = vmatpush3.bf16.msra.mxu1 %v3562_v50 }
 0x559   :  { %3376 = vmatprep.subr.bf16.mxu1 %v3660_v48 }
 0x5e9   :  { %v2039_v52 = vpop.f32.mrf.mxu0  ;;  %v2080_v53 = vpop.f32.mrf.mxu1 }
 0x5ea   :  { %v2086_v19 = vadd.f32 %v2039_v52, %v4017_v43  ;;  %v4433_v43 = vld [vmem:[%s4571_s4] ss:$0 sm:$0xff] }
 0x5eb   :  { %v2041_v58 = vpop.f32.mrf.mxu0  ;;  %v3354_v24 = vpop.f32.mrf.mxu1  ;;  %v2107_v38 = vadd.f32 %v4433_v43, %v2080_v53 }
 0x5ec   :  { %v3050_v62 = vmul.f32 -1.442695, %v2086_v19  ;;  %v2093_v25 = vadd.f32 %v2041_v58, %v4019_v45 }
 0x5ed   :  { %v2043_v6 = vpop.f32.mrf.mxu0  ;;  %v2083_v7 = vpop.f32.mrf.mxu1 }
 0x5ee   :  { %3629 = vpow2.f32 %v3050_v62  ;;  %v3051_v33 = vmul.f32 -1.442695, %v2093_v25  ;;  %v2700_v25 = vpack.c.bf16 %v4112_v55, %v4053_v16  ;;  %v3575_v16 = vld [vmem:[%s4572_s6 + $0x18] sm:$0xff]   ;;  %v3576_v55 = vld [vmem:[%s4572_s6 + $0x10] sm:$0xff]  }
 0x5ef   :  { %v2044_v13 = vpop.f32.mrf.mxu0  ;;  %v3355_v18 = vpop.f32.mrf.mxu1 }
 0x5f0   :  { %3631 = vpow2.f32 %v3051_v33  ;;  %v3572_v18 = vld [vmem:[%s4572_s6 + $0x30] sm:$0xff]   ;;  %v3574_v33 = vld [vmem:[%s4572_s6 + $0x20] sm:$0xff]  }
 0x5fb   :  { %v3630_v29 = vpop.eup %3629 }
 0x5fc   :  { %v2090_v56 = vadd.f32 1.0, %v3630_v29  ;;  %v3577_v29 = vld [vmem:[%s4572_s6 + $0x8] sm:$0xff]  }
 0x5fd   :  { %v3632_v59 = vpop.eup %3631 }
 0x5fe   :  { %3633 = vrcp.f32 %v2090_v56  ;;  %v2097_v60 = vadd.f32 1.0, %v3632_v59  ;;  %v3578_v56 = vld [vmem:[%s4572_s6] sm:$0xff]   ;;  %v2701_v59 = vpack.c.bf16 %v4313_v37, %v4253_v31 }
 0x600   :  { %3635 = vrcp.f32 %v2097_v60 }
 0x60b   :  { %v3634_v27 = vpop.eup %3633 }
 0x60c   :  { %v2108_v35 = vmul.f32 %v3634_v27, %v2107_v38 }
 0x60d   :  { %v3636_v45 = vpop.eup %3635 }
 0x60e   :  { %v2109_v36 = vadd.f32 %v2108_v35, %v4044_v2  ;;  %v2111_v12 = vsub.f32 1.0, %v3636_v45  ;;  %v2113_v40 = vmul.f32 %v3636_v45, %v4373_v41  ;;  %v3564_v2 = vld [vmem:[%s4567_s3 + $0x98] ss:$12 sps:$4 sm:$0xff]  }
 0x610   :  { %3637 = vtanh.f32 %v2109_v36 }
 0x61d   :  { %v3638_v63 = vpop.eup %3637 }
 0x61e   :  { %v2112_v9 = vmul.f32 %v3638_v63, %v2111_v12 }
 0x620   :  { %v4438_v42 = vadd.f32 %v2113_v40, %v2112_v9 }
 0x622   :  { %v2131_v23 = vpack.c.bf16 %v4438_v42, %v4438_v42  ;;  %v2702_v60 = vpack.c.bf16 %v4438_v42, %v4373_v41 }
 0x624   :  { %2325 = vmatmul.mubr.bf16.vlgmr.msra.gmra.mxu0 %v2131_v23  ;;  %3373 = vmatmul.mubr.bf16.vlgmr.msra.gmra.mxu1 %v2131_v23 }
 0x625   :  { %2580 = vmatpush1.bf16.msra.mxu0 %v4127_v61  ;;  %2611 = vmatprep.mubr.bf16.mxu0 %v3659_v1  ;;  %v3563_v1 = vld [vmem:[%s4567_s3 + $0xb0] ss:$12 sps:$4 sm:$0xff]   ;;  %v3565_v61 = vld [vmem:[%s4567_s3 + $0x80] ss:$12 sps:$4 sm:$0xff]  }
 0x626   :  { %2581 = vmatprep.subr.bf16.mxu0 %v4137_v0  ;;  %3392 = vmatprep.mubr.msk.bf16.mxu1 %vm3661_vm0, %v3660_v48  ;;  %v3566_v0 = vld [vmem:[%s4567_s3 + $0x68] ss:$12 sps:$4 sm:$0xff]  }
 0x627   :  { %3377 = vmatpush3.bf16.msra.mxu1 %v3563_v1 }
 0x628   :  { %3378 = vmatprep.subr.bf16.mxu1 %v3660_v48 }
 0x629   :  { %2582 = vmatpush1.bf16.msra.mxu0 %v4143_v3  ;;  %v3567_v3 = vld [vmem:[%s4567_s3 + $0x50] ss:$12 sps:$4 sm:$0xff]  }
 0x62a   :  { %2583 = vmatprep.subr.bf16.mxu0 %v4153_v20  ;;  %v3568_v20 = vld [vmem:[%s4567_s3 + $0x38] ss:$12 sps:$4 sm:$0xff]  }
 0x62b   :  { %3379 = vmatpush3.bf16.msra.mxu1 %v3564_v2 }
 0x62c   :  { %3380 = vmatprep.subr.bf16.mxu1 %v3660_v48 }
 0x62d   :  { %2584 = vmatpush1.bf16.msra.mxu0 %v4159_v4  ;;  %v3569_v4 = vld [vmem:[%s4567_s3 + $0x20] ss:$12 sps:$4 sm:$0xff]  }
 0x62e   :  { %2585 = vmatprep.subr.bf16.mxu0 %v4169_v8  ;;  %v3570_v8 = vld [vmem:[%s4567_s3 + $0x8] ss:$12 sps:$4 sm:$0xff]  }
 0x62f   :  { %3381 = vmatpush3.bf16.msra.mxu1 %v3565_v61 }
 0x630   :  { %3382 = vmatprep.subr.bf16.mxu1 %v3660_v48 }
 0x631   :  { %2586 = vmatpush1.bf16.msra.mxu0 %v4175_v11  ;;  %v3571_v11 = vld [vmem:[%s4572_s6 + $0x38] sm:$0xff]  }
 0x632   :  { %2587 = vmatprep.subr.bf16.mxu0 %v4185_v14 }
 0x633   :  { %3383 = vmatpush3.bf16.msra.mxu1 %v3566_v0 }
 0x634   :  { %3384 = vmatprep.subr.bf16.mxu1 %v3660_v48 }
 0x635   :  { %2588 = vmatpush1.bf16.msra.mxu0 %v4191_v17 }
 0x636   :  { %2589 = vmatprep.subr.bf16.mxu0 %v4201_v21 }
 0x637   :  { %3385 = vmatpush3.bf16.msra.mxu1 %v3567_v3 }
 0x638   :  { %3386 = vmatprep.subr.bf16.mxu1 %v3660_v48 }
 0x639   :  { %2590 = vmatpush1.bf16.msra.mxu0 %v4207_v22 }
 0x63a   :  { %2591 = vmatprep.subr.bf16.mxu0 %v4217_v26 }
 0x63b   :  { %3387 = vmatpush3.bf16.msra.mxu1 %v3568_v20 }
 0x63c   :  { %3388 = vmatprep.subr.bf16.mxu1 %v3660_v48 }
 0x63d   :  { %2592 = vmatpush1.bf16.msra.mxu0 %v4223_v28 }
 0x63e   :  { %2593 = vmatprep.subr.bf16.mxu0 %v4233_v32 }
 0x63f   :  { %3389 = vmatpush3.bf16.msra.mxu1 %v3569_v4 }
 0x640   :  { %3390 = vmatprep.subr.bf16.mxu1 %v3660_v48 }
 0x641   :  { %2594 = vmatpush1.bf16.msra.mxu0 %v4239_v34 }
 0x642   :  { %3396 = vmatprep.subr.bf16.mxu0 %v3571_v11 }
 0x643   :  { %3391 = vmatpush3.bf16.msra.mxu1 %v3570_v8 }
 0x6e4   :  { %v2326_v14 = vpop.f32.mrf.mxu0  ;;  %v2367_v17 = vpop.f32.mrf.mxu1 }
 0x6e5   :  { %v2373_v21 = vadd.f32 %v2326_v14, %v4021_v49  ;;  %v2394_v52 = vadd.f32 %v4433_v43, %v2367_v17 }
 0x6e6   :  { %v2328_v22 = vpop.f32.mrf.mxu0  ;;  %v3374_v26 = vpop.f32.mrf.mxu1 }
 0x6e7   :  { %v3077_v28 = vmul.f32 -1.442695, %v2373_v21  ;;  %v2380_v10 = vadd.f32 %v2328_v22, %v4023_v51 }
 0x6e8   :  { %v2330_v32 = vpop.f32.mrf.mxu0  ;;  %v2370_v34 = vpop.f32.mrf.mxu1 }
 0x6e9   :  { %3639 = vpow2.f32 %v3077_v28  ;;  %v3078_v5 = vmul.f32 -1.442695, %v2380_v10 }
 0x6ea   :  { %v2331_v48 = vpop.f32.mrf.mxu0  ;;  %v3375_v39 = vpop.f32.mrf.mxu1 }
 0x6eb   :  { %3641 = vpow2.f32 %v3078_v5 }
 0x6f6   :  { %v3640_v44 = vpop.eup %3639 }
 0x6f7   :  { %v2377_v46 = vadd.f32 1.0, %v3640_v44 }
 0x6f8   :  { %v3642_v47 = vpop.eup %3641 }
 0x6f9   :  { %3643 = vrcp.f32 %v2377_v46  ;;  %v2384_v50 = vadd.f32 1.0, %v3642_v47 }
 0x6fb   :  { %3645 = vrcp.f32 %v2384_v50 }
 0x706   :  { %v3644_v49 = vpop.eup %3643 }
 0x707   :  { %v2395_v53 = vmul.f32 %v3644_v49, %v2394_v52 }
 0x708   :  { %v3646_v58 = vpop.eup %3645 }
 0x709   :  { %v2396_v19 = vadd.f32 %v2395_v53, %v4038_v15  ;;  %v2398_v24 = vsub.f32 1.0, %v3646_v58  ;;  %v2400_v51 = vmul.f32 %v3646_v58, %v4438_v42  ;;  %v3573_v15 = vld [vmem:[%s4572_s6 + $0x28] sm:$0xff]  }
 0x70b   :  { %3647 = vtanh.f32 %v2396_v19 }
 0x718   :  { %v3648_v62 = vpop.eup %3647 }
 0x719   :  { %v2399_v6 = vmul.f32 %v3648_v62, %v2398_v24 }
 0x71b   :  { %v4499_v7 = vadd.f32 %v2400_v51, %v2399_v6 }
 0x71d   :  { %v2418_v13 = vpack.c.bf16 %v4499_v7, %v4499_v7 }
 0x71f   :  { %2612 = vmatmul.mubr.bf16.vlgmr.msra.gmra.mxu0 %v2418_v13  ;;  %3393 = vmatmul.mubr.bf16.vlgmr.msra.gmra.mxu1 %v2418_v13 }
 0x720   :  { %3397 = vmatpush3.bf16.msra.mxu0 %v3571_v11  ;;  %3412 = vmatprep.mubr.bf16.mxu0 %v2700_v25 }
 0x721   :  { %3398 = vmatprep.subr.bf16.mxu0 %v3572_v18 }
 0x724   :  { %3399 = vmatpush3.bf16.msra.mxu0 %v3572_v18 }
 0x725   :  { %3400 = vmatprep.subr.bf16.mxu0 %v3573_v15 }
 0x728   :  { %3401 = vmatpush3.bf16.msra.mxu0 %v3573_v15 }
 0x729   :  { %3402 = vmatprep.subr.bf16.mxu0 %v3574_v33 }
 0x72c   :  { %3403 = vmatpush3.bf16.msra.mxu0 %v3574_v33 }
 0x72d   :  { %3404 = vmatprep.subr.bf16.mxu0 %v3575_v16 }
 0x730   :  { %3405 = vmatpush3.bf16.msra.mxu0 %v3575_v16 }
 0x731   :  { %3406 = vmatprep.subr.bf16.mxu0 %v3576_v55 }
 0x734   :  { %3407 = vmatpush3.bf16.msra.mxu0 %v3576_v55 }
 0x735   :  { %3408 = vmatprep.subr.bf16.mxu0 %v3577_v29 }
 0x738   :  { %3409 = vmatpush3.bf16.msra.mxu0 %v3577_v29 }
 0x739   :  { %3410 = vmatprep.subr.bf16.mxu0 %v3578_v56 }
 0x73c   :  { %3411 = vmatpush3.bf16.msra.mxu0 %v3578_v56 }
 0x73f   :  { %3413 = vmatmul.mubr.bf16.vlgmr.msra.gmra.mxu0 %v2701_v59 }
 0x740   :  { %3416 = vmatprep.mubr.bf16.mxu0 %v2702_v60 }
 0x7df   :  { %v2613_v38 = vpop.f32.mrf.mxu0  ;;  %v2654_v27 = vpop.f32.mrf.mxu1 }
 0x7e0   :  { %v2660_v35 = vadd.f32 %v2613_v38, %v4025_v54  ;;  %v3107_v54 = vld [vmem:[%s4573_s7] ss:$0 sm:$0xff]  ;;  %v2681_v0 = vadd.f32 %v4433_v43, %v2654_v27 }
 0x7e1   :  { %v2615_v36 = vpop.f32.mrf.mxu0  ;;  %v3394_v45 = vpop.f32.mrf.mxu1 }
 0x7e2   :  { %v3104_v12 = vmul.f32 -1.442695, %v2660_v35  ;;  %v2667_v1 = vadd.f32 %v2615_v36, %v4030_v57 }
 0x7e3   :  { %v2617_v63 = vpop.f32.mrf.mxu0  ;;  %v2657_v9 = vpop.f32.mrf.mxu1 }
 0x7e4   :  { %3649 = vpow2.f32 %v3104_v12  ;;  %v3105_v31 = vmul.f32 -1.442695, %v2667_v1 }
 0x7e5   :  { %v2618_v40 = vpop.f32.mrf.mxu0  ;;  %v3395_v23 = vpop.f32.mrf.mxu1 }
 0x7e6   :  { %3651 = vpow2.f32 %v3105_v31 }
 0x7f1   :  { %v3650_v37 = vpop.eup %3649 }
 0x7f2   :  { %v2664_v41 = vadd.f32 1.0, %v3650_v37 }
 0x7f3   :  { %v3652_v42 = vpop.eup %3651 }
 0x7f4   :  { %3653 = vrcp.f32 %v2664_v41  ;;  %v2671_v2 = vadd.f32 1.0, %v3652_v42 }
 0x7f6   :  { %3655 = vrcp.f32 %v2671_v2 }
 0x7ff   :  { %v3414_v61 = vpop.f32.mrf.mxu0 }
 0x800   :  { %v2818_v3 = vadd.f32 %v3414_v61, %v3107_v54 }
 0x801   :  { %v3654_v20 = vpop.eup %3653  ;;  %v2809_v4 = vpop.f32.mrf.mxu0 }
 0x802   :  { %v2682_v8 = vmul.f32 %v3654_v20, %v2681_v0  ;;  %2842 = vst [vmem:[%s4574_s8 + $0x10] sm:$0xff] %v2818_v3  ;;  %v2810_v57 = vadd.f32 %v3107_v54, %v2809_v4 }
 0x803   :  { %v3415_v11 = vpop.f32.mrf.mxu0  ;;  %v3656_v22 = vpop.eup %3655 }
 0x804   :  { %v2683_v14 = vadd.f32 %v2682_v8, %v4042_v30  ;;  %2840 = vst [vmem:[%s4574_s8] sm:$0xff] %v2810_v57  ;;  %v2821_v17 = vadd.f32 %v3415_v11, %v3107_v54  ;;  %v2685_v26 = vsub.f32 1.0, %v3656_v22  ;;  %v2687_v32 = vmul.f32 %v3656_v22, %v4499_v7 }
 0x805   :  { %v2812_v21 = vpop.f32.mrf.mxu0 }
 0x806   :  { %3657 = vtanh.f32 %v2683_v14  ;;  %2843 = vst [vmem:[%s4574_s8 + $0x18] sm:$0xff] %v2821_v17  ;;  %v2813_v43 = vadd.f32 %v3107_v54, %v2812_v21 }
 0x808   :  { %2841 = vst [vmem:[%s4574_s8 + $0x8] sm:$0xff] %v2813_v43 }
 0x813   :  { %v3658_v28 = vpop.eup %3657 }
 0x814   :  { %v2686_v30 = vmul.f32 %v3658_v28, %v2685_v26 }
 0x816   :  { %v2688_v34 = vadd.f32 %v2687_v32, %v2686_v30 }
 0x818   :  { %2689 = vst [vmem:[%s4575_s9] sm:$0xff] %v2688_v34  ;;  %v2703_v48 = vpack.c.bf16 %v2688_v34, %v4499_v7 }
 0x81a   :  { %3417 = vmatmul.mubr.bf16.gmra.mxu0 %v2703_v48 }
 0x8da   :  { %v3418_v39 = vpop.f32.mrf.mxu0 }
 0x8db   :  { %v2834_v10 = vadd.f32 %v3418_v39, %v3107_v54 }
 0x8dc   :  { %v2825_v5 = vpop.f32.mrf.mxu0 }
 0x8dd   :  { %2846 = vst [vmem:[%s4574_s8 + $0x30] sm:$0xff] %v2834_v10  ;;  %v2826_v44 = vadd.f32 %v3107_v54, %v2825_v5 }
 0x8de   :  { %v3419_v46 = vpop.f32.mrf.mxu0 }
 0x8df   :  { %2844 = vst [vmem:[%s4574_s8 + $0x20] sm:$0xff] %v2826_v44  ;;  %v2837_v47 = vadd.f32 %v3419_v46, %v3107_v54 }
 0x8e0   :  { %v2828_v50 = vpop.f32.mrf.mxu0 }
 0x8e1   :  { %2847 = vst [vmem:[%s4574_s8 + $0x38] sm:$0xff] %v2837_v47  ;;  %v2829_v52 = vadd.f32 %v3107_v54, %v2828_v50 }
 0x8e3   :  { %2845 = vst [vmem:[%s4574_s8 + $0x28] sm:$0xff] %v2829_v52 }

</bundles_post_ra>
